<compile_context>
chip_gen: v7x
topology: tpu7x:2x2x1
jax: 0.10.0
libtpu: 0.0.40
codegen_flags: <defaults>
</compile_context>

<pallas_src>
import numpy as np
import jax
import jax.numpy as jnp
from jax import lax
from jax.experimental import pallas as pl
from jax.experimental.pallas import tpu as pltpu

# Model hyperparameters (PyTorch Model defaults).
NTOKENS = 14
N_OUTPUTS = 12947
D_MODEL = 128
NHEAD = 8
HEAD_DIM = D_MODEL // NHEAD
D_HID = 512
NLAYERS = 2
MAX_SEQ_LEN = 183
EPS = 1e-5
SQRT_D = float(np.sqrt(D_MODEL))
INV_SQRT_HD = 1.0 / float(np.sqrt(HEAD_DIM))
TN = 2048  # decoder output tile (lane-dense, multiple of 128)

# Fixed ordering of the stacked per-layer weight tensors (kernel signature).
WKEYS = ("wqkv", "bqkv", "wo", "bo", "g1", "be1",
         "w1", "b1", "w2", "b2", "g2", "be2")


# ----------------------------- kernels --------------------------------------

def _layernorm(x, gamma, beta):
    mean = jnp.mean(x, axis=-1, keepdims=True)
    var = jnp.mean(jnp.square(x - mean), axis=-1, keepdims=True)
    return (x - mean) * lax.rsqrt(var + EPS) * gamma + beta


def encoder_stack_kernel(x_ref, pe_ref,
                         wqkv_ref, bqkv_ref, wo_ref, bo_ref,
                         g1_ref, be1_ref, w1_ref, b1_ref,
                         w2_ref, b2_ref, g2_ref, be2_ref,
                         out_ref):
    # One grid step == one batch element.  The whole encoder (scale + posenc +
    # both post-norm transformer layers) runs here so activations never leave
    # VMEM between layers.
    #
    # pe is indexed by the batch position and broadcast over the seq axis —
    # this faithfully reproduces the PyTorch module's `pe[:x.size(0)]` add on
    # batch_first inputs.  Dropout is identity in eval mode.
    x = x_ref[0] * SQRT_D + pe_ref[0]                           # (S, D)

    for l in range(NLAYERS):
        # --- self attention -------------------------------------------------
        # Fused full-width QKV projection: (S,128) @ (128,384) on the MXU.
        qkv = (jnp.dot(x, wqkv_ref[l], preferred_element_type=jnp.float32)
               + bqkv_ref[l])                                   # (S, 3D)
        q_all = qkv[:, 0:D_MODEL]
        k_all = qkv[:, D_MODEL:2 * D_MODEL]
        v_all = qkv[:, 2 * D_MODEL:3 * D_MODEL]

        heads = []
        for h in range(NHEAD):
            lo, hi = h * HEAD_DIM, (h + 1) * HEAD_DIM
            q = q_all[:, lo:hi]                                 # (S, Dh)
            k = k_all[:, lo:hi]
            v = v_all[:, lo:hi]
            s = lax.dot_general(q, k, (((1,), (1,)), ((), ())),
                                preferred_element_type=jnp.float32) * INV_SQRT_HD
            s = s - jnp.max(s, axis=-1, keepdims=True)
            p = jnp.exp(s)
            p = p * pl.reciprocal(jnp.sum(p, axis=-1, keepdims=True), approx=True)
            heads.append(jnp.dot(p, v, preferred_element_type=jnp.float32))
        ctx = jnp.concatenate(heads, axis=-1)                   # (S, D)

        # Single full-K output projection: (S,128) @ (128,128).
        attn = (jnp.dot(ctx, wo_ref[l], preferred_element_type=jnp.float32)
                + bo_ref[l])

        # --- post-norm residual blocks (norm_first=False) --------------------
        y = _layernorm(x + attn, g1_ref[l], be1_ref[l])
        h1 = jnp.maximum(
            jnp.dot(y, w1_ref[l], preferred_element_type=jnp.float32) + b1_ref[l],
            0.0)
        h2 = jnp.dot(h1, w2_ref[l], preferred_element_type=jnp.float32) + b2_ref[l]
        x = _layernorm(y + h2, g2_ref[l], be2_ref[l])

    out_ref[0] = x


def decoder_kernel(x_ref, w_ref, b_ref, out_ref):
    # bf16 weights (halved HBM traffic — the decoder is pure bandwidth),
    # f32 accumulation on the MXU.
    out_ref[...] = (jnp.dot(x_ref[...].astype(jnp.bfloat16), w_ref[...],
                            preferred_element_type=jnp.float32) + b_ref[...])


# ----------------------------- wrappers -------------------------------------

def transformer_encode(x, pe, lw):
    B, S, D = x.shape
    weights = [lw[k] for k in WKEYS]

    def full_spec(a):
        nd = a.ndim
        return pl.BlockSpec(a.shape, lambda b, _nd=nd: (0,) * _nd)

    in_specs = ([pl.BlockSpec((1, S, D), lambda b: (b, 0, 0)),
                 pl.BlockSpec((1, 1, D), lambda b: (b, 0, 0))]
                + [full_spec(a) for a in weights])
    return pl.pallas_call(
        encoder_stack_kernel,
        grid=(B,),
        in_specs=in_specs,
        out_specs=pl.BlockSpec((1, S, D), lambda b: (b, 0, 0)),
        out_shape=jax.ShapeDtypeStruct((B, S, D), jnp.float32),
        compiler_params=pltpu.CompilerParams(dimension_semantics=("parallel",)),
    )(x, pe, *weights)


def decode(x2d, wt_bf16, b_pad):
    BS, D = x2d.shape
    n_pad = wt_bf16.shape[1]
    # Output written directly at (BS, N_OUTPUTS); Pallas masks the partial
    # last tile, so no post-hoc slice/copy of padded logits is needed.
    return pl.pallas_call(
        decoder_kernel,
        grid=(n_pad // TN,),
        in_specs=[pl.BlockSpec((BS, D), lambda j: (0, 0)),
                  pl.BlockSpec((D, TN), lambda j: (0, j)),
                  pl.BlockSpec((1, TN), lambda j: (0, j))],
        out_specs=pl.BlockSpec((BS, TN), lambda j: (0, j)),
        out_shape=jax.ShapeDtypeStruct((BS, N_OUTPUTS), jnp.float32),
        compiler_params=pltpu.CompilerParams(dimension_semantics=("parallel",)),
    )(x2d, wt_bf16, b_pad)


# --------------------------- parameters -------------------------------------

def _uniform(key, shape, scale):
    return jax.random.uniform(key, shape, jnp.float32, -scale, scale)


def init_params(key):
    k_emb, k_dec, *k_layers = jax.random.split(key, 2 + NLAYERS)

    # nn.Embedding(ntokens, d_model), uniform(-0.1, 0.1)
    embedding = _uniform(k_emb, (NTOKENS, D_MODEL), 0.1)

    # nn.Linear(d_model, n_outputs): weight uniform(-0.1, 0.1), bias zero.
    wd = _uniform(k_dec, (N_OUTPUTS, D_MODEL), 0.1)
    n_pad = TN * int(np.ceil(N_OUTPUTS / TN))
    wd_t_pad = jnp.zeros((D_MODEL, n_pad), jnp.float32).at[:, :N_OUTPUTS].set(wd.T)
    wd_t_bf16 = wd_t_pad.astype(jnp.bfloat16)
    bd_pad = jnp.zeros((1, n_pad), jnp.float32)

    # PositionalEncoding buffer (same construction as the PyTorch module).
    position = np.arange(MAX_SEQ_LEN, dtype=np.float32)[:, None]
    div_term = np.exp(np.arange(0, D_MODEL, 2, dtype=np.float32)
                      * (-np.log(10000.0) / D_MODEL))
    pe = np.zeros((MAX_SEQ_LEN, 1, D_MODEL), np.float32)
    pe[:, 0, 0::2] = np.sin(position * div_term)
    pe[:, 0, 1::2] = np.cos(position * div_term)
    pe = jnp.asarray(pe)

    # Per-layer TransformerEncoderLayer weights, pre-transposed for x @ W and
    # stacked along a leading NLAYERS axis (one fused pallas_call).
    per_layer = {k: [] for k in WKEYS}
    for kl in k_layers:
        ks = jax.random.split(kl, 8)
        w_in = _uniform(ks[0], (3 * D_MODEL, D_MODEL), 1.0 / np.sqrt(D_MODEL))
        b_in = _uniform(ks[1], (3 * D_MODEL,), 0.02)
        w_o = _uniform(ks[2], (D_MODEL, D_MODEL), 1.0 / np.sqrt(D_MODEL))
        b_o = _uniform(ks[3], (D_MODEL,), 0.02)
        w1 = _uniform(ks[4], (D_HID, D_MODEL), 1.0 / np.sqrt(D_MODEL))
        b1 = _uniform(ks[5], (D_HID,), 0.02)
        w2 = _uniform(ks[6], (D_MODEL, D_HID), 1.0 / np.sqrt(D_HID))
        b2 = _uniform(ks[7], (D_MODEL,), 0.02)

        per_layer["wqkv"].append(w_in.T)                        # (D, 3D)
        per_layer["bqkv"].append(b_in.reshape(1, 3 * D_MODEL))
        per_layer["wo"].append(w_o.T)                           # (D, D)
        per_layer["bo"].append(b_o.reshape(1, D_MODEL))
        per_layer["g1"].append(jnp.ones((1, D_MODEL), jnp.float32))
        per_layer["be1"].append(jnp.zeros((1, D_MODEL), jnp.float32))
        per_layer["w1"].append(w1.T)                            # (D, D_HID)
        per_layer["b1"].append(b1.reshape(1, D_HID))
        per_layer["w2"].append(w2.T)                            # (D_HID, D)
        per_layer["b2"].append(b2.reshape(1, D_MODEL))
        per_layer["g2"].append(jnp.ones((1, D_MODEL), jnp.float32))
        per_layer["be2"].append(jnp.zeros((1, D_MODEL), jnp.float32))

    layer_weights = {k: jnp.stack(v) for k, v in per_layer.items()}

    return {"embedding": embedding, "pe": pe, "layer_weights": layer_weights,
            "wd_t_bf16": wd_t_bf16, "bd_pad": bd_pad}


# ----------------------------- forward --------------------------------------

@jax.jit
def model_forward(tokens, params):
    B, S = tokens.shape
    # TODO(synk): the nn.Embedding gather stays in XLA glue (tiny: B*S rows of
    # a 14x128 table); an in-kernel version would need scalar-prefetched ids.
    x = jnp.take(params["embedding"], tokens, axis=0)           # (B, S, D) f32
    x = transformer_encode(x, params["pe"], params["layer_weights"])
    logits = decode(x.reshape(B * S, D_MODEL),
                    params["wd_t_bf16"], params["bd_pad"])
    return logits.reshape(B, S, N_OUTPUTS)


if __name__ == "__main__":
    B, S = 2, 8
    key = jax.random.PRNGKey(0)
    k_tok, k_par = jax.random.split(key)
    tokens = jax.random.randint(k_tok, (B, S), 0, NTOKENS, dtype=jnp.int32)
    params = init_params(k_par)

    out = model_forward(tokens, params)
    out = jax.block_until_ready(out)
    assert out.shape == (B, S, N_OUTPUTS), out.shape
    assert bool(jnp.all(jnp.isfinite(out)))
    print("KERNEL_OK")
</pallas_src>

<mosaic_0001>
module attributes {stable_mosaic.version = 11 : i64} {
  func.func @decoder_kernel(%arg0: i32, %arg1: memref<16x128xf32, #tpu.memory_space<vmem>>, %arg2: memref<128x2048xbf16, #tpu.memory_space<vmem>>, %arg3: memref<1x2048xf32, #tpu.memory_space<vmem>>, %arg4: memref<16x2048xf32, #tpu.memory_space<vmem>>) attributes {dimension_semantics = [#tpu.dimension_semantics<parallel>], iteration_bounds = array<i64: 7>, scalar_prefetch = 0 : i64, scratch_operands = 0 : i64, tpu.core_type = #tpu.core_type<tc>, window_params = [{pipeline_mode = #tpu.pipeline_mode<synchronous>, transform_indices = @transform_0, window_bounds = array<i64: 16, 128>}, {transform_indices = @transform_1, window_bounds = array<i64: 128, 2048>}, {transform_indices = @transform_2, window_bounds = array<i64: 1, 2048>}, {transform_indices = @transform_3, window_bounds = array<i64: 16, 2048>}]} {
    %c0 = arith.constant 0 : index
    %c0_0 = arith.constant 0 : index
    %0 = vector.load %arg1[%c0, %c0_0] : memref<16x128xf32, #tpu.memory_space<vmem>>, vector<16x128xf32>
    %1 = arith.truncf %0 : vector<16x128xf32> to vector<16x128xbf16>
    %c0_1 = arith.constant 0 : index
    %c0_2 = arith.constant 0 : index
    %2 = vector.load %arg2[%c0_1, %c0_2] : memref<128x2048xbf16, #tpu.memory_space<vmem>>, vector<128x2048xbf16>
    %cst = arith.constant dense<0.000000e+00> : vector<16x2048xf32>
    %3 = tpu.matmul %1, %2, %cst {dimension_numbers = #tpu.dot_dimension_numbers<[1], [0], [0], [1], [0, 0, 1, 1], [], []>} : vector<16x128xbf16>, vector<128x2048xbf16>, vector<16x2048xf32> -> vector<16x2048xf32>
    %c0_3 = arith.constant 0 : index
    %c0_4 = arith.constant 0 : index
    %4 = vector.load %arg3[%c0_3, %c0_4] : memref<1x2048xf32, #tpu.memory_space<vmem>>, vector<1x2048xf32>
    %5 = vector.broadcast %4 : vector<1x2048xf32> to vector<16x2048xf32>
    %6 = arith.addf %3, %5 : vector<16x2048xf32>
    %c0_5 = arith.constant 0 : index
    %c0_6 = arith.constant 0 : index
    %7 = vector.load %arg4[%c0_5, %c0_6] : memref<16x2048xf32, #tpu.memory_space<vmem>>, vector<16x2048xf32>
    tpu.vector_store %arg4[%c0_5, %c0_6], %6 {strides = array<i32>} : memref<16x2048xf32, #tpu.memory_space<vmem>>, vector<16x2048xf32>,
    return
  }
  func.func @transform_0(%arg0: i32) -> (i32, i32) {
    %c0_i32 = arith.constant 0 : i32
    %c0_i32_0 = arith.constant 0 : i32
    %c0_i32_1 = arith.constant 0 : i32
    return %c0_i32, %c0_i32_0 : i32, i32
  }
  func.func @transform_1(%arg0: i32) -> (i32, i32) {
    %c0_i32 = arith.constant 0 : i32
    %c0_i32_0 = arith.constant 0 : i32
    return %c0_i32, %arg0 : i32, i32
  }
  func.func @transform_2(%arg0: i32) -> (i32, i32) {
    %c0_i32 = arith.constant 0 : i32
    %c0_i32_0 = arith.constant 0 : i32
    return %c0_i32, %arg0 : i32, i32
  }
  func.func @transform_3(%arg0: i32) -> (i32, i32) {
    %c0_i32 = arith.constant 0 : i32
    %c0_i32_0 = arith.constant 0 : i32
    return %c0_i32, %arg0 : i32, i32
  }
}

module attributes {stable_mosaic.version = 11 : i64} {
  func.func @encoder_stack_kernel(%arg0: i32, %arg1: memref<1x8x128xf32, #tpu.memory_space<vmem>>, %arg2: memref<1x1x128xf32, #tpu.memory_space<vmem>>, %arg3: memref<2x128x384xf32, #tpu.memory_space<vmem>>, %arg4: memref<2x1x384xf32, #tpu.memory_space<vmem>>, %arg5: memref<2x128x128xf32, #tpu.memory_space<vmem>>, %arg6: memref<2x1x128xf32, #tpu.memory_space<vmem>>, %arg7: memref<2x1x128xf32, #tpu.memory_space<vmem>>, %arg8: memref<2x1x128xf32, #tpu.memory_space<vmem>>, %arg9: memref<2x128x512xf32, #tpu.memory_space<vmem>>, %arg10: memref<2x1x512xf32, #tpu.memory_space<vmem>>, %arg11: memref<2x512x128xf32, #tpu.memory_space<vmem>>, %arg12: memref<2x1x128xf32, #tpu.memory_space<vmem>>, %arg13: memref<2x1x128xf32, #tpu.memory_space<vmem>>, %arg14: memref<2x1x128xf32, #tpu.memory_space<vmem>>, %arg15: memref<1x8x128xf32, #tpu.memory_space<vmem>>) attributes {dimension_semantics = [#tpu.dimension_semantics<parallel>], iteration_bounds = array<i64: 2>, scalar_prefetch = 0 : i64, scratch_operands = 0 : i64, tpu.core_type = #tpu.core_type<tc>, window_params = [{transform_indices = @transform_0, window_bounds = array<i64: 1, 8, 128>}, {transform_indices = @transform_1, window_bounds = array<i64: 1, 1, 128>}, {pipeline_mode = #tpu.pipeline_mode<synchronous>, transform_indices = @transform_2, window_bounds = array<i64: 2, 128, 384>}, {pipeline_mode = #tpu.pipeline_mode<synchronous>, transform_indices = @transform_3, window_bounds = array<i64: 2, 1, 384>}, {pipeline_mode = #tpu.pipeline_mode<synchronous>, transform_indices = @transform_4, window_bounds = array<i64: 2, 128, 128>}, {pipeline_mode = #tpu.pipeline_mode<synchronous>, transform_indices = @transform_5, window_bounds = array<i64: 2, 1, 128>}, {pipeline_mode = #tpu.pipeline_mode<synchronous>, transform_indices = @transform_6, window_bounds = array<i64: 2, 1, 128>}, {pipeline_mode = #tpu.pipeline_mode<synchronous>, transform_indices = @transform_7, window_bounds = array<i64: 2, 1, 128>}, {pipeline_mode = #tpu.pipeline_mode<synchronous>, transform_indices = @transform_8, window_bounds = array<i64: 2, 128, 512>}, {pipeline_mode = #tpu.pipeline_mode<synchronous>, transform_indices = @transform_9, window_bounds = array<i64: 2, 1, 512>}, {pipeline_mode = #tpu.pipeline_mode<synchronous>, transform_indices = @transform_10, window_bounds = array<i64: 2, 512, 128>}, {pipeline_mode = #tpu.pipeline_mode<synchronous>, transform_indices = @transform_11, window_bounds = array<i64: 2, 1, 128>}, {pipeline_mode = #tpu.pipeline_mode<synchronous>, transform_indices = @transform_12, window_bounds = array<i64: 2, 1, 128>}, {pipeline_mode = #tpu.pipeline_mode<synchronous>, transform_indices = @transform_13, window_bounds = array<i64: 2, 1, 128>}, {transform_indices = @transform_14, window_bounds = array<i64: 1, 8, 128>}]} {
    %c0 = arith.constant 0 : index
    %c0_0 = arith.constant 0 : index
    %c0_1 = arith.constant 0 : index
    %0 = vector.load %arg1[%c0, %c0_0, %c0_1] : memref<1x8x128xf32, #tpu.memory_space<vmem>>, vector<1x8x128xf32>
    %1 = vector.shape_cast %0 : vector<1x8x128xf32> to vector<8x128xf32>
    %cst = arith.constant 11.3137083 : f32
    %2 = vector.broadcast %cst : f32 to vector<8x128xf32>
    %3 = arith.mulf %1, %2 : vector<8x128xf32>
    %c0_2 = arith.constant 0 : index
    %c0_3 = arith.constant 0 : index
    %c0_4 = arith.constant 0 : index
    %4 = vector.load %arg2[%c0_2, %c0_3, %c0_4] : memref<1x1x128xf32, #tpu.memory_space<vmem>>, vector<1x1x128xf32>
    %5 = vector.shape_cast %4 : vector<1x1x128xf32> to vector<1x128xf32>
    %6 = vector.broadcast %5 : vector<1x128xf32> to vector<8x128xf32>
    %7 = arith.addf %3, %6 : vector<8x128xf32>
    %c0_5 = arith.constant 0 : index
    %c0_6 = arith.constant 0 : index
    %c0_7 = arith.constant 0 : index
    %8 = vector.load %arg3[%c0_5, %c0_6, %c0_7] : memref<2x128x384xf32, #tpu.memory_space<vmem>>, vector<1x128x384xf32>
    %9 = vector.shape_cast %8 : vector<1x128x384xf32> to vector<128x384xf32>
    %cst_8 = arith.constant dense<0.000000e+00> : vector<8x384xf32>
    %10 = tpu.matmul %7, %9, %cst_8 {dimension_numbers = #tpu.dot_dimension_numbers<[1], [0], [0], [1], [0, 0, 1, 1], [], []>} : vector<8x128xf32>, vector<128x384xf32>, vector<8x384xf32> -> vector<8x384xf32>
    %c0_9 = arith.constant 0 : index
    %c0_10 = arith.constant 0 : index
    %c0_11 = arith.constant 0 : index
    %11 = vector.load %arg4[%c0_9, %c0_10, %c0_11] : memref<2x1x384xf32, #tpu.memory_space<vmem>>, vector<1x1x384xf32>
    %12 = vector.shape_cast %11 : vector<1x1x384xf32> to vector<1x384xf32>
    %13 = vector.broadcast %12 : vector<1x384xf32> to vector<8x384xf32>
    %14 = arith.addf %10, %13 : vector<8x384xf32>
    %15 = vector.extract_strided_slice %14 {offsets = [0, 0], sizes = [8, 128], strides = [1, 1]} : vector<8x384xf32> to vector<8x128xf32>
    %16 = vector.extract_strided_slice %14 {offsets = [0, 128], sizes = [8, 128], strides = [1, 1]} : vector<8x384xf32> to vector<8x128xf32>
    %17 = vector.extract_strided_slice %14 {offsets = [0, 256], sizes = [8, 128], strides = [1, 1]} : vector<8x384xf32> to vector<8x128xf32>
    %18 = vector.extract_strided_slice %15 {offsets = [0, 0], sizes = [8, 16], strides = [1, 1]} : vector<8x128xf32> to vector<8x16xf32>
    %19 = vector.extract_strided_slice %16 {offsets = [0, 0], sizes = [8, 16], strides = [1, 1]} : vector<8x128xf32> to vector<8x16xf32>
    %20 = vector.extract_strided_slice %17 {offsets = [0, 0], sizes = [8, 16], strides = [1, 1]} : vector<8x128xf32> to vector<8x16xf32>
    %cst_12 = arith.constant dense<0.000000e+00> : vector<8x8xf32>
    %21 = tpu.matmul %18, %19, %cst_12 {dimension_numbers = #tpu.dot_dimension_numbers<[1], [1], [0], [0], [0, 0, 1, 0], [], []>} : vector<8x16xf32>, vector<8x16xf32>, vector<8x8xf32> -> vector<8x8xf32>
    %cst_13 = arith.constant 2.500000e-01 : f32
    %22 = vector.broadcast %cst_13 : f32 to vector<8x8xf32>
    %23 = arith.mulf %21, %22 : vector<8x8xf32>
    %cst_14 = arith.constant dense<0xFF800000> : vector<8xf32>
    %24 = vector.multi_reduction <maximumf>, %23, %cst_14 [1] : vector<8x8xf32> to vector<8xf32>
    %25 = vector.shape_cast %24 : vector<8xf32> to vector<8x1xf32>
    %26 = vector.broadcast %25 : vector<8x1xf32> to vector<8x8xf32>
    %27 = arith.subf %23, %26 : vector<8x8xf32>
    %28 = math.exp %27 : vector<8x8xf32>
    %cst_15 = arith.constant dense<0.000000e+00> : vector<8xf32>
    %29 = vector.multi_reduction <add>, %28, %cst_15 [1] : vector<8x8xf32> to vector<8xf32>
    %30 = vector.shape_cast %29 : vector<8xf32> to vector<8x1xf32>
    %31 = tpu.reciprocal %30 {approx = true} : vector<8x1xf32> -> vector<8x1xf32>
    %32 = vector.broadcast %31 : vector<8x1xf32> to vector<8x8xf32>
    %33 = arith.mulf %28, %32 : vector<8x8xf32>
    %cst_16 = arith.constant dense<0.000000e+00> : vector<8x16xf32>
    %34 = tpu.matmul %33, %20, %cst_16 {dimension_numbers = #tpu.dot_dimension_numbers<[1], [0], [0], [1], [0, 0, 1, 1], [], []>} : vector<8x8xf32>, vector<8x16xf32>, vector<8x16xf32> -> vector<8x16xf32>
    %35 = vector.extract_strided_slice %15 {offsets = [0, 16], sizes = [8, 16], strides = [1, 1]} : vector<8x128xf32> to vector<8x16xf32>
    %36 = vector.extract_strided_slice %16 {offsets = [0, 16], sizes = [8, 16], strides = [1, 1]} : vector<8x128xf32> to vector<8x16xf32>
    %37 = vector.extract_strided_slice %17 {offsets = [0, 16], sizes = [8, 16], strides = [1, 1]} : vector<8x128xf32> to vector<8x16xf32>
    %cst_17 = arith.constant dense<0.000000e+00> : vector<8x8xf32>
    %38 = tpu.matmul %35, %36, %cst_17 {dimension_numbers = #tpu.dot_dimension_numbers<[1], [1], [0], [0], [0, 0, 1, 0], [], []>} : vector<8x16xf32>, vector<8x16xf32>, vector<8x8xf32> -> vector<8x8xf32>
    %cst_18 = arith.constant 2.500000e-01 : f32
    %39 = vector.broadcast %cst_18 : f32 to vector<8x8xf32>
    %40 = arith.mulf %38, %39 : vector<8x8xf32>
    %cst_19 = arith.constant dense<0xFF800000> : vector<8xf32>
    %41 = vector.multi_reduction <maximumf>, %40, %cst_19 [1] : vector<8x8xf32> to vector<8xf32>
    %42 = vector.shape_cast %41 : vector<8xf32> to vector<8x1xf32>
    %43 = vector.broadcast %42 : vector<8x1xf32> to vector<8x8xf32>
    %44 = arith.subf %40, %43 : vector<8x8xf32>
    %45 = math.exp %44 : vector<8x8xf32>
    %cst_20 = arith.constant dense<0.000000e+00> : vector<8xf32>
    %46 = vector.multi_reduction <add>, %45, %cst_20 [1] : vector<8x8xf32> to vector<8xf32>
    %47 = vector.shape_cast %46 : vector<8xf32> to vector<8x1xf32>
    %48 = tpu.reciprocal %47 {approx = true} : vector<8x1xf32> -> vector<8x1xf32>
    %49 = vector.broadcast %48 : vector<8x1xf32> to vector<8x8xf32>
    %50 = arith.mulf %45, %49 : vector<8x8xf32>
    %cst_21 = arith.constant dense<0.000000e+00> : vector<8x16xf32>
    %51 = tpu.matmul %50, %37, %cst_21 {dimension_numbers = #tpu.dot_dimension_numbers<[1], [0], [0], [1], [0, 0, 1, 1], [], []>} : vector<8x8xf32>, vector<8x16xf32>, vector<8x16xf32> -> vector<8x16xf32>
    %52 = vector.extract_strided_slice %15 {offsets = [0, 32], sizes = [8, 16], strides = [1, 1]} : vector<8x128xf32> to vector<8x16xf32>
    %53 = vector.extract_strided_slice %16 {offsets = [0, 32], sizes = [8, 16], strides = [1, 1]} : vector<8x128xf32> to vector<8x16xf32>
    %54 = vector.extract_strided_slice %17 {offsets = [0, 32], sizes = [8, 16], strides = [1, 1]} : vector<8x128xf32> to vector<8x16xf32>
    %cst_22 = arith.constant dense<0.000000e+00> : vector<8x8xf32>
    %55 = tpu.matmul %52, %53, %cst_22 {dimension_numbers = #tpu.dot_dimension_numbers<[1], [1], [0], [0], [0, 0, 1, 0], [], []>} : vector<8x16xf32>, vector<8x16xf32>, vector<8x8xf32> -> vector<8x8xf32>
    %cst_23 = arith.constant 2.500000e-01 : f32
    %56 = vector.broadcast %cst_23 : f32 to vector<8x8xf32>
    %57 = arith.mulf %55, %56 : vector<8x8xf32>
    %cst_24 = arith.constant dense<0xFF800000> : vector<8xf32>
    %58 = vector.multi_reduction <maximumf>, %57, %cst_24 [1] : vector<8x8xf32> to vector<8xf32>
    %59 = vector.shape_cast %58 : vector<8xf32> to vector<8x1xf32>
    %60 = vector.broadcast %59 : vector<8x1xf32> to vector<8x8xf32>
    %61 = arith.subf %57, %60 : vector<8x8xf32>
    %62 = math.exp %61 : vector<8x8xf32>
    %cst_25 = arith.constant dense<0.000000e+00> : vector<8xf32>
    %63 = vector.multi_reduction <add>, %62, %cst_25 [1] : vector<8x8xf32> to vector<8xf32>
    %64 = vector.shape_cast %63 : vector<8xf32> to vector<8x1xf32>
    %65 = tpu.reciprocal %64 {approx = true} : vector<8x1xf32> -> vector<8x1xf32>
    %66 = vector.broadcast %65 : vector<8x1xf32> to vector<8x8xf32>
    %67 = arith.mulf %62, %66 : vector<8x8xf32>
    %cst_26 = arith.constant dense<0.000000e+00> : vector<8x16xf32>
    %68 = tpu.matmul %67, %54, %cst_26 {dimension_numbers = #tpu.dot_dimension_numbers<[1], [0], [0], [1], [0, 0, 1, 1], [], []>} : vector<8x8xf32>, vector<8x16xf32>, vector<8x16xf32> -> vector<8x16xf32>
    %69 = vector.extract_strided_slice %15 {offsets = [0, 48], sizes = [8, 16], strides = [1, 1]} : vector<8x128xf32> to vector<8x16xf32>
    %70 = vector.extract_strided_slice %16 {offsets = [0, 48], sizes = [8, 16], strides = [1, 1]} : vector<8x128xf32> to vector<8x16xf32>
    %71 = vector.extract_strided_slice %17 {offsets = [0, 48], sizes = [8, 16], strides = [1, 1]} : vector<8x128xf32> to vector<8x16xf32>
    %cst_27 = arith.constant dense<0.000000e+00> : vector<8x8xf32>
    %72 = tpu.matmul %69, %70, %cst_27 {dimension_numbers = #tpu.dot_dimension_numbers<[1], [1], [0], [0], [0, 0, 1, 0], [], []>} : vector<8x16xf32>, vector<8x16xf32>, vector<8x8xf32> -> vector<8x8xf32>
    %cst_28 = arith.constant 2.500000e-01 : f32
    %73 = vector.broadcast %cst_28 : f32 to vector<8x8xf32>
    %74 = arith.mulf %72, %73 : vector<8x8xf32>
    %cst_29 = arith.constant dense<0xFF800000> : vector<8xf32>
    %75 = vector.multi_reduction <maximumf>, %74, %cst_29 [1] : vector<8x8xf32> to vector<8xf32>
    %76 = vector.shape_cast %75 : vector<8xf32> to vector<8x1xf32>
    %77 = vector.broadcast %76 : vector<8x1xf32> to vector<8x8xf32>
    %78 = arith.subf %74, %77 : vector<8x8xf32>
    %79 = math.exp %78 : vector<8x8xf32>
    %cst_30 = arith.constant dense<0.000000e+00> : vector<8xf32>
    %80 = vector.multi_reduction <add>, %79, %cst_30 [1] : vector<8x8xf32> to vector<8xf32>
    %81 = vector.shape_cast %80 : vector<8xf32> to vector<8x1xf32>
    %82 = tpu.reciprocal %81 {approx = true} : vector<8x1xf32> -> vector<8x1xf32>
    %83 = vector.broadcast %82 : vector<8x1xf32> to vector<8x8xf32>
    %84 = arith.mulf %79, %83 : vector<8x8xf32>
    %cst_31 = arith.constant dense<0.000000e+00> : vector<8x16xf32>
    %85 = tpu.matmul %84, %71, %cst_31 {dimension_numbers = #tpu.dot_dimension_numbers<[1], [0], [0], [1], [0, 0, 1, 1], [], []>} : vector<8x8xf32>, vector<8x16xf32>, vector<8x16xf32> -> vector<8x16xf32>
    %86 = vector.extract_strided_slice %15 {offsets = [0, 64], sizes = [8, 16], strides = [1, 1]} : vector<8x128xf32> to vector<8x16xf32>
    %87 = vector.extract_strided_slice %16 {offsets = [0, 64], sizes = [8, 16], strides = [1, 1]} : vector<8x128xf32> to vector<8x16xf32>
    %88 = vector.extract_strided_slice %17 {offsets = [0, 64], sizes = [8, 16], strides = [1, 1]} : vector<8x128xf32> to vector<8x16xf32>
    %cst_32 = arith.constant dense<0.000000e+00> : vector<8x8xf32>
    %89 = tpu.matmul %86, %87, %cst_32 {dimension_numbers = #tpu.dot_dimension_numbers<[1], [1], [0], [0], [0, 0, 1, 0], [], []>} : vector<8x16xf32>, vector<8x16xf32>, vector<8x8xf32> -> vector<8x8xf32>
    %cst_33 = arith.constant 2.500000e-01 : f32
    %90 = vector.broadcast %cst_33 : f32 to vector<8x8xf32>
    %91 = arith.mulf %89, %90 : vector<8x8xf32>
    %cst_34 = arith.constant dense<0xFF800000> : vector<8xf32>
    %92 = vector.multi_reduction <maximumf>, %91, %cst_34 [1] : vector<8x8xf32> to vector<8xf32>
    %93 = vector.shape_cast %92 : vector<8xf32> to vector<8x1xf32>
    %94 = vector.broadcast %93 : vector<8x1xf32> to vector<8x8xf32>
    %95 = arith.subf %91, %94 : vector<8x8xf32>
    %96 = math.exp %95 : vector<8x8xf32>
    %cst_35 = arith.constant dense<0.000000e+00> : vector<8xf32>
    %97 = vector.multi_reduction <add>, %96, %cst_35 [1] : vector<8x8xf32> to vector<8xf32>
    %98 = vector.shape_cast %97 : vector<8xf32> to vector<8x1xf32>
    %99 = tpu.reciprocal %98 {approx = true} : vector<8x1xf32> -> vector<8x1xf32>
    %100 = vector.broadcast %99 : vector<8x1xf32> to vector<8x8xf32>
    %101 = arith.mulf %96, %100 : vector<8x8xf32>
    %cst_36 = arith.constant dense<0.000000e+00> : vector<8x16xf32>
    %102 = tpu.matmul %101, %88, %cst_36 {dimension_numbers = #tpu.dot_dimension_numbers<[1], [0], [0], [1], [0, 0, 1, 1], [], []>} : vector<8x8xf32>, vector<8x16xf32>, vector<8x16xf32> -> vector<8x16xf32>
    %103 = vector.extract_strided_slice %15 {offsets = [0, 80], sizes = [8, 16], strides = [1, 1]} : vector<8x128xf32> to vector<8x16xf32>
    %104 = vector.extract_strided_slice %16 {offsets = [0, 80], sizes = [8, 16], strides = [1, 1]} : vector<8x128xf32> to vector<8x16xf32>
    %105 = vector.extract_strided_slice %17 {offsets = [0, 80], sizes = [8, 16], strides = [1, 1]} : vector<8x128xf32> to vector<8x16xf32>
    %cst_37 = arith.constant dense<0.000000e+00> : vector<8x8xf32>
    %106 = tpu.matmul %103, %104, %cst_37 {dimension_numbers = #tpu.dot_dimension_numbers<[1], [1], [0], [0], [0, 0, 1, 0], [], []>} : vector<8x16xf32>, vector<8x16xf32>, vector<8x8xf32> -> vector<8x8xf32>
    %cst_38 = arith.constant 2.500000e-01 : f32
    %107 = vector.broadcast %cst_38 : f32 to vector<8x8xf32>
    %108 = arith.mulf %106, %107 : vector<8x8xf32>
    %cst_39 = arith.constant dense<0xFF800000> : vector<8xf32>
    %109 = vector.multi_reduction <maximumf>, %108, %cst_39 [1] : vector<8x8xf32> to vector<8xf32>
    %110 = vector.shape_cast %109 : vector<8xf32> to vector<8x1xf32>
    %111 = vector.broadcast %110 : vector<8x1xf32> to vector<8x8xf32>
    %112 = arith.subf %108, %111 : vector<8x8xf32>
    %113 = math.exp %112 : vector<8x8xf32>
    %cst_40 = arith.constant dense<0.000000e+00> : vector<8xf32>
    %114 = vector.multi_reduction <add>, %113, %cst_40 [1] : vector<8x8xf32> to vector<8xf32>
    %115 = vector.shape_cast %114 : vector<8xf32> to vector<8x1xf32>
    %116 = tpu.reciprocal %115 {approx = true} : vector<8x1xf32> -> vector<8x1xf32>
    %117 = vector.broadcast %116 : vector<8x1xf32> to vector<8x8xf32>
    %118 = arith.mulf %113, %117 : vector<8x8xf32>
    %cst_41 = arith.constant dense<0.000000e+00> : vector<8x16xf32>
    %119 = tpu.matmul %118, %105, %cst_41 {dimension_numbers = #tpu.dot_dimension_numbers<[1], [0], [0], [1], [0, 0, 1, 1], [], []>} : vector<8x8xf32>, vector<8x16xf32>, vector<8x16xf32> -> vector<8x16xf32>
    %120 = vector.extract_strided_slice %15 {offsets = [0, 96], sizes = [8, 16], strides = [1, 1]} : vector<8x128xf32> to vector<8x16xf32>
    %121 = vector.extract_strided_slice %16 {offsets = [0, 96], sizes = [8, 16], strides = [1, 1]} : vector<8x128xf32> to vector<8x16xf32>
    %122 = vector.extract_strided_slice %17 {offsets = [0, 96], sizes = [8, 16], strides = [1, 1]} : vector<8x128xf32> to vector<8x16xf32>
    %cst_42 = arith.constant dense<0.000000e+00> : vector<8x8xf32>
    %123 = tpu.matmul %120, %121, %cst_42 {dimension_numbers = #tpu.dot_dimension_numbers<[1], [1], [0], [0], [0, 0, 1, 0], [], []>} : vector<8x16xf32>, vector<8x16xf32>, vector<8x8xf32> -> vector<8x8xf32>
    %cst_43 = arith.constant 2.500000e-01 : f32
    %124 = vector.broadcast %cst_43 : f32 to vector<8x8xf32>
    %125 = arith.mulf %123, %124 : vector<8x8xf32>
    %cst_44 = arith.constant dense<0xFF800000> : vector<8xf32>
    %126 = vector.multi_reduction <maximumf>, %125, %cst_44 [1] : vector<8x8xf32> to vector<8xf32>
    %127 = vector.shape_cast %126 : vector<8xf32> to vector<8x1xf32>
    %128 = vector.broadcast %127 : vector<8x1xf32> to vector<8x8xf32>
    %129 = arith.subf %125, %128 : vector<8x8xf32>
    %130 = math.exp %129 : vector<8x8xf32>
    %cst_45 = arith.constant dense<0.000000e+00> : vector<8xf32>
    %131 = vector.multi_reduction <add>, %130, %cst_45 [1] : vector<8x8xf32> to vector<8xf32>
    %132 = vector.shape_cast %131 : vector<8xf32> to vector<8x1xf32>
    %133 = tpu.reciprocal %132 {approx = true} : vector<8x1xf32> -> vector<8x1xf32>
    %134 = vector.broadcast %133 : vector<8x1xf32> to vector<8x8xf32>
    %135 = arith.mulf %130, %134 : vector<8x8xf32>
    %cst_46 = arith.constant dense<0.000000e+00> : vector<8x16xf32>
    %136 = tpu.matmul %135, %122, %cst_46 {dimension_numbers = #tpu.dot_dimension_numbers<[1], [0], [0], [1], [0, 0, 1, 1], [], []>} : vector<8x8xf32>, vector<8x16xf32>, vector<8x16xf32> -> vector<8x16xf32>
    %137 = vector.extract_strided_slice %15 {offsets = [0, 112], sizes = [8, 16], strides = [1, 1]} : vector<8x128xf32> to vector<8x16xf32>
    %138 = vector.extract_strided_slice %16 {offsets = [0, 112], sizes = [8, 16], strides = [1, 1]} : vector<8x128xf32> to vector<8x16xf32>
    %139 = vector.extract_strided_slice %17 {offsets = [0, 112], sizes = [8, 16], strides = [1, 1]} : vector<8x128xf32> to vector<8x16xf32>
    %cst_47 = arith.constant dense<0.000000e+00> : vector<8x8xf32>
    %140 = tpu.matmul %137, %138, %cst_47 {dimension_numbers = #tpu.dot_dimension_numbers<[1], [1], [0], [0], [0, 0, 1, 0], [], []>} : vector<8x16xf32>, vector<8x16xf32>, vector<8x8xf32> -> vector<8x8xf32>
    %cst_48 = arith.constant 2.500000e-01 : f32
    %141 = vector.broadcast %cst_48 : f32 to vector<8x8xf32>
    %142 = arith.mulf %140, %141 : vector<8x8xf32>
    %cst_49 = arith.constant dense<0xFF800000> : vector<8xf32>
    %143 = vector.multi_reduction <maximumf>, %142, %cst_49 [1] : vector<8x8xf32> to vector<8xf32>
    %144 = vector.shape_cast %143 : vector<8xf32> to vector<8x1xf32>
    %145 = vector.broadcast %144 : vector<8x1xf32> to vector<8x8xf32>
    %146 = arith.subf %142, %145 : vector<8x8xf32>
    %147 = math.exp %146 : vector<8x8xf32>
    %cst_50 = arith.constant dense<0.000000e+00> : vector<8xf32>
    %148 = vector.multi_reduction <add>, %147, %cst_50 [1] : vector<8x8xf32> to vector<8xf32>
    %149 = vector.shape_cast %148 : vector<8xf32> to vector<8x1xf32>
    %150 = tpu.reciprocal %149 {approx = true} : vector<8x1xf32> -> vector<8x1xf32>
    %151 = vector.broadcast %150 : vector<8x1xf32> to vector<8x8xf32>
    %152 = arith.mulf %147, %151 : vector<8x8xf32>
    %cst_51 = arith.constant dense<0.000000e+00> : vector<8x16xf32>
    %153 = tpu.matmul %152, %139, %cst_51 {dimension_numbers = #tpu.dot_dimension_numbers<[1], [0], [0], [1], [0, 0, 1, 1], [], []>} : vector<8x8xf32>, vector<8x16xf32>, vector<8x16xf32> -> vector<8x16xf32>
    %154 = tpu.concatenate %34, %51, %68, %85, %102, %119, %136, %153 in 1 : vector<8x16xf32>, vector<8x16xf32>, vector<8x16xf32>, vector<8x16xf32>, vector<8x16xf32>, vector<8x16xf32>, vector<8x16xf32>, vector<8x16xf32> -> vector<8x128xf32>
    %c0_52 = arith.constant 0 : index
    %c0_53 = arith.constant 0 : index
    %c0_54 = arith.constant 0 : index
    %155 = vector.load %arg5[%c0_52, %c0_53, %c0_54] : memref<2x128x128xf32, #tpu.memory_space<vmem>>, vector<1x128x128xf32>
    %156 = vector.shape_cast %155 : vector<1x128x128xf32> to vector<128x128xf32>
    %cst_55 = arith.constant dense<0.000000e+00> : vector<8x128xf32>
    %157 = tpu.matmul %154, %156, %cst_55 {dimension_numbers = #tpu.dot_dimension_numbers<[1], [0], [0], [1], [0, 0, 1, 1], [], []>} : vector<8x128xf32>, vector<128x128xf32>, vector<8x128xf32> -> vector<8x128xf32>
    %c0_56 = arith.constant 0 : index
    %c0_57 = arith.constant 0 : index
    %c0_58 = arith.constant 0 : index
    %158 = vector.load %arg6[%c0_56, %c0_57, %c0_58] : memref<2x1x128xf32, #tpu.memory_space<vmem>>, vector<1x1x128xf32>
    %159 = vector.shape_cast %158 : vector<1x1x128xf32> to vector<1x128xf32>
    %160 = vector.broadcast %159 : vector<1x128xf32> to vector<8x128xf32>
    %161 = arith.addf %157, %160 : vector<8x128xf32>
    %162 = arith.addf %7, %161 : vector<8x128xf32>
    %c0_59 = arith.constant 0 : index
    %c0_60 = arith.constant 0 : index
    %c0_61 = arith.constant 0 : index
    %163 = vector.load %arg7[%c0_59, %c0_60, %c0_61] : memref<2x1x128xf32, #tpu.memory_space<vmem>>, vector<1x1x128xf32>
    %164 = vector.shape_cast %163 : vector<1x1x128xf32> to vector<1x128xf32>
    %c0_62 = arith.constant 0 : index
    %c0_63 = arith.constant 0 : index
    %c0_64 = arith.constant 0 : index
    %165 = vector.load %arg8[%c0_62, %c0_63, %c0_64] : memref<2x1x128xf32, #tpu.memory_space<vmem>>, vector<1x1x128xf32>
    %166 = vector.shape_cast %165 : vector<1x1x128xf32> to vector<1x128xf32>
    %cst_65 = arith.constant dense<0.000000e+00> : vector<8xf32>
    %167 = vector.multi_reduction <add>, %162, %cst_65 [1] : vector<8x128xf32> to vector<8xf32>
    %168 = vector.shape_cast %167 : vector<8xf32> to vector<8x1xf32>
    %cst_66 = arith.constant 1.280000e+02 : f32
    %169 = vector.broadcast %cst_66 : f32 to vector<8x1xf32>
    %170 = arith.divf %168, %169 : vector<8x1xf32>
    %171 = vector.broadcast %170 : vector<8x1xf32> to vector<8x128xf32>
    %172 = arith.subf %162, %171 : vector<8x128xf32>
    %173 = arith.mulf %172, %172 : vector<8x128xf32>
    %cst_67 = arith.constant dense<0.000000e+00> : vector<8xf32>
    %174 = vector.multi_reduction <add>, %173, %cst_67 [1] : vector<8x128xf32> to vector<8xf32>
    %175 = vector.shape_cast %174 : vector<8xf32> to vector<8x1xf32>
    %cst_68 = arith.constant 1.280000e+02 : f32
    %176 = vector.broadcast %cst_68 : f32 to vector<8x1xf32>
    %177 = arith.divf %175, %176 : vector<8x1xf32>
    %178 = vector.broadcast %170 : vector<8x1xf32> to vector<8x128xf32>
    %179 = arith.subf %162, %178 : vector<8x128xf32>
    %cst_69 = arith.constant 9.99999974E-6 : f32
    %180 = vector.broadcast %cst_69 : f32 to vector<8x1xf32>
    %181 = arith.addf %177, %180 : vector<8x1xf32>
    %182 = math.rsqrt %181 : vector<8x1xf32>
    %183 = vector.broadcast %182 : vector<8x1xf32> to vector<8x128xf32>
    %184 = arith.mulf %179, %183 : vector<8x128xf32>
    %185 = vector.broadcast %164 : vector<1x128xf32> to vector<8x128xf32>
    %186 = arith.mulf %184, %185 : vector<8x128xf32>
    %187 = vector.broadcast %166 : vector<1x128xf32> to vector<8x128xf32>
    %188 = arith.addf %186, %187 : vector<8x128xf32>
    %c0_70 = arith.constant 0 : index
    %c0_71 = arith.constant 0 : index
    %c0_72 = arith.constant 0 : index
    %189 = vector.load %arg9[%c0_70, %c0_71, %c0_72] : memref<2x128x512xf32, #tpu.memory_space<vmem>>, vector<1x128x512xf32>
    %190 = vector.shape_cast %189 : vector<1x128x512xf32> to vector<128x512xf32>
    %cst_73 = arith.constant dense<0.000000e+00> : vector<8x512xf32>
    %191 = tpu.matmul %188, %190, %cst_73 {dimension_numbers = #tpu.dot_dimension_numbers<[1], [0], [0], [1], [0, 0, 1, 1], [], []>} : vector<8x128xf32>, vector<128x512xf32>, vector<8x512xf32> -> vector<8x512xf32>
    %c0_74 = arith.constant 0 : index
    %c0_75 = arith.constant 0 : index
    %c0_76 = arith.constant 0 : index
    %192 = vector.load %arg10[%c0_74, %c0_75, %c0_76] : memref<2x1x512xf32, #tpu.memory_space<vmem>>, vector<1x1x512xf32>
    %193 = vector.shape_cast %192 : vector<1x1x512xf32> to vector<1x512xf32>
    %194 = vector.broadcast %193 : vector<1x512xf32> to vector<8x512xf32>
    %195 = arith.addf %191, %194 : vector<8x512xf32>
    %cst_77 = arith.constant 0.000000e+00 : f32
    %196 = vector.broadcast %cst_77 : f32 to vector<8x512xf32>
    %197 = arith.maximumf %195, %196 : vector<8x512xf32>
    %c0_78 = arith.constant 0 : index
    %c0_79 = arith.constant 0 : index
    %c0_80 = arith.constant 0 : index
    %198 = vector.load %arg11[%c0_78, %c0_79, %c0_80] : memref<2x512x128xf32, #tpu.memory_space<vmem>>, vector<1x512x128xf32>
    %199 = vector.shape_cast %198 : vector<1x512x128xf32> to vector<512x128xf32>
    %cst_81 = arith.constant dense<0.000000e+00> : vector<8x128xf32>
    %200 = tpu.matmul %197, %199, %cst_81 {dimension_numbers = #tpu.dot_dimension_numbers<[1], [0], [0], [1], [0, 0, 1, 1], [], []>} : vector<8x512xf32>, vector<512x128xf32>, vector<8x128xf32> -> vector<8x128xf32>
    %c0_82 = arith.constant 0 : index
    %c0_83 = arith.constant 0 : index
    %c0_84 = arith.constant 0 : index
    %201 = vector.load %arg12[%c0_82, %c0_83, %c0_84] : memref<2x1x128xf32, #tpu.memory_space<vmem>>, vector<1x1x128xf32>
    %202 = vector.shape_cast %201 : vector<1x1x128xf32> to vector<1x128xf32>
    %203 = vector.broadcast %202 : vector<1x128xf32> to vector<8x128xf32>
    %204 = arith.addf %200, %203 : vector<8x128xf32>
    %205 = arith.addf %188, %204 : vector<8x128xf32>
    %c0_85 = arith.constant 0 : index
    %c0_86 = arith.constant 0 : index
    %c0_87 = arith.constant 0 : index
    %206 = vector.load %arg13[%c0_85, %c0_86, %c0_87] : memref<2x1x128xf32, #tpu.memory_space<vmem>>, vector<1x1x128xf32>
    %207 = vector.shape_cast %206 : vector<1x1x128xf32> to vector<1x128xf32>
    %c0_88 = arith.constant 0 : index
    %c0_89 = arith.constant 0 : index
    %c0_90 = arith.constant 0 : index
    %208 = vector.load %arg14[%c0_88, %c0_89, %c0_90] : memref<2x1x128xf32, #tpu.memory_space<vmem>>, vector<1x1x128xf32>
    %209 = vector.shape_cast %208 : vector<1x1x128xf32> to vector<1x128xf32>
    %cst_91 = arith.constant dense<0.000000e+00> : vector<8xf32>
    %210 = vector.multi_reduction <add>, %205, %cst_91 [1] : vector<8x128xf32> to vector<8xf32>
    %211 = vector.shape_cast %210 : vector<8xf32> to vector<8x1xf32>
    %cst_92 = arith.constant 1.280000e+02 : f32
    %212 = vector.broadcast %cst_92 : f32 to vector<8x1xf32>
    %213 = arith.divf %211, %212 : vector<8x1xf32>
    %214 = vector.broadcast %213 : vector<8x1xf32> to vector<8x128xf32>
    %215 = arith.subf %205, %214 : vector<8x128xf32>
    %216 = arith.mulf %215, %215 : vector<8x128xf32>
    %cst_93 = arith.constant dense<0.000000e+00> : vector<8xf32>
    %217 = vector.multi_reduction <add>, %216, %cst_93 [1] : vector<8x128xf32> to vector<8xf32>
    %218 = vector.shape_cast %217 : vector<8xf32> to vector<8x1xf32>
    %cst_94 = arith.constant 1.280000e+02 : f32
    %219 = vector.broadcast %cst_94 : f32 to vector<8x1xf32>
    %220 = arith.divf %218, %219 : vector<8x1xf32>
    %221 = vector.broadcast %213 : vector<8x1xf32> to vector<8x128xf32>
    %222 = arith.subf %205, %221 : vector<8x128xf32>
    %cst_95 = arith.constant 9.99999974E-6 : f32
    %223 = vector.broadcast %cst_95 : f32 to vector<8x1xf32>
    %224 = arith.addf %220, %223 : vector<8x1xf32>
    %225 = math.rsqrt %224 : vector<8x1xf32>
    %226 = vector.broadcast %225 : vector<8x1xf32> to vector<8x128xf32>
    %227 = arith.mulf %222, %226 : vector<8x128xf32>
    %228 = vector.broadcast %207 : vector<1x128xf32> to vector<8x128xf32>
    %229 = arith.mulf %227, %228 : vector<8x128xf32>
    %230 = vector.broadcast %209 : vector<1x128xf32> to vector<8x128xf32>
    %231 = arith.addf %229, %230 : vector<8x128xf32>
    %c1 = arith.constant 1 : index
    %c0_96 = arith.constant 0 : index
    %c0_97 = arith.constant 0 : index
    %232 = vector.load %arg3[%c1, %c0_96, %c0_97] : memref<2x128x384xf32, #tpu.memory_space<vmem>>, vector<1x128x384xf32>
    %233 = vector.shape_cast %232 : vector<1x128x384xf32> to vector<128x384xf32>
    %cst_98 = arith.constant dense<0.000000e+00> : vector<8x384xf32>
    %234 = tpu.matmul %231, %233, %cst_98 {dimension_numbers = #tpu.dot_dimension_numbers<[1], [0], [0], [1], [0, 0, 1, 1], [], []>} : vector<8x128xf32>, vector<128x384xf32>, vector<8x384xf32> -> vector<8x384xf32>
    %c1_99 = arith.constant 1 : index
    %c0_100 = arith.constant 0 : index
    %c0_101 = arith.constant 0 : index
    %235 = vector.load %arg4[%c1_99, %c0_100, %c0_101] : memref<2x1x384xf32, #tpu.memory_space<vmem>>, vector<1x1x384xf32>
    %236 = vector.shape_cast %235 : vector<1x1x384xf32> to vector<1x384xf32>
    %237 = vector.broadcast %236 : vector<1x384xf32> to vector<8x384xf32>
    %238 = arith.addf %234, %237 : vector<8x384xf32>
    %239 = vector.extract_strided_slice %238 {offsets = [0, 0], sizes = [8, 128], strides = [1, 1]} : vector<8x384xf32> to vector<8x128xf32>
    %240 = vector.extract_strided_slice %238 {offsets = [0, 128], sizes = [8, 128], strides = [1, 1]} : vector<8x384xf32> to vector<8x128xf32>
    %241 = vector.extract_strided_slice %238 {offsets = [0, 256], sizes = [8, 128], strides = [1, 1]} : vector<8x384xf32> to vector<8x128xf32>
    %242 = vector.extract_strided_slice %239 {offsets = [0, 0], sizes = [8, 16], strides = [1, 1]} : vector<8x128xf32> to vector<8x16xf32>
    %243 = vector.extract_strided_slice %240 {offsets = [0, 0], sizes = [8, 16], strides = [1, 1]} : vector<8x128xf32> to vector<8x16xf32>
    %244 = vector.extract_strided_slice %241 {offsets = [0, 0], sizes = [8, 16], strides = [1, 1]} : vector<8x128xf32> to vector<8x16xf32>
    %cst_102 = arith.constant dense<0.000000e+00> : vector<8x8xf32>
    %245 = tpu.matmul %242, %243, %cst_102 {dimension_numbers = #tpu.dot_dimension_numbers<[1], [1], [0], [0], [0, 0, 1, 0], [], []>} : vector<8x16xf32>, vector<8x16xf32>, vector<8x8xf32> -> vector<8x8xf32>
    %cst_103 = arith.constant 2.500000e-01 : f32
    %246 = vector.broadcast %cst_103 : f32 to vector<8x8xf32>
    %247 = arith.mulf %245, %246 : vector<8x8xf32>
    %cst_104 = arith.constant dense<0xFF800000> : vector<8xf32>
    %248 = vector.multi_reduction <maximumf>, %247, %cst_104 [1] : vector<8x8xf32> to vector<8xf32>
    %249 = vector.shape_cast %248 : vector<8xf32> to vector<8x1xf32>
    %250 = vector.broadcast %249 : vector<8x1xf32> to vector<8x8xf32>
    %251 = arith.subf %247, %250 : vector<8x8xf32>
    %252 = math.exp %251 : vector<8x8xf32>
    %cst_105 = arith.constant dense<0.000000e+00> : vector<8xf32>
    %253 = vector.multi_reduction <add>, %252, %cst_105 [1] : vector<8x8xf32> to vector<8xf32>
    %254 = vector.shape_cast %253 : vector<8xf32> to vector<8x1xf32>
    %255 = tpu.reciprocal %254 {approx = true} : vector<8x1xf32> -> vector<8x1xf32>
    %256 = vector.broadcast %255 : vector<8x1xf32> to vector<8x8xf32>
    %257 = arith.mulf %252, %256 : vector<8x8xf32>
    %cst_106 = arith.constant dense<0.000000e+00> : vector<8x16xf32>
    %258 = tpu.matmul %257, %244, %cst_106 {dimension_numbers = #tpu.dot_dimension_numbers<[1], [0], [0], [1], [0, 0, 1, 1], [], []>} : vector<8x8xf32>, vector<8x16xf32>, vector<8x16xf32> -> vector<8x16xf32>
    %259 = vector.extract_strided_slice %239 {offsets = [0, 16], sizes = [8, 16], strides = [1, 1]} : vector<8x128xf32> to vector<8x16xf32>
    %260 = vector.extract_strided_slice %240 {offsets = [0, 16], sizes = [8, 16], strides = [1, 1]} : vector<8x128xf32> to vector<8x16xf32>
    %261 = vector.extract_strided_slice %241 {offsets = [0, 16], sizes = [8, 16], strides = [1, 1]} : vector<8x128xf32> to vector<8x16xf32>
    %cst_107 = arith.constant dense<0.000000e+00> : vector<8x8xf32>
    %262 = tpu.matmul %259, %260, %cst_107 {dimension_numbers = #tpu.dot_dimension_numbers<[1], [1], [0], [0], [0, 0, 1, 0], [], []>} : vector<8x16xf32>, vector<8x16xf32>, vector<8x8xf32> -> vector<8x8xf32>
    %cst_108 = arith.constant 2.500000e-01 : f32
    %263 = vector.broadcast %cst_108 : f32 to vector<8x8xf32>
    %264 = arith.mulf %262, %263 : vector<8x8xf32>
    %cst_109 = arith.constant dense<0xFF800000> : vector<8xf32>
    %265 = vector.multi_reduction <maximumf>, %264, %cst_109 [1] : vector<8x8xf32> to vector<8xf32>
    %266 = vector.shape_cast %265 : vector<8xf32> to vector<8x1xf32>
    %267 = vector.broadcast %266 : vector<8x1xf32> to vector<8x8xf32>
    %268 = arith.subf %264, %267 : vector<8x8xf32>
    %269 = math.exp %268 : vector<8x8xf32>
    %cst_110 = arith.constant dense<0.000000e+00> : vector<8xf32>
    %270 = vector.multi_reduction <add>, %269, %cst_110 [1] : vector<8x8xf32> to vector<8xf32>
    %271 = vector.shape_cast %270 : vector<8xf32> to vector<8x1xf32>
    %272 = tpu.reciprocal %271 {approx = true} : vector<8x1xf32> -> vector<8x1xf32>
    %273 = vector.broadcast %272 : vector<8x1xf32> to vector<8x8xf32>
    %274 = arith.mulf %269, %273 : vector<8x8xf32>
    %cst_111 = arith.constant dense<0.000000e+00> : vector<8x16xf32>
    %275 = tpu.matmul %274, %261, %cst_111 {dimension_numbers = #tpu.dot_dimension_numbers<[1], [0], [0], [1], [0, 0, 1, 1], [], []>} : vector<8x8xf32>, vector<8x16xf32>, vector<8x16xf32> -> vector<8x16xf32>
    %276 = vector.extract_strided_slice %239 {offsets = [0, 32], sizes = [8, 16], strides = [1, 1]} : vector<8x128xf32> to vector<8x16xf32>
    %277 = vector.extract_strided_slice %240 {offsets = [0, 32], sizes = [8, 16], strides = [1, 1]} : vector<8x128xf32> to vector<8x16xf32>
    %278 = vector.extract_strided_slice %241 {offsets = [0, 32], sizes = [8, 16], strides = [1, 1]} : vector<8x128xf32> to vector<8x16xf32>
    %cst_112 = arith.constant dense<0.000000e+00> : vector<8x8xf32>
    %279 = tpu.matmul %276, %277, %cst_112 {dimension_numbers = #tpu.dot_dimension_numbers<[1], [1], [0], [0], [0, 0, 1, 0], [], []>} : vector<8x16xf32>, vector<8x16xf32>, vector<8x8xf32> -> vector<8x8xf32>
    %cst_113 = arith.constant 2.500000e-01 : f32
    %280 = vector.broadcast %cst_113 : f32 to vector<8x8xf32>
    %281 = arith.mulf %279, %280 : vector<8x8xf32>
    %cst_114 = arith.constant dense<0xFF800000> : vector<8xf32>
    %282 = vector.multi_reduction <maximumf>, %281, %cst_114 [1] : vector<8x8xf32> to vector<8xf32>
    %283 = vector.shape_cast %282 : vector<8xf32> to vector<8x1xf32>
    %284 = vector.broadcast %283 : vector<8x1xf32> to vector<8x8xf32>
    %285 = arith.subf %281, %284 : vector<8x8xf32>
    %286 = math.exp %285 : vector<8x8xf32>
    %cst_115 = arith.constant dense<0.000000e+00> : vector<8xf32>
    %287 = vector.multi_reduction <add>, %286, %cst_115 [1] : vector<8x8xf32> to vector<8xf32>
    %288 = vector.shape_cast %287 : vector<8xf32> to vector<8x1xf32>
    %289 = tpu.reciprocal %288 {approx = true} : vector<8x1xf32> -> vector<8x1xf32>
    %290 = vector.broadcast %289 : vector<8x1xf32> to vector<8x8xf32>
    %291 = arith.mulf %286, %290 : vector<8x8xf32>
    %cst_116 = arith.constant dense<0.000000e+00> : vector<8x16xf32>
    %292 = tpu.matmul %291, %278, %cst_116 {dimension_numbers = #tpu.dot_dimension_numbers<[1], [0], [0], [1], [0, 0, 1, 1], [], []>} : vector<8x8xf32>, vector<8x16xf32>, vector<8x16xf32> -> vector<8x16xf32>
    %293 = vector.extract_strided_slice %239 {offsets = [0, 48], sizes = [8, 16], strides = [1, 1]} : vector<8x128xf32> to vector<8x16xf32>
    %294 = vector.extract_strided_slice %240 {offsets = [0, 48], sizes = [8, 16], strides = [1, 1]} : vector<8x128xf32> to vector<8x16xf32>
    %295 = vector.extract_strided_slice %241 {offsets = [0, 48], sizes = [8, 16], strides = [1, 1]} : vector<8x128xf32> to vector<8x16xf32>
    %cst_117 = arith.constant dense<0.000000e+00> : vector<8x8xf32>
    %296 = tpu.matmul %293, %294, %cst_117 {dimension_numbers = #tpu.dot_dimension_numbers<[1], [1], [0], [0], [0, 0, 1, 0], [], []>} : vector<8x16xf32>, vector<8x16xf32>, vector<8x8xf32> -> vector<8x8xf32>
    %cst_118 = arith.constant 2.500000e-01 : f32
    %297 = vector.broadcast %cst_118 : f32 to vector<8x8xf32>
    %298 = arith.mulf %296, %297 : vector<8x8xf32>
    %cst_119 = arith.constant dense<0xFF800000> : vector<8xf32>
    %299 = vector.multi_reduction <maximumf>, %298, %cst_119 [1] : vector<8x8xf32> to vector<8xf32>
    %300 = vector.shape_cast %299 : vector<8xf32> to vector<8x1xf32>
    %301 = vector.broadcast %300 : vector<8x1xf32> to vector<8x8xf32>
    %302 = arith.subf %298, %301 : vector<8x8xf32>
    %303 = math.exp %302 : vector<8x8xf32>
    %cst_120 = arith.constant dense<0.000000e+00> : vector<8xf32>
    %304 = vector.multi_reduction <add>, %303, %cst_120 [1] : vector<8x8xf32> to vector<8xf32>
    %305 = vector.shape_cast %304 : vector<8xf32> to vector<8x1xf32>
    %306 = tpu.reciprocal %305 {approx = true} : vector<8x1xf32> -> vector<8x1xf32>
    %307 = vector.broadcast %306 : vector<8x1xf32> to vector<8x8xf32>
    %308 = arith.mulf %303, %307 : vector<8x8xf32>
    %cst_121 = arith.constant dense<0.000000e+00> : vector<8x16xf32>
    %309 = tpu.matmul %308, %295, %cst_121 {dimension_numbers = #tpu.dot_dimension_numbers<[1], [0], [0], [1], [0, 0, 1, 1], [], []>} : vector<8x8xf32>, vector<8x16xf32>, vector<8x16xf32> -> vector<8x16xf32>
    %310 = vector.extract_strided_slice %239 {offsets = [0, 64], sizes = [8, 16], strides = [1, 1]} : vector<8x128xf32> to vector<8x16xf32>
    %311 = vector.extract_strided_slice %240 {offsets = [0, 64], sizes = [8, 16], strides = [1, 1]} : vector<8x128xf32> to vector<8x16xf32>
    %312 = vector.extract_strided_slice %241 {offsets = [0, 64], sizes = [8, 16], strides = [1, 1]} : vector<8x128xf32> to vector<8x16xf32>
    %cst_122 = arith.constant dense<0.000000e+00> : vector<8x8xf32>
    %313 = tpu.matmul %310, %311, %cst_122 {dimension_numbers = #tpu.dot_dimension_numbers<[1], [1], [0], [0], [0, 0, 1, 0], [], []>} : vector<8x16xf32>, vector<8x16xf32>, vector<8x8xf32> -> vector<8x8xf32>
    %cst_123 = arith.constant 2.500000e-01 : f32
    %314 = vector.broadcast %cst_123 : f32 to vector<8x8xf32>
    %315 = arith.mulf %313, %314 : vector<8x8xf32>
    %cst_124 = arith.constant dense<0xFF800000> : vector<8xf32>
    %316 = vector.multi_reduction <maximumf>, %315, %cst_124 [1] : vector<8x8xf32> to vector<8xf32>
    %317 = vector.shape_cast %316 : vector<8xf32> to vector<8x1xf32>
    %318 = vector.broadcast %317 : vector<8x1xf32> to vector<8x8xf32>
    %319 = arith.subf %315, %318 : vector<8x8xf32>
    %320 = math.exp %319 : vector<8x8xf32>
    %cst_125 = arith.constant dense<0.000000e+00> : vector<8xf32>
    %321 = vector.multi_reduction <add>, %320, %cst_125 [1] : vector<8x8xf32> to vector<8xf32>
    %322 = vector.shape_cast %321 : vector<8xf32> to vector<8x1xf32>
    %323 = tpu.reciprocal %322 {approx = true} : vector<8x1xf32> -> vector<8x1xf32>
    %324 = vector.broadcast %323 : vector<8x1xf32> to vector<8x8xf32>
    %325 = arith.mulf %320, %324 : vector<8x8xf32>
    %cst_126 = arith.constant dense<0.000000e+00> : vector<8x16xf32>
    %326 = tpu.matmul %325, %312, %cst_126 {dimension_numbers = #tpu.dot_dimension_numbers<[1], [0], [0], [1], [0, 0, 1, 1], [], []>} : vector<8x8xf32>, vector<8x16xf32>, vector<8x16xf32> -> vector<8x16xf32>
    %327 = vector.extract_strided_slice %239 {offsets = [0, 80], sizes = [8, 16], strides = [1, 1]} : vector<8x128xf32> to vector<8x16xf32>
    %328 = vector.extract_strided_slice %240 {offsets = [0, 80], sizes = [8, 16], strides = [1, 1]} : vector<8x128xf32> to vector<8x16xf32>
    %329 = vector.extract_strided_slice %241 {offsets = [0, 80], sizes = [8, 16], strides = [1, 1]} : vector<8x128xf32> to vector<8x16xf32>
    %cst_127 = arith.constant dense<0.000000e+00> : vector<8x8xf32>
    %330 = tpu.matmul %327, %328, %cst_127 {dimension_numbers = #tpu.dot_dimension_numbers<[1], [1], [0], [0], [0, 0, 1, 0], [], []>} : vector<8x16xf32>, vector<8x16xf32>, vector<8x8xf32> -> vector<8x8xf32>
    %cst_128 = arith.constant 2.500000e-01 : f32
    %331 = vector.broadcast %cst_128 : f32 to vector<8x8xf32>
    %332 = arith.mulf %330, %331 : vector<8x8xf32>
    %cst_129 = arith.constant dense<0xFF800000> : vector<8xf32>
    %333 = vector.multi_reduction <maximumf>, %332, %cst_129 [1] : vector<8x8xf32> to vector<8xf32>
    %334 = vector.shape_cast %333 : vector<8xf32> to vector<8x1xf32>
    %335 = vector.broadcast %334 : vector<8x1xf32> to vector<8x8xf32>
    %336 = arith.subf %332, %335 : vector<8x8xf32>
    %337 = math.exp %336 : vector<8x8xf32>
    %cst_130 = arith.constant dense<0.000000e+00> : vector<8xf32>
    %338 = vector.multi_reduction <add>, %337, %cst_130 [1] : vector<8x8xf32> to vector<8xf32>
    %339 = vector.shape_cast %338 : vector<8xf32> to vector<8x1xf32>
    %340 = tpu.reciprocal %339 {approx = true} : vector<8x1xf32> -> vector<8x1xf32>
    %341 = vector.broadcast %340 : vector<8x1xf32> to vector<8x8xf32>
    %342 = arith.mulf %337, %341 : vector<8x8xf32>
    %cst_131 = arith.constant dense<0.000000e+00> : vector<8x16xf32>
    %343 = tpu.matmul %342, %329, %cst_131 {dimension_numbers = #tpu.dot_dimension_numbers<[1], [0], [0], [1], [0, 0, 1, 1], [], []>} : vector<8x8xf32>, vector<8x16xf32>, vector<8x16xf32> -> vector<8x16xf32>
    %344 = vector.extract_strided_slice %239 {offsets = [0, 96], sizes = [8, 16], strides = [1, 1]} : vector<8x128xf32> to vector<8x16xf32>
    %345 = vector.extract_strided_slice %240 {offsets = [0, 96], sizes = [8, 16], strides = [1, 1]} : vector<8x128xf32> to vector<8x16xf32>
    %346 = vector.extract_strided_slice %241 {offsets = [0, 96], sizes = [8, 16], strides = [1, 1]} : vector<8x128xf32> to vector<8x16xf32>
    %cst_132 = arith.constant dense<0.000000e+00> : vector<8x8xf32>
    %347 = tpu.matmul %344, %345, %cst_132 {dimension_numbers = #tpu.dot_dimension_numbers<[1], [1], [0], [0], [0, 0, 1, 0], [], []>} : vector<8x16xf32>, vector<8x16xf32>, vector<8x8xf32> -> vector<8x8xf32>
    %cst_133 = arith.constant 2.500000e-01 : f32
    %348 = vector.broadcast %cst_133 : f32 to vector<8x8xf32>
    %349 = arith.mulf %347, %348 : vector<8x8xf32>
    %cst_134 = arith.constant dense<0xFF800000> : vector<8xf32>
    %350 = vector.multi_reduction <maximumf>, %349, %cst_134 [1] : vector<8x8xf32> to vector<8xf32>
    %351 = vector.shape_cast %350 : vector<8xf32> to vector<8x1xf32>
    %352 = vector.broadcast %351 : vector<8x1xf32> to vector<8x8xf32>
    %353 = arith.subf %349, %352 : vector<8x8xf32>
    %354 = math.exp %353 : vector<8x8xf32>
    %cst_135 = arith.constant dense<0.000000e+00> : vector<8xf32>
    %355 = vector.multi_reduction <add>, %354, %cst_135 [1] : vector<8x8xf32> to vector<8xf32>
    %356 = vector.shape_cast %355 : vector<8xf32> to vector<8x1xf32>
    %357 = tpu.reciprocal %356 {approx = true} : vector<8x1xf32> -> vector<8x1xf32>
    %358 = vector.broadcast %357 : vector<8x1xf32> to vector<8x8xf32>
    %359 = arith.mulf %354, %358 : vector<8x8xf32>
    %cst_136 = arith.constant dense<0.000000e+00> : vector<8x16xf32>
    %360 = tpu.matmul %359, %346, %cst_136 {dimension_numbers = #tpu.dot_dimension_numbers<[1], [0], [0], [1], [0, 0, 1, 1], [], []>} : vector<8x8xf32>, vector<8x16xf32>, vector<8x16xf32> -> vector<8x16xf32>
    %361 = vector.extract_strided_slice %239 {offsets = [0, 112], sizes = [8, 16], strides = [1, 1]} : vector<8x128xf32> to vector<8x16xf32>
    %362 = vector.extract_strided_slice %240 {offsets = [0, 112], sizes = [8, 16], strides = [1, 1]} : vector<8x128xf32> to vector<8x16xf32>
    %363 = vector.extract_strided_slice %241 {offsets = [0, 112], sizes = [8, 16], strides = [1, 1]} : vector<8x128xf32> to vector<8x16xf32>
    %cst_137 = arith.constant dense<0.000000e+00> : vector<8x8xf32>
    %364 = tpu.matmul %361, %362, %cst_137 {dimension_numbers = #tpu.dot_dimension_numbers<[1], [1], [0], [0], [0, 0, 1, 0], [], []>} : vector<8x16xf32>, vector<8x16xf32>, vector<8x8xf32> -> vector<8x8xf32>
    %cst_138 = arith.constant 2.500000e-01 : f32
    %365 = vector.broadcast %cst_138 : f32 to vector<8x8xf32>
    %366 = arith.mulf %364, %365 : vector<8x8xf32>
    %cst_139 = arith.constant dense<0xFF800000> : vector<8xf32>
    %367 = vector.multi_reduction <maximumf>, %366, %cst_139 [1] : vector<8x8xf32> to vector<8xf32>
    %368 = vector.shape_cast %367 : vector<8xf32> to vector<8x1xf32>
    %369 = vector.broadcast %368 : vector<8x1xf32> to vector<8x8xf32>
    %370 = arith.subf %366, %369 : vector<8x8xf32>
    %371 = math.exp %370 : vector<8x8xf32>
    %cst_140 = arith.constant dense<0.000000e+00> : vector<8xf32>
    %372 = vector.multi_reduction <add>, %371, %cst_140 [1] : vector<8x8xf32> to vector<8xf32>
    %373 = vector.shape_cast %372 : vector<8xf32> to vector<8x1xf32>
    %374 = tpu.reciprocal %373 {approx = true} : vector<8x1xf32> -> vector<8x1xf32>
    %375 = vector.broadcast %374 : vector<8x1xf32> to vector<8x8xf32>
    %376 = arith.mulf %371, %375 : vector<8x8xf32>
    %cst_141 = arith.constant dense<0.000000e+00> : vector<8x16xf32>
    %377 = tpu.matmul %376, %363, %cst_141 {dimension_numbers = #tpu.dot_dimension_numbers<[1], [0], [0], [1], [0, 0, 1, 1], [], []>} : vector<8x8xf32>, vector<8x16xf32>, vector<8x16xf32> -> vector<8x16xf32>
    %378 = tpu.concatenate %258, %275, %292, %309, %326, %343, %360, %377 in 1 : vector<8x16xf32>, vector<8x16xf32>, vector<8x16xf32>, vector<8x16xf32>, vector<8x16xf32>, vector<8x16xf32>, vector<8x16xf32>, vector<8x16xf32> -> vector<8x128xf32>
    %c1_142 = arith.constant 1 : index
    %c0_143 = arith.constant 0 : index
    %c0_144 = arith.constant 0 : index
    %379 = vector.load %arg5[%c1_142, %c0_143, %c0_144] : memref<2x128x128xf32, #tpu.memory_space<vmem>>, vector<1x128x128xf32>
    %380 = vector.shape_cast %379 : vector<1x128x128xf32> to vector<128x128xf32>
    %cst_145 = arith.constant dense<0.000000e+00> : vector<8x128xf32>
    %381 = tpu.matmul %378, %380, %cst_145 {dimension_numbers = #tpu.dot_dimension_numbers<[1], [0], [0], [1], [0, 0, 1, 1], [], []>} : vector<8x128xf32>, vector<128x128xf32>, vector<8x128xf32> -> vector<8x128xf32>
    %c1_146 = arith.constant 1 : index
    %c0_147 = arith.constant 0 : index
    %c0_148 = arith.constant 0 : index
    %382 = vector.load %arg6[%c1_146, %c0_147, %c0_148] : memref<2x1x128xf32, #tpu.memory_space<vmem>>, vector<1x1x128xf32>
    %383 = vector.shape_cast %382 : vector<1x1x128xf32> to vector<1x128xf32>
    %384 = vector.broadcast %383 : vector<1x128xf32> to vector<8x128xf32>
    %385 = arith.addf %381, %384 : vector<8x128xf32>
    %386 = arith.addf %231, %385 : vector<8x128xf32>
    %c1_149 = arith.constant 1 : index
    %c0_150 = arith.constant 0 : index
    %c0_151 = arith.constant 0 : index
    %387 = vector.load %arg7[%c1_149, %c0_150, %c0_151] : memref<2x1x128xf32, #tpu.memory_space<vmem>>, vector<1x1x128xf32>
    %388 = vector.shape_cast %387 : vector<1x1x128xf32> to vector<1x128xf32>
    %c1_152 = arith.constant 1 : index
    %c0_153 = arith.constant 0 : index
    %c0_154 = arith.constant 0 : index
    %389 = vector.load %arg8[%c1_152, %c0_153, %c0_154] : memref<2x1x128xf32, #tpu.memory_space<vmem>>, vector<1x1x128xf32>
    %390 = vector.shape_cast %389 : vector<1x1x128xf32> to vector<1x128xf32>
    %cst_155 = arith.constant dense<0.000000e+00> : vector<8xf32>
    %391 = vector.multi_reduction <add>, %386, %cst_155 [1] : vector<8x128xf32> to vector<8xf32>
    %392 = vector.shape_cast %391 : vector<8xf32> to vector<8x1xf32>
    %cst_156 = arith.constant 1.280000e+02 : f32
    %393 = vector.broadcast %cst_156 : f32 to vector<8x1xf32>
    %394 = arith.divf %392, %393 : vector<8x1xf32>
    %395 = vector.broadcast %394 : vector<8x1xf32> to vector<8x128xf32>
    %396 = arith.subf %386, %395 : vector<8x128xf32>
    %397 = arith.mulf %396, %396 : vector<8x128xf32>
    %cst_157 = arith.constant dense<0.000000e+00> : vector<8xf32>
    %398 = vector.multi_reduction <add>, %397, %cst_157 [1] : vector<8x128xf32> to vector<8xf32>
    %399 = vector.shape_cast %398 : vector<8xf32> to vector<8x1xf32>
    %cst_158 = arith.constant 1.280000e+02 : f32
    %400 = vector.broadcast %cst_158 : f32 to vector<8x1xf32>
    %401 = arith.divf %399, %400 : vector<8x1xf32>
    %402 = vector.broadcast %394 : vector<8x1xf32> to vector<8x128xf32>
    %403 = arith.subf %386, %402 : vector<8x128xf32>
    %cst_159 = arith.constant 9.99999974E-6 : f32
    %404 = vector.broadcast %cst_159 : f32 to vector<8x1xf32>
    %405 = arith.addf %401, %404 : vector<8x1xf32>
    %406 = math.rsqrt %405 : vector<8x1xf32>
    %407 = vector.broadcast %406 : vector<8x1xf32> to vector<8x128xf32>
    %408 = arith.mulf %403, %407 : vector<8x128xf32>
    %409 = vector.broadcast %388 : vector<1x128xf32> to vector<8x128xf32>
    %410 = arith.mulf %408, %409 : vector<8x128xf32>
    %411 = vector.broadcast %390 : vector<1x128xf32> to vector<8x128xf32>
    %412 = arith.addf %410, %411 : vector<8x128xf32>
    %c1_160 = arith.constant 1 : index
    %c0_161 = arith.constant 0 : index
    %c0_162 = arith.constant 0 : index
    %413 = vector.load %arg9[%c1_160, %c0_161, %c0_162] : memref<2x128x512xf32, #tpu.memory_space<vmem>>, vector<1x128x512xf32>
    %414 = vector.shape_cast %413 : vector<1x128x512xf32> to vector<128x512xf32>
    %cst_163 = arith.constant dense<0.000000e+00> : vector<8x512xf32>
    %415 = tpu.matmul %412, %414, %cst_163 {dimension_numbers = #tpu.dot_dimension_numbers<[1], [0], [0], [1], [0, 0, 1, 1], [], []>} : vector<8x128xf32>, vector<128x512xf32>, vector<8x512xf32> -> vector<8x512xf32>
    %c1_164 = arith.constant 1 : index
    %c0_165 = arith.constant 0 : index
    %c0_166 = arith.constant 0 : index
    %416 = vector.load %arg10[%c1_164, %c0_165, %c0_166] : memref<2x1x512xf32, #tpu.memory_space<vmem>>, vector<1x1x512xf32>
    %417 = vector.shape_cast %416 : vector<1x1x512xf32> to vector<1x512xf32>
    %418 = vector.broadcast %417 : vector<1x512xf32> to vector<8x512xf32>
    %419 = arith.addf %415, %418 : vector<8x512xf32>
    %cst_167 = arith.constant 0.000000e+00 : f32
    %420 = vector.broadcast %cst_167 : f32 to vector<8x512xf32>
    %421 = arith.maximumf %419, %420 : vector<8x512xf32>
    %c1_168 = arith.constant 1 : index
    %c0_169 = arith.constant 0 : index
    %c0_170 = arith.constant 0 : index
    %422 = vector.load %arg11[%c1_168, %c0_169, %c0_170] : memref<2x512x128xf32, #tpu.memory_space<vmem>>, vector<1x512x128xf32>
    %423 = vector.shape_cast %422 : vector<1x512x128xf32> to vector<512x128xf32>
    %cst_171 = arith.constant dense<0.000000e+00> : vector<8x128xf32>
    %424 = tpu.matmul %421, %423, %cst_171 {dimension_numbers = #tpu.dot_dimension_numbers<[1], [0], [0], [1], [0, 0, 1, 1], [], []>} : vector<8x512xf32>, vector<512x128xf32>, vector<8x128xf32> -> vector<8x128xf32>
    %c1_172 = arith.constant 1 : index
    %c0_173 = arith.constant 0 : index
    %c0_174 = arith.constant 0 : index
    %425 = vector.load %arg12[%c1_172, %c0_173, %c0_174] : memref<2x1x128xf32, #tpu.memory_space<vmem>>, vector<1x1x128xf32>
    %426 = vector.shape_cast %425 : vector<1x1x128xf32> to vector<1x128xf32>
    %427 = vector.broadcast %426 : vector<1x128xf32> to vector<8x128xf32>
    %428 = arith.addf %424, %427 : vector<8x128xf32>
    %429 = arith.addf %412, %428 : vector<8x128xf32>
    %c1_175 = arith.constant 1 : index
    %c0_176 = arith.constant 0 : index
    %c0_177 = arith.constant 0 : index
    %430 = vector.load %arg13[%c1_175, %c0_176, %c0_177] : memref<2x1x128xf32, #tpu.memory_space<vmem>>, vector<1x1x128xf32>
    %431 = vector.shape_cast %430 : vector<1x1x128xf32> to vector<1x128xf32>
    %c1_178 = arith.constant 1 : index
    %c0_179 = arith.constant 0 : index
    %c0_180 = arith.constant 0 : index
    %432 = vector.load %arg14[%c1_178, %c0_179, %c0_180] : memref<2x1x128xf32, #tpu.memory_space<vmem>>, vector<1x1x128xf32>
    %433 = vector.shape_cast %432 : vector<1x1x128xf32> to vector<1x128xf32>
    %cst_181 = arith.constant dense<0.000000e+00> : vector<8xf32>
    %434 = vector.multi_reduction <add>, %429, %cst_181 [1] : vector<8x128xf32> to vector<8xf32>
    %435 = vector.shape_cast %434 : vector<8xf32> to vector<8x1xf32>
    %cst_182 = arith.constant 1.280000e+02 : f32
    %436 = vector.broadcast %cst_182 : f32 to vector<8x1xf32>
    %437 = arith.divf %435, %436 : vector<8x1xf32>
    %438 = vector.broadcast %437 : vector<8x1xf32> to vector<8x128xf32>
    %439 = arith.subf %429, %438 : vector<8x128xf32>
    %440 = arith.mulf %439, %439 : vector<8x128xf32>
    %cst_183 = arith.constant dense<0.000000e+00> : vector<8xf32>
    %441 = vector.multi_reduction <add>, %440, %cst_183 [1] : vector<8x128xf32> to vector<8xf32>
    %442 = vector.shape_cast %441 : vector<8xf32> to vector<8x1xf32>
    %cst_184 = arith.constant 1.280000e+02 : f32
    %443 = vector.broadcast %cst_184 : f32 to vector<8x1xf32>
    %444 = arith.divf %442, %443 : vector<8x1xf32>
    %445 = vector.broadcast %437 : vector<8x1xf32> to vector<8x128xf32>
    %446 = arith.subf %429, %445 : vector<8x128xf32>
    %cst_185 = arith.constant 9.99999974E-6 : f32
    %447 = vector.broadcast %cst_185 : f32 to vector<8x1xf32>
    %448 = arith.addf %444, %447 : vector<8x1xf32>
    %449 = math.rsqrt %448 : vector<8x1xf32>
    %450 = vector.broadcast %449 : vector<8x1xf32> to vector<8x128xf32>
    %451 = arith.mulf %446, %450 : vector<8x128xf32>
    %452 = vector.broadcast %431 : vector<1x128xf32> to vector<8x128xf32>
    %453 = arith.mulf %451, %452 : vector<8x128xf32>
    %454 = vector.broadcast %433 : vector<1x128xf32> to vector<8x128xf32>
    %455 = arith.addf %453, %454 : vector<8x128xf32>
    %c0_186 = arith.constant 0 : index
    %c0_187 = arith.constant 0 : index
    %c0_188 = arith.constant 0 : index
    %456 = vector.load %arg15[%c0_186, %c0_187, %c0_188] : memref<1x8x128xf32, #tpu.memory_space<vmem>>, vector<1x8x128xf32>
    %457 = vector.shape_cast %456 : vector<1x8x128xf32> to vector<8x128xf32>
    %458 = vector.shape_cast %455 : vector<8x128xf32> to vector<1x8x128xf32>
    tpu.vector_store %arg15[%c0_186, %c0_187, %c0_188], %458 {strides = array<i32>} : memref<1x8x128xf32, #tpu.memory_space<vmem>>, vector<1x8x128xf32>,
    return
  }
  func.func @transform_0(%arg0: i32) -> (i32, i32, i32) {
    %c0_i32 = arith.constant 0 : i32
    %c0_i32_0 = arith.constant 0 : i32
    %c0_i32_1 = arith.constant 0 : i32
    return %arg0, %c0_i32, %c0_i32_0 : i32, i32, i32
  }
  func.func @transform_1(%arg0: i32) -> (i32, i32, i32) {
    %c0_i32 = arith.constant 0 : i32
    %c0_i32_0 = arith.constant 0 : i32
    %c0_i32_1 = arith.constant 0 : i32
    return %arg0, %c0_i32, %c0_i32_0 : i32, i32, i32
  }
  func.func @transform_2(%arg0: i32) -> (i32, i32, i32) {
    %c0_i32 = arith.constant 0 : i32
    %c0_i32_0 = arith.constant 0 : i32
    %c0_i32_1 = arith.constant 0 : i32
    %c0_i32_2 = arith.constant 0 : i32
    return %c0_i32, %c0_i32_0, %c0_i32_1 : i32, i32, i32
  }
  func.func @transform_3(%arg0: i32) -> (i32, i32, i32) {
    %c0_i32 = arith.constant 0 : i32
    %c0_i32_0 = arith.constant 0 : i32
    %c0_i32_1 = arith.constant 0 : i32
    %c0_i32_2 = arith.constant 0 : i32
    return %c0_i32, %c0_i32_0, %c0_i32_1 : i32, i32, i32
  }
  func.func @transform_4(%arg0: i32) -> (i32, i32, i32) {
    %c0_i32 = arith.constant 0 : i32
    %c0_i32_0 = arith.constant 0 : i32
    %c0_i32_1 = arith.constant 0 : i32
    %c0_i32_2 = arith.constant 0 : i32
    return %c0_i32, %c0_i32_0, %c0_i32_1 : i32, i32, i32
  }
  func.func @transform_5(%arg0: i32) -> (i32, i32, i32) {
    %c0_i32 = arith.constant 0 : i32
    %c0_i32_0 = arith.constant 0 : i32
    %c0_i32_1 = arith.constant 0 : i32
    %c0_i32_2 = arith.constant 0 : i32
    return %c0_i32, %c0_i32_0, %c0_i32_1 : i32, i32, i32
  }
  func.func @transform_6(%arg0: i32) -> (i32, i32, i32) {
    %c0_i32 = arith.constant 0 : i32
    %c0_i32_0 = arith.constant 0 : i32
    %c0_i32_1 = arith.constant 0 : i32
    %c0_i32_2 = arith.constant 0 : i32
    return %c0_i32, %c0_i32_0, %c0_i32_1 : i32, i32, i32
  }
  func.func @transform_7(%arg0: i32) -> (i32, i32, i32) {
    %c0_i32 = arith.constant 0 : i32
    %c0_i32_0 = arith.constant 0 : i32
    %c0_i32_1 = arith.constant 0 : i32
    %c0_i32_2 = arith.constant 0 : i32
    return %c0_i32, %c0_i32_0, %c0_i32_1 : i32, i32, i32
  }
  func.func @transform_8(%arg0: i32) -> (i32, i32, i32) {
    %c0_i32 = arith.constant 0 : i32
    %c0_i32_0 = arith.constant 0 : i32
    %c0_i32_1 = arith.constant 0 : i32
    %c0_i32_2 = arith.constant 0 : i32
    return %c0_i32, %c0_i32_0, %c0_i32_1 : i32, i32, i32
  }
  func.func @transform_9(%arg0: i32) -> (i32, i32, i32) {
    %c0_i32 = arith.constant 0 : i32
    %c0_i32_0 = arith.constant 0 : i32
    %c0_i32_1 = arith.constant 0 : i32
    %c0_i32_2 = arith.constant 0 : i32
    return %c0_i32, %c0_i32_0, %c0_i32_1 : i32, i32, i32
  }
  func.func @transform_10(%arg0: i32) -> (i32, i32, i32) {
    %c0_i32 = arith.constant 0 : i32
    %c0_i32_0 = arith.constant 0 : i32
    %c0_i32_1 = arith.constant 0 : i32
    %c0_i32_2 = arith.constant 0 : i32
    return %c0_i32, %c0_i32_0, %c0_i32_1 : i32, i32, i32
  }
  func.func @transform_11(%arg0: i32) -> (i32, i32, i32) {
    %c0_i32 = arith.constant 0 : i32
    %c0_i32_0 = arith.constant 0 : i32
    %c0_i32_1 = arith.constant 0 : i32
    %c0_i32_2 = arith.constant 0 : i32
    return %c0_i32, %c0_i32_0, %c0_i32_1 : i32, i32, i32
  }
  func.func @transform_12(%arg0: i32) -> (i32, i32, i32) {
    %c0_i32 = arith.constant 0 : i32
    %c0_i32_0 = arith.constant 0 : i32
    %c0_i32_1 = arith.constant 0 : i32
    %c0_i32_2 = arith.constant 0 : i32
    return %c0_i32, %c0_i32_0, %c0_i32_1 : i32, i32, i32
  }
  func.func @transform_13(%arg0: i32) -> (i32, i32, i32) {
    %c0_i32 = arith.constant 0 : i32
    %c0_i32_0 = arith.constant 0 : i32
    %c0_i32_1 = arith.constant 0 : i32
    %c0_i32_2 = arith.constant 0 : i32
    return %c0_i32, %c0_i32_0, %c0_i32_1 : i32, i32, i32
  }
  func.func @transform_14(%arg0: i32) -> (i32, i32, i32) {
    %c0_i32 = arith.constant 0 : i32
    %c0_i32_0 = arith.constant 0 : i32
    %c0_i32_1 = arith.constant 0 : i32
    return %arg0, %c0_i32, %c0_i32_0 : i32, i32, i32
  }
}

</mosaic_0001>

<bundles_post_ra>
// kernel: model_forward.3
= control target key start
LH: loop header
LB: loop body
LE: loop exit
PB: predicated region body
PF: predicated region fallthrough
CT: control target
= control target key end

     0   :  { %8 = vsyncpa [#allocation3], 0  ;;  %s2398_s0 = inlined_call_operand.vmem [shape: f32[16,128], index: 0, kind: input, shape index: {}]   ;;  %s2399_s1 = inlined_call_operand.hbm [shape: bf16[128,14336], index: 1, kind: input, shape index: {}]   ;;  %s2400_s2 = inlined_call_operand.hbm [shape: f32[1,14336], index: 2, kind: input, shape index: {}]   ;;  %s2401_s3 = inlined_call_operand.hbm [shape: f32[16,12947], index: 3, kind: output, shape index: {}]  }
   0x1   :  { %10 = vsyncpa [#allocation3 + $0x1], 0 }
   0x2   :  { %11 = vsyncpa [#allocation6], 0 }
   0x3   :  { %13 = vsyncpa [#allocation6 + $0x1], 0 }
   0x4   :  { %14 = vsyncpa [#allocation4], 0 }
   0x5   :  { %16 = vsyncpa [#allocation4 + $0x1], 0  ;;  %s1956_s12 = smov 0   ;;  %s1958_s13 = smov 0  }
   0x6   :  { %s1960_s14 = smov 0   ;;  %s1962_s15 = smov 0  }
   0x7 LB: > { %s1977_s16 = sadd.s32 4294967295, %s1925_s15   ;;  %s1583_s17 = sadd.s32 4294967294, %s1925_s15   ;;  %s1925_s15 = sphi %s1962_s15, %s2417_s15   ;;  %s1921_s14 = sphi %s1960_s14, %s2416_s14   ;;  %s1917_s13 = sphi %s1958_s13, %s2415_s13   ;;  %s1913_s12 = sphi %s1956_s12, %s2414_s12  }
   0x8   : > { %s1981_s18 = sadd.s32 1, %s1925_s15   ;;  %s50_s19 = sadd.s32 1, %s1921_s14 }
   0x9   : > { %s47_s20 = ssub.s32 %s1925_s15, %s1981_s18  ;;  %p57_p0 = scmp.ne.s32.totalorder %s1921_s14, %s1917_s13 }
   0xa   : > { %p48_p1 = scmp.eq.s32.totalorder %s47_s20, 0  ;;  %p58_p2 = scmp.eq.s32.totalorder %s1925_s15, 0 }
   0xb   : > { %p63_p3 = scmp.ne.s32.totalorder %s1917_s13, %s1913_s12  ;;  %p64_p4 = scmp.eq.s32.totalorder %s1977_s16, 0 }
   0xc   : > { %s1993_s21 = scalar_select %p48_p1, %s1921_s14, %s50_s19  }
   0xd   : > { %p1995_p5 = por %p58_p2, %p57_p0  ;;  %p1999_p6 = por %p64_p4, %p63_p3 }
   0xe   : > { %p113_p7 = scmp.eq.s32.totalorder %s1977_s16, 6  ;;  %p119_p8 = scmp.eq.s32.totalorder %s1583_s17, 6 }
   0xf   : > { %s2404_s23 = scalar_select %p1999_p6, 1, 0 }
  0x10   : > { %p1755_p9 = scmp.lt.s32.totalorder %s1925_s15, 7  ;;  %p2005_p10 = por %p113_p7, %p57_p0 }
  0x11   : > { %p2009_p11 = por %p119_p8, %p63_p3  ;;  %s2014_s26 = sand.u32 1, %s1921_s14  }
  0x12   : > { %s2405_s24 = scalar_select %p2005_p10, 1, 0 }
  0x13   : > { %s2406_s25 = scalar_select %p2009_p11, 1, 0 }
  0x14   : > { %s1734_s27 = sshll.u32 %s1925_s15, 10  ;;  %s1586_s28 = sshll.u32 %s2014_s26, 10 }
  0x15   : > { %s2021_s4 = scalar_lea.hbm %s2399_s1, %s1734_s27  ;;  %s146_s5 = scalar_lea.vmem [#allocation2], %s1586_s28 }
  0x16   : > { %s153_s6 = sshll.u32 %s146_s5, 4  ;;  %p2025_p12 = pnand %p1755_p9, %p1995_p5  ;;  %s2029_s6 = int_to_ptr.vmem [resolvable:$true] %s153_s6 }
  0x17   : > { %s143_s8 = scalar_lea.sflag [#allocation3], %s2014_s26  ;;  %s1795_s9 = scalar_lea.hbm %s2021_s4, 16384 }
  0x18   : > { %p1796_p0 = scmp.ne.s32.totalorder %s2021_s4, %s1795_s9  ;;  %p1797_p1 = pneg %p2025_p12 }
  0x19   : > { %s1800_s17 = scalar_lea.hbm %s2399_s1, 114688  ;;  %p1801_p4 = scmp.lt.u32.totalorder %s2021_s4, %s2399_s1 }
  0x1a   : > { %p1798_p2 = pnand %p1797_p1, %p1796_p0  ;;  %p1802_p5 = scmp.lt.u32.totalorder %s1800_s17, %s1795_s9 }
  0x1b   : > { %p1804_p8 = scmp.lt.u32.totalorder %s1795_s9, %s2021_s4 }
  0x1c   : > { %p1799_p3 = pneg %p1798_p2  ;;  %p1803_p7 = por %p1802_p5, %p1801_p4 }
  0x1e   : > { %p1805_p9 = por %p1804_p8, %p1803_p7 }
  0x20   : > { %p1806_p13 = pnand %p1805_p9, %p1799_p3 }
  0x22   : > { %1809 = shalt.err (!%p1806_p13)
}
  0x23   : > { %s1810_s22 = scalar_lea.vmem %s2029_s6, 16384  ;;  %s1927_s27 = smov [#allocation2]  }
  0x24   : > { %p1811_p0 = scmp.ne.s32.totalorder %s2029_s6, %s1810_s22  ;;  %s1815_s28 = sshll.u32 %s1927_s27, 4  ;;  %s1816_s28 = int_to_ptr.vmem [resolvable:$false] %s1815_s28 }
  0x25   : > { %s1817_s29 = scalar_lea.vmem %s1816_s28, 32768  ;;  %p1818_p10 = scmp.lt.s32.totalorder %s2029_s6, %s1816_s28 }
  0x26   : > { %p1813_p2 = pnand %p1811_p0, %p1797_p1  ;;  %p1819_p4 = scmp.lt.s32.totalorder %s1817_s29, %s1810_s22 }
  0x28   : > { %p1814_p11 = pneg %p1813_p2  ;;  %p1820_p5 = por %p1819_p4, %p1818_p10 }
  0x2a   : > { %p1821_p7 = pnand %p1820_p5, %p1814_p11 }
  0x2c   : > { %1824 = shalt.err (!%p1821_p7)
}
  0x2d   : > { %s1928_s30 = smov 7168   ;;  %s1929_s5 = smov 1024  }
  0x2e   : > { %s1930_s9 = smov 64   ;;  %p180_p13 = scmp.lt.s32.totalorder %s1925_s15, 8 }
  0x2f   : > { %1747 = dma.hbm_to_vmem [thread:$0]  (!%p2025_p12), %s2021_s4, 16384, %s2029_s6, %s143_s8, %s1928_s30, %s1929_s5, %s1930_s9  }
  0x30   : > { %s1589_s10 = sshll.u32 %s2014_s26, 4  ;;  %s1735_s11 = sshll.u32 %s1925_s15, 8 }
  0x31   : > { %p2408_p10 = scmp.ge.s32.totalorder %s1925_s15, 1  ;;  %s2072_s22 = scalar_lea.hbm %s2400_s2, %s1735_s11 }
  0x32   : > { %s167_s27 = scalar_lea.vmem [#allocation5], %s1589_s10  ;;  %s164_s4 = scalar_lea.sflag [#allocation6], %s2014_s26 }
  0x33   : > { %p2065_p11 = pnand %p2408_p10, %p180_p13  ;;  %s175_s28 = sshll.u32 %s167_s27, 4  ;;  %s176_s28 = int_to_ptr.vmem [resolvable:$true] %s175_s28 }
  0x34   : > { %s1825_s6 = scalar_lea.hbm %s2072_s22, 256  ;;  %s1830_s30 = scalar_lea.hbm %s2400_s2, 1792 }
  0x35   : > { %s2409_s17 = scalar_select %p2065_p11, 1, 0 }
  0x36   : > { %p1826_p3 = scmp.ne.s32.totalorder %s2072_s22, %s1825_s6  ;;  %p1831_p0 = scmp.lt.u32.totalorder %s2072_s22, %s2400_s2 }
  0x37   : > { %p1832_p2 = scmp.lt.u32.totalorder %s1830_s30, %s1825_s6  ;;  %p1834_p5 = scmp.lt.u32.totalorder %s1825_s6, %s2072_s22 }
  0x38   : > { %p1828_p8 = pnand %p1826_p3, %p1797_p1 }
  0x39   : > { %p1833_p4 = por %p1832_p2, %p1831_p0 }
  0x3a   : > { %p1829_p9 = pneg %p1828_p8 }
  0x3b   : > { %p1835_p7 = por %p1834_p5, %p1833_p4 }
  0x3d   : > { %p1836_p13 = pnand %p1835_p7, %p1829_p9 }
  0x3f   : > { %1839 = shalt.err (!%p1836_p13)
}
  0x40   : > { %s1840_s26 = scalar_lea.vmem %s176_s28, 256  ;;  %s1931_s10 = smov [#allocation5]  }
  0x41   : > { %p1841_p10 = scmp.ne.s32.totalorder %s176_s28, %s1840_s26  ;;  %s1845_s11 = sshll.u32 %s1931_s10, 4  ;;  %s1846_s11 = int_to_ptr.vmem [resolvable:$false] %s1845_s11 }
  0x42   : > { %s1847_s19 = scalar_lea.vmem %s1846_s11, 512  ;;  %p1848_p6 = scmp.lt.s32.totalorder %s176_s28, %s1846_s11 }
  0x43   : > { %p1843_p3 = pnand %p1841_p10, %p1797_p1  ;;  %p1849_p11 = scmp.lt.s32.totalorder %s1847_s19, %s1840_s26 }
  0x45   : > { %p1844_p8 = pneg %p1843_p3  ;;  %p1850_p0 = por %p1849_p11, %p1848_p6 }
  0x47   : > { %p1851_p2 = pnand %p1850_p0, %p1844_p8 }
  0x49   : > { %1854 = shalt.err (!%p1851_p2)
}
  0x4a   : > { %1750 = dma.hbm_to_vmem [thread:$0]  (!%p2025_p12), %s2072_s22, 256, %s176_s28, %s164_s4  }
  0x4b   : > { %p2410_p9 = scmp.ne.s32.totalorder %s2409_s17, 0 }
  0x4c   : > { %s2097_s20 = sand.u32 (!%p2410_p9), 1, %s1917_s13   ;;  %p2411_p6 = scmp.ne.s32.totalorder (!%p2410_p9), %s2404_s23, 0 }
  0x4d   : > { %184 = sbr.rel (%p2410_p9) target bundleno = 467 (0x1d3), region = 32  ;;  %s1593_s27 = sshll.u32 (!%p2410_p9), %s2097_s20, 10 }
  0x4e   : > { %s187_s6 = scalar_lea.sflag (!%p2410_p9), [#allocation3], %s2097_s20  ;;  %s2101_s8 = scalar_lea.vmem (!%p2410_p9), [#allocation2], %s1593_s27 }
  0x54   : > { %1900 = dma.done.wait (%p2411_p6), %s187_s6, 16384  }
  0x55   : > { %1902 = vsyncadd (%p2411_p6), %s187_s6, 4294950912  ;;  %s1594_s7 = sshll.u32 %s2097_s20, 4  ;;  %s196_s17 = scalar_lea.sflag [#allocation6], %s2097_s20 }
  0x56   : > { %s2109_s22 = scalar_lea.vmem [#allocation5], %s1594_s7 }
  0x57   : > { %1904 = dma.done.wait (%p2411_p6), %s196_s17, 256  }
  0x58   : > { %1906 = vsyncadd (%p2411_p6), %s196_s17, 4294967040  ;;  %v1932_v0 = vmov 0   ;;  %v238_v1 = vld [vmem:[%s2101_s8] sm:$0xff]  ;;  %v239_v3 = vld [vmem:[%s2101_s8 + $0x8] sm:$0xff]  ;;  %s1595_s30 = sshll.u32 %s2097_s20, 8  ;;  %s1467_s9 = scalar_lea.sflag [#allocation4], %s2097_s20 }
  0x59   : > { %1122 = vmatprep.mubr.bf16.mxu0 %v1932_v0  ;;  %1165 = vmatprep.mubr.bf16.mxu1 %v1932_v0  ;;  %v246_v2 = vld [vmem:[%s2101_s8 + $0x40] sm:$0xff]  ;;  %v247_v5 = vld [vmem:[%s2101_s8 + $0x48] sm:$0xff]  ;;  %v240_v63 = vld [vmem:[%s2101_s8 + $0x10] sm:$0xff]  ;;  %s2283_s5 = scalar_lea.vmem [#allocation7], %s1595_s30  ;;  %p2412_p12 = scmp.ne.s32.totalorder %s2405_s24, 0 }
  0x5a   : > { %v1597_v4 = vcombine.high %v238_v1, %v246_v2  ;;  %v1596_v6 = vcombine.low %v238_v1, %v246_v2  ;;  %v254_v7 = vld [vmem:[%s2101_s8 + $0x80] sm:$0xff]  ;;  %v1599_v9 = vcombine.high %v239_v3, %v247_v5  ;;  %v1598_v10 = vcombine.low %v239_v3, %v247_v5  ;;  %v255_v12 = vld [vmem:[%s2101_s8 + $0x88] sm:$0xff]  ;;  %v248_v1 = vld [vmem:[%s2101_s8 + $0x50] sm:$0xff]  ;;  %s1725_s26 = sshll.u32 (%p2412_p12), %s1977_s16, 4 }
  0x5b   : > { %v262_v8 = vld [vmem:[%s2101_s8 + $0xc0] sm:$0xff]  ;;  %v263_v13 = vld [vmem:[%s2101_s8 + $0xc8] sm:$0xff]  ;;  %v241_v2 = vld [vmem:[%s2101_s8 + $0x18] sm:$0xff]  ;;  %s1475_s10 = ssub.s32 (%p2412_p12), 102, %s1725_s26 }
  0x5c   : > { %v1613_v11 = vcombine.high %v254_v7, %v262_v8  ;;  %v270_v14 = vld [vmem:[%s2101_s8 + $0x100] sm:$0xff]  ;;  %1090 = vmatprep.subr.bf16.mxu0 %v1597_v4  ;;  %v1615_v15 = vcombine.high %v255_v12, %v263_v13  ;;  %v271_v17 = vld [vmem:[%s2101_s8 + $0x108] sm:$0xff]  ;;  %1133 = vmatprep.subr.bf16.mxu1 %v1599_v9  ;;  %v1612_v19 = vcombine.low %v254_v7, %v262_v8  ;;  %v249_v3 = vld [vmem:[%s2101_s8 + $0x58] sm:$0xff]  ;;  %p1476_p1 = scmp.lt.s32.totalorder (%p2412_p12), %s1475_s10, 16 }
  0x5d   : > { %v278_v16 = vld [vmem:[%s2101_s8 + $0x140] sm:$0xff]  ;;  %v279_v18 = vld [vmem:[%s2101_s8 + $0x148] sm:$0xff]  ;;  %1091 = vmatpush1.bf16.msra.mxu0 %v1596_v6  ;;  %1134 = vmatpush1.bf16.msra.mxu1 %v1598_v10  ;;  %v1614_v20 = vcombine.low %v255_v12, %v263_v13  ;;  %v1601_v8 = vcombine.high %v240_v63, %v248_v1  ;;  %v1603_v9 = vcombine.high %v241_v2, %v249_v3  ;;  %v256_v10 = vld [vmem:[%s2101_s8 + $0x90] sm:$0xff] }
  0x5e   : > { %1092 = vmatprep.subr.bf16.mxu0 %v1613_v11  ;;  %v1629_v21 = vcombine.high %v270_v14, %v278_v16  ;;  %1135 = vmatprep.subr.bf16.mxu1 %v1615_v15  ;;  %v1631_v22 = vcombine.high %v271_v17, %v279_v18  ;;  %v286_v23 = vld [vmem:[%s2101_s8 + $0x180] sm:$0xff]  ;;  %v287_v25 = vld [vmem:[%s2101_s8 + $0x188] sm:$0xff]  ;;  %v1628_v27 = vcombine.low %v270_v14, %v278_v16  ;;  %v264_v11 = vld [vmem:[%s2101_s8 + $0xd0] sm:$0xff] }
  0x5f   : > { %v294_v24 = vld [vmem:[%s2101_s8 + $0x1c0] sm:$0xff]  ;;  %v295_v26 = vld [vmem:[%s2101_s8 + $0x1c8] sm:$0xff]  ;;  %v1630_v28 = vcombine.low %v271_v17, %v279_v18  ;;  %v257_v13 = vld [vmem:[%s2101_s8 + $0x98] sm:$0xff]  ;;  %v1600_v15 = vcombine.low %v240_v63, %v248_v1  ;;  %v1602_v16 = vcombine.low %v241_v2, %v249_v3  ;;  %v1617_v17 = vcombine.high %v256_v10, %v264_v11 }
  0x60   : > { %v1645_v29 = vcombine.high %v286_v23, %v294_v24  ;;  %v1647_v30 = vcombine.high %v287_v25, %v295_v26  ;;  %v302_v31 = vld [vmem:[%s2101_s8 + $0x200] sm:$0xff]  ;;  %v303_v33 = vld [vmem:[%s2101_s8 + $0x208] sm:$0xff]  ;;  %v1644_v35 = vcombine.low %v286_v23, %v294_v24  ;;  %v1646_v36 = vcombine.low %v287_v25, %v295_v26  ;;  %v265_v14 = vld [vmem:[%s2101_s8 + $0xd8] sm:$0xff] }
  0x61   : > { %1093 = vmatpush1.bf16.msra.mxu0 %v1612_v19  ;;  %1136 = vmatpush1.bf16.msra.mxu1 %v1614_v20  ;;  %v310_v32 = vld [vmem:[%s2101_s8 + $0x240] sm:$0xff]  ;;  %v311_v34 = vld [vmem:[%s2101_s8 + $0x248] sm:$0xff]  ;;  %v1619_v18 = vcombine.high %v257_v13, %v265_v14  ;;  %v272_v19 = vld [vmem:[%s2101_s8 + $0x110] sm:$0xff]  ;;  %v1616_v23 = vcombine.low %v256_v10, %v264_v11  ;;  %v1618_v24 = vcombine.low %v257_v13, %v265_v14 }
  0x62   : > { %1094 = vmatprep.subr.bf16.mxu0 %v1629_v21  ;;  %1137 = vmatprep.subr.bf16.mxu1 %v1631_v22  ;;  %v1661_v37 = vcombine.high %v302_v31, %v310_v32  ;;  %v1663_v38 = vcombine.high %v303_v33, %v311_v34  ;;  %v318_v39 = vld [vmem:[%s2101_s8 + $0x280] sm:$0xff]  ;;  %v319_v41 = vld [vmem:[%s2101_s8 + $0x288] sm:$0xff]  ;;  %v1660_v43 = vcombine.low %v302_v31, %v310_v32  ;;  %v280_v20 = vld [vmem:[%s2101_s8 + $0x150] sm:$0xff] }
  0x63   : > { %v326_v40 = vld [vmem:[%s2101_s8 + $0x2c0] sm:$0xff]  ;;  %v327_v42 = vld [vmem:[%s2101_s8 + $0x2c8] sm:$0xff]  ;;  %v1662_v44 = vcombine.low %v303_v33, %v311_v34  ;;  %v273_v21 = vld [vmem:[%s2101_s8 + $0x118] sm:$0xff]  ;;  %v1633_v25 = vcombine.high %v272_v19, %v280_v20  ;;  %v1632_v31 = vcombine.low %v272_v19, %v280_v20 }
  0x64   : > { %v1677_v45 = vcombine.high %v318_v39, %v326_v40  ;;  %v1679_v46 = vcombine.high %v319_v41, %v327_v42  ;;  %v334_v47 = vld [vmem:[%s2101_s8 + $0x300] sm:$0xff]  ;;  %v335_v49 = vld [vmem:[%s2101_s8 + $0x308] sm:$0xff]  ;;  %v1676_v51 = vcombine.low %v318_v39, %v326_v40  ;;  %v1678_v52 = vcombine.low %v319_v41, %v327_v42  ;;  %v281_v22 = vld [vmem:[%s2101_s8 + $0x158] sm:$0xff] }
  0x65   : > { %1095 = vmatpush1.bf16.msra.mxu0 %v1628_v27  ;;  %1138 = vmatpush1.bf16.msra.mxu1 %v1630_v28  ;;  %v342_v48 = vld [vmem:[%s2101_s8 + $0x340] sm:$0xff]  ;;  %v343_v50 = vld [vmem:[%s2101_s8 + $0x348] sm:$0xff]  ;;  %v1635_v26 = vcombine.high %v273_v21, %v281_v22  ;;  %v288_v27 = vld [vmem:[%s2101_s8 + $0x190] sm:$0xff]  ;;  %v1634_v32 = vcombine.low %v273_v21, %v281_v22 }
  0x66   : > { %1096 = vmatprep.subr.bf16.mxu0 %v1645_v29  ;;  %1139 = vmatprep.subr.bf16.mxu1 %v1647_v30  ;;  %v1693_v53 = vcombine.high %v334_v47, %v342_v48  ;;  %v1695_v54 = vcombine.high %v335_v49, %v343_v50  ;;  %v350_v55 = vld [vmem:[%s2101_s8 + $0x380] sm:$0xff]  ;;  %v351_v57 = vld [vmem:[%s2101_s8 + $0x388] sm:$0xff]  ;;  %v1692_v59 = vcombine.low %v334_v47, %v342_v48  ;;  %v296_v28 = vld [vmem:[%s2101_s8 + $0x1d0] sm:$0xff] }
  0x67   : > { %v358_v56 = vld [vmem:[%s2101_s8 + $0x3c0] sm:$0xff]  ;;  %v359_v58 = vld [vmem:[%s2101_s8 + $0x3c8] sm:$0xff]  ;;  %v1694_v60 = vcombine.low %v335_v49, %v343_v50  ;;  %v289_v29 = vld [vmem:[%s2101_s8 + $0x198] sm:$0xff]  ;;  %v1649_v33 = vcombine.high %v288_v27, %v296_v28  ;;  %v1648_v39 = vcombine.low %v288_v27, %v296_v28 }
  0x68   : > { %v1709_v61 = vcombine.high %v350_v55, %v358_v56  ;;  %v1711_v62 = vcombine.high %v351_v57, %v359_v58  ;;  %v1708_v4 = vcombine.low %v350_v55, %v358_v56  ;;  %v235_v5 = vld [vmem:[%s2398_s0] sm:$0xff]  ;;  %v236_v6 = vld [vmem:[%s2398_s0 + $0x8] sm:$0xff]  ;;  %v1710_v7 = vcombine.low %v351_v57, %v359_v58  ;;  %v297_v30 = vld [vmem:[%s2101_s8 + $0x1d8] sm:$0xff] }
  0x69   : > { %1097 = vmatpush1.bf16.msra.mxu0 %v1644_v35  ;;  %1140 = vmatpush1.bf16.msra.mxu1 %v1646_v36  ;;  %v2161_v12 = vpack.c.bf16 %v236_v6, %v235_v5  ;;  %v1651_v34 = vcombine.high %v289_v29, %v297_v30  ;;  %v304_v35 = vld [vmem:[%s2101_s8 + $0x210] sm:$0xff]  ;;  %v1650_v40 = vcombine.low %v289_v29, %v297_v30  ;;  %v250_v5 = vld [vmem:[%s2101_s8 + $0x60] sm:$0xff]  ;;  %v243_v6 = vld [vmem:[%s2101_s8 + $0x28] sm:$0xff] }
  0x6a   : > { %1098 = vmatprep.subr.bf16.mxu0 %v1661_v37  ;;  %1141 = vmatprep.subr.bf16.mxu1 %v1663_v38  ;;  %v312_v36 = vld [vmem:[%s2101_s8 + $0x250] sm:$0xff]  ;;  %v305_v37 = vld [vmem:[%s2101_s8 + $0x218] sm:$0xff]  ;;  %v258_v13 = vld [vmem:[%s2101_s8 + $0xa0] sm:$0xff] }
  0x6b   : > { %v313_v38 = vld [vmem:[%s2101_s8 + $0x258] sm:$0xff]  ;;  %v1665_v41 = vcombine.high %v304_v35, %v312_v36  ;;  %v1664_v47 = vcombine.low %v304_v35, %v312_v36  ;;  %v266_v14 = vld [vmem:[%s2101_s8 + $0xe0] sm:$0xff] }
  0x6c   : > { %v1667_v42 = vcombine.high %v305_v37, %v313_v38  ;;  %v1666_v48 = vcombine.low %v305_v37, %v313_v38  ;;  %v1621_v19 = vcombine.high %v258_v13, %v266_v14  ;;  %v274_v21 = vld [vmem:[%s2101_s8 + $0x120] sm:$0xff] }
  0x6d   : > { %1099 = vmatpush1.bf16.msra.mxu0 %v1660_v43  ;;  %1142 = vmatpush1.bf16.msra.mxu1 %v1662_v44  ;;  %v320_v43 = vld [vmem:[%s2101_s8 + $0x290] sm:$0xff]  ;;  %v282_v22 = vld [vmem:[%s2101_s8 + $0x160] sm:$0xff] }
  0x6e   : > { %1100 = vmatprep.subr.bf16.mxu0 %v1677_v45  ;;  %1143 = vmatprep.subr.bf16.mxu1 %v1679_v46  ;;  %v328_v44 = vld [vmem:[%s2101_s8 + $0x2d0] sm:$0xff]  ;;  %v321_v45 = vld [vmem:[%s2101_s8 + $0x298] sm:$0xff]  ;;  %v1637_v27 = vcombine.high %v274_v21, %v282_v22  ;;  %v290_v29 = vld [vmem:[%s2101_s8 + $0x1a0] sm:$0xff] }
  0x6f   : > { %v329_v46 = vld [vmem:[%s2101_s8 + $0x2d8] sm:$0xff]  ;;  %v1681_v49 = vcombine.high %v320_v43, %v328_v44  ;;  %v1680_v55 = vcombine.low %v320_v43, %v328_v44  ;;  %v298_v30 = vld [vmem:[%s2101_s8 + $0x1e0] sm:$0xff] }
  0x70   : > { %v1683_v50 = vcombine.high %v321_v45, %v329_v46  ;;  %v1682_v56 = vcombine.low %v321_v45, %v329_v46  ;;  %v1653_v35 = vcombine.high %v290_v29, %v298_v30  ;;  %v306_v37 = vld [vmem:[%s2101_s8 + $0x220] sm:$0xff] }
  0x71   : > { %1101 = vmatpush1.bf16.msra.mxu0 %v1676_v51  ;;  %1144 = vmatpush1.bf16.msra.mxu1 %v1678_v52  ;;  %v336_v51 = vld [vmem:[%s2101_s8 + $0x310] sm:$0xff]  ;;  %v314_v38 = vld [vmem:[%s2101_s8 + $0x260] sm:$0xff] }
  0x72   : > { %1102 = vmatprep.subr.bf16.mxu0 %v1693_v53  ;;  %1145 = vmatprep.subr.bf16.mxu1 %v1695_v54  ;;  %v344_v52 = vld [vmem:[%s2101_s8 + $0x350] sm:$0xff]  ;;  %v337_v53 = vld [vmem:[%s2101_s8 + $0x318] sm:$0xff]  ;;  %v1669_v43 = vcombine.high %v306_v37, %v314_v38  ;;  %v322_v45 = vld [vmem:[%s2101_s8 + $0x2a0] sm:$0xff] }
  0x73   : > { %v345_v54 = vld [vmem:[%s2101_s8 + $0x358] sm:$0xff]  ;;  %v1697_v57 = vcombine.high %v336_v51, %v344_v52  ;;  %v1696_v63 = vcombine.low %v336_v51, %v344_v52  ;;  %v330_v46 = vld [vmem:[%s2101_s8 + $0x2e0] sm:$0xff] }
  0x74   : > { %v1699_v58 = vcombine.high %v337_v53, %v345_v54  ;;  %v1698_v1 = vcombine.low %v337_v53, %v345_v54  ;;  %v1685_v51 = vcombine.high %v322_v45, %v330_v46  ;;  %v338_v53 = vld [vmem:[%s2101_s8 + $0x320] sm:$0xff] }
  0x75   : > { %1103 = vmatpush1.bf16.msra.mxu0 %v1692_v59  ;;  %1146 = vmatpush1.bf16.msra.mxu1 %v1694_v60  ;;  %v352_v59 = vld [vmem:[%s2101_s8 + $0x390] sm:$0xff]  ;;  %v346_v54 = vld [vmem:[%s2101_s8 + $0x360] sm:$0xff] }
  0x76   : > { %1104 = vmatprep.subr.bf16.mxu0 %v1709_v61  ;;  %1147 = vmatprep.subr.bf16.mxu1 %v1711_v62  ;;  %v360_v60 = vld [vmem:[%s2101_s8 + $0x3d0] sm:$0xff]  ;;  %v353_v61 = vld [vmem:[%s2101_s8 + $0x398] sm:$0xff] }
  0x77   : > { %v361_v62 = vld [vmem:[%s2101_s8 + $0x3d8] sm:$0xff]  ;;  %v1713_v2 = vcombine.high %v352_v59, %v360_v60 }
  0x78   : > { %v1715_v3 = vcombine.high %v353_v61, %v361_v62 }
  0x79   : > { %1105 = vmatpush1.bf16.msra.mxu0 %v1708_v4  ;;  %1148 = vmatpush1.bf16.msra.mxu1 %v1710_v7  ;;  %v242_v4 = vld [vmem:[%s2101_s8 + $0x20] sm:$0xff]  ;;  %v251_v7 = vld [vmem:[%s2101_s8 + $0x68] sm:$0xff] }
  0x7a   : > { %1176 = vmatprep.subr.bf16.mxu0 %v1601_v8  ;;  %1219 = vmatprep.subr.bf16.mxu1 %v1603_v9  ;;  %v1712_v8 = vcombine.low %v352_v59, %v360_v60  ;;  %v1714_v9 = vcombine.low %v353_v61, %v361_v62  ;;  %v1605_v10 = vcombine.high %v242_v4, %v250_v5  ;;  %v354_v61 = vld [vmem:[%s2101_s8 + $0x3a0] sm:$0xff] }
  0x7b   : > { %v1607_v11 = vcombine.high %v243_v6, %v251_v7  ;;  %v1701_v59 = vcombine.high %v338_v53, %v346_v54  ;;  %v362_v62 = vld [vmem:[%s2101_s8 + $0x3e0] sm:$0xff] }
  0x7c   : > { %1123 = vmatmul.mubr.bf16.vlgmr.msra.gmra.mrb[0].mxu0 %v2161_v12  ;;  %1166 = vmatmul.mubr.bf16.vlgmr.msra.gmra.mrb[0].mxu1 %v2161_v12 }
  0x7d   : > { %1177 = vmatpush1.bf16.msra.mxu0 %v1600_v15  ;;  %1220 = vmatpush1.bf16.msra.mxu1 %v1602_v16  ;;  %v259_v15 = vld [vmem:[%s2101_s8 + $0xa8] sm:$0xff] }
  0x7e   : > { %1178 = vmatprep.subr.bf16.mxu0 %v1617_v17  ;;  %1221 = vmatprep.subr.bf16.mxu1 %v1619_v18  ;;  %v267_v16 = vld [vmem:[%s2101_s8 + $0xe8] sm:$0xff]  ;;  %v1604_v17 = vcombine.low %v242_v4, %v250_v5  ;;  %v1606_v18 = vcombine.low %v243_v6, %v251_v7  ;;  %v1717_v4 = vcombine.high %v354_v61, %v362_v62  ;;  %v244_v6 = vld [vmem:[%s2101_s8 + $0x30] sm:$0xff] }
  0x7f   : > { %1208 = vmatprep.mubr.bf16.mxu0 %v1932_v0  ;;  %1251 = vmatprep.mubr.bf16.mxu1 %v1932_v0  ;;  %v1623_v20 = vcombine.high %v259_v15, %v267_v16  ;;  %v252_v7 = vld [vmem:[%s2101_s8 + $0x70] sm:$0xff] }
  0x81   : > { %1179 = vmatpush1.bf16.msra.mxu0 %v1616_v23  ;;  %1222 = vmatpush1.bf16.msra.mxu1 %v1618_v24  ;;  %v275_v23 = vld [vmem:[%s2101_s8 + $0x128] sm:$0xff] }
  0x82   : > { %1180 = vmatprep.subr.bf16.mxu0 %v1633_v25  ;;  %1223 = vmatprep.subr.bf16.mxu1 %v1635_v26  ;;  %v283_v24 = vld [vmem:[%s2101_s8 + $0x168] sm:$0xff]  ;;  %v1620_v25 = vcombine.low %v258_v13, %v266_v14  ;;  %v1622_v26 = vcombine.low %v259_v15, %v267_v16  ;;  %v1609_v13 = vcombine.high %v244_v6, %v252_v7  ;;  %v260_v15 = vld [vmem:[%s2101_s8 + $0xb0] sm:$0xff] }
  0x83   : > { %v1639_v28 = vcombine.high %v275_v23, %v283_v24  ;;  %v268_v16 = vld [vmem:[%s2101_s8 + $0xf0] sm:$0xff] }
  0x85   : > { %1181 = vmatpush1.bf16.msra.mxu0 %v1632_v31  ;;  %1224 = vmatpush1.bf16.msra.mxu1 %v1634_v32  ;;  %v291_v31 = vld [vmem:[%s2101_s8 + $0x1a8] sm:$0xff] }
  0x86   : > { %1182 = vmatprep.subr.bf16.mxu0 %v1649_v33  ;;  %1225 = vmatprep.subr.bf16.mxu1 %v1651_v34  ;;  %v299_v32 = vld [vmem:[%s2101_s8 + $0x1e8] sm:$0xff]  ;;  %v1636_v33 = vcombine.low %v274_v21, %v282_v22  ;;  %v1638_v34 = vcombine.low %v275_v23, %v283_v24  ;;  %v1625_v21 = vcombine.high %v260_v15, %v268_v16  ;;  %v276_v23 = vld [vmem:[%s2101_s8 + $0x130] sm:$0xff] }
  0x87   : > { %v1655_v36 = vcombine.high %v291_v31, %v299_v32  ;;  %v284_v24 = vld [vmem:[%s2101_s8 + $0x170] sm:$0xff] }
  0x89   : > { %1183 = vmatpush1.bf16.msra.mxu0 %v1648_v39  ;;  %1226 = vmatpush1.bf16.msra.mxu1 %v1650_v40  ;;  %v307_v39 = vld [vmem:[%s2101_s8 + $0x228] sm:$0xff] }
  0x8a   : > { %1184 = vmatprep.subr.bf16.mxu0 %v1665_v41  ;;  %1227 = vmatprep.subr.bf16.mxu1 %v1667_v42  ;;  %v315_v40 = vld [vmem:[%s2101_s8 + $0x268] sm:$0xff]  ;;  %v1652_v41 = vcombine.low %v290_v29, %v298_v30  ;;  %v1654_v42 = vcombine.low %v291_v31, %v299_v32  ;;  %v1641_v29 = vcombine.high %v276_v23, %v284_v24  ;;  %v292_v31 = vld [vmem:[%s2101_s8 + $0x1b0] sm:$0xff] }
  0x8b   : > { %v1671_v44 = vcombine.high %v307_v39, %v315_v40  ;;  %v300_v32 = vld [vmem:[%s2101_s8 + $0x1f0] sm:$0xff] }
  0x8d   : > { %1185 = vmatpush1.bf16.msra.mxu0 %v1664_v47  ;;  %1228 = vmatpush1.bf16.msra.mxu1 %v1666_v48  ;;  %v323_v47 = vld [vmem:[%s2101_s8 + $0x2a8] sm:$0xff] }
  0x8e   : > { %1186 = vmatprep.subr.bf16.mxu0 %v1681_v49  ;;  %1229 = vmatprep.subr.bf16.mxu1 %v1683_v50  ;;  %v331_v48 = vld [vmem:[%s2101_s8 + $0x2e8] sm:$0xff]  ;;  %v1668_v49 = vcombine.low %v306_v37, %v314_v38  ;;  %v1670_v50 = vcombine.low %v307_v39, %v315_v40  ;;  %v1657_v37 = vcombine.high %v292_v31, %v300_v32  ;;  %v308_v39 = vld [vmem:[%s2101_s8 + $0x230] sm:$0xff] }
  0x8f   : > { %v1687_v52 = vcombine.high %v323_v47, %v331_v48  ;;  %v316_v40 = vld [vmem:[%s2101_s8 + $0x270] sm:$0xff] }
  0x91   : > { %1187 = vmatpush1.bf16.msra.mxu0 %v1680_v55  ;;  %1230 = vmatpush1.bf16.msra.mxu1 %v1682_v56  ;;  %v339_v55 = vld [vmem:[%s2101_s8 + $0x328] sm:$0xff] }
  0x92   : > { %1188 = vmatprep.subr.bf16.mxu0 %v1697_v57  ;;  %1231 = vmatprep.subr.bf16.mxu1 %v1699_v58  ;;  %v347_v56 = vld [vmem:[%s2101_s8 + $0x368] sm:$0xff]  ;;  %v1684_v57 = vcombine.low %v322_v45, %v330_v46  ;;  %v1686_v58 = vcombine.low %v323_v47, %v331_v48  ;;  %v324_v46 = vld [vmem:[%s2101_s8 + $0x2b0] sm:$0xff]  ;;  %v325_v48 = vld [vmem:[%s2101_s8 + $0x2b8] sm:$0xff] }
  0x93   : > { %v1703_v60 = vcombine.high %v339_v55, %v347_v56  ;;  %v332_v47 = vld [vmem:[%s2101_s8 + $0x2f0] sm:$0xff] }
  0x95   : > { %1189 = vmatpush1.bf16.msra.mxu0 %v1696_v63  ;;  %1232 = vmatpush1.bf16.msra.mxu1 %v1698_v1  ;;  %v355_v63 = vld [vmem:[%s2101_s8 + $0x3a8] sm:$0xff] }
  0x96   : > { %1190 = vmatprep.subr.bf16.mxu0 %v1713_v2  ;;  %1233 = vmatprep.subr.bf16.mxu1 %v1715_v3  ;;  %v363_v1 = vld [vmem:[%s2101_s8 + $0x3e8] sm:$0xff]  ;;  %v1700_v2 = vcombine.low %v338_v53, %v346_v54  ;;  %v1702_v3 = vcombine.low %v339_v55, %v347_v56  ;;  %v340_v54 = vld [vmem:[%s2101_s8 + $0x330] sm:$0xff]  ;;  %v341_v56 = vld [vmem:[%s2101_s8 + $0x338] sm:$0xff] }
  0x97   : > { %v1719_v5 = vcombine.high %v355_v63, %v363_v1  ;;  %v348_v55 = vld [vmem:[%s2101_s8 + $0x370] sm:$0xff] }
  0x99   : > { %1191 = vmatpush1.bf16.msra.mxu0 %v1712_v8  ;;  %1234 = vmatpush1.bf16.msra.mxu1 %v1714_v9  ;;  %v245_v8 = vld [vmem:[%s2101_s8 + $0x38] sm:$0xff] }
  0x9a   : > { %1262 = vmatprep.subr.bf16.mxu0 %v1605_v10  ;;  %1305 = vmatprep.subr.bf16.mxu1 %v1607_v11  ;;  %v253_v9 = vld [vmem:[%s2101_s8 + $0x78] sm:$0xff]  ;;  %v1716_v10 = vcombine.low %v354_v61, %v362_v62  ;;  %v1718_v11 = vcombine.low %v355_v63, %v363_v1  ;;  %v356_v62 = vld [vmem:[%s2101_s8 + $0x3b0] sm:$0xff] }
  0x9b   : > { %v1611_v14 = vcombine.high %v245_v8, %v253_v9  ;;  %v364_v63 = vld [vmem:[%s2101_s8 + $0x3f0] sm:$0xff]  ;;  %v357_v1 = vld [vmem:[%s2101_s8 + $0x3b8] sm:$0xff] }
  0x9c   : > { %1209 = vmatmul.mubr.bf16.vlgmr.msra.gmra.mrb[4].mxu0 %v2161_v12  ;;  %1252 = vmatmul.mubr.bf16.vlgmr.msra.gmra.mrb[4].mxu1 %v2161_v12 }
  0x9d   : > { %1263 = vmatpush1.bf16.msra.mxu0 %v1604_v17  ;;  %1306 = vmatpush1.bf16.msra.mxu1 %v1606_v18  ;;  %v261_v17 = vld [vmem:[%s2101_s8 + $0xb8] sm:$0xff] }
  0x9e   : > { %1264 = vmatprep.subr.bf16.mxu0 %v1621_v19  ;;  %1307 = vmatprep.subr.bf16.mxu1 %v1623_v20  ;;  %v269_v18 = vld [vmem:[%s2101_s8 + $0xf8] sm:$0xff]  ;;  %v1608_v19 = vcombine.low %v244_v6, %v252_v7  ;;  %v1610_v20 = vcombine.low %v245_v8, %v253_v9  ;;  %v1720_v7 = vcombine.low %v356_v62, %v364_v63  ;;  %v370_v9 = vlaneseq }
  0x9f   : > { %1294 = vmatprep.mubr.bf16.mxu0 %v1932_v0  ;;  %1337 = vmatprep.mubr.bf16.mxu1 %v1932_v0  ;;  %v1627_v22 = vcombine.high %v261_v17, %v269_v18 }
  0xa1   : > { %1265 = vmatpush1.bf16.msra.mxu0 %v1620_v25  ;;  %1308 = vmatpush1.bf16.msra.mxu1 %v1622_v26  ;;  %v277_v25 = vld [vmem:[%s2101_s8 + $0x138] sm:$0xff] }
  0xa2   : > { %1266 = vmatprep.subr.bf16.mxu0 %v1637_v27  ;;  %1309 = vmatprep.subr.bf16.mxu1 %v1639_v28  ;;  %v285_v26 = vld [vmem:[%s2101_s8 + $0x178] sm:$0xff]  ;;  %v1624_v27 = vcombine.low %v260_v15, %v268_v16  ;;  %v1626_v28 = vcombine.low %v261_v17, %v269_v18 }
  0xa3   : > { %v1643_v30 = vcombine.high %v277_v25, %v285_v26 }
  0xa5   : > { %1267 = vmatpush1.bf16.msra.mxu0 %v1636_v33  ;;  %1310 = vmatpush1.bf16.msra.mxu1 %v1638_v34  ;;  %v293_v33 = vld [vmem:[%s2101_s8 + $0x1b8] sm:$0xff] }
  0xa6   : > { %1268 = vmatprep.subr.bf16.mxu0 %v1653_v35  ;;  %1311 = vmatprep.subr.bf16.mxu1 %v1655_v36  ;;  %v301_v34 = vld [vmem:[%s2101_s8 + $0x1f8] sm:$0xff]  ;;  %v1640_v35 = vcombine.low %v276_v23, %v284_v24  ;;  %v1642_v36 = vcombine.low %v277_v25, %v285_v26 }
  0xa7   : > { %v1659_v38 = vcombine.high %v293_v33, %v301_v34 }
  0xa9   : > { %1269 = vmatpush1.bf16.msra.mxu0 %v1652_v41  ;;  %1312 = vmatpush1.bf16.msra.mxu1 %v1654_v42  ;;  %v309_v41 = vld [vmem:[%s2101_s8 + $0x238] sm:$0xff] }
  0xaa   : > { %1270 = vmatprep.subr.bf16.mxu0 %v1669_v43  ;;  %1313 = vmatprep.subr.bf16.mxu1 %v1671_v44  ;;  %v317_v42 = vld [vmem:[%s2101_s8 + $0x278] sm:$0xff]  ;;  %v1656_v43 = vcombine.low %v292_v31, %v300_v32  ;;  %v1673_v44 = vcombine.high %v308_v39, %v316_v40 }
  0xab   : > { %v1675_v45 = vcombine.high %v309_v41, %v317_v42 }
  0xad   : > { %1271 = vmatpush1.bf16.msra.mxu0 %v1668_v49  ;;  %1314 = vmatpush1.bf16.msra.mxu1 %v1670_v50  ;;  %v333_v49 = vld [vmem:[%s2101_s8 + $0x2f8] sm:$0xff]  ;;  %v1672_v50 = vcombine.low %v308_v39, %v316_v40 }
  0xae   : > { %1272 = vmatprep.subr.bf16.mxu0 %v1685_v51  ;;  %1315 = vmatprep.subr.bf16.mxu1 %v1687_v52  ;;  %v1674_v51 = vcombine.low %v309_v41, %v317_v42  ;;  %v1689_v52 = vcombine.high %v324_v46, %v332_v47  ;;  %v1691_v53 = vcombine.high %v325_v48, %v333_v49 }
  0xb1   : > { %1273 = vmatpush1.bf16.msra.mxu0 %v1684_v57  ;;  %1316 = vmatpush1.bf16.msra.mxu1 %v1686_v58  ;;  %v349_v57 = vld [vmem:[%s2101_s8 + $0x378] sm:$0xff]  ;;  %v1688_v58 = vcombine.low %v324_v46, %v332_v47 }
  0xb2   : > { %1274 = vmatprep.subr.bf16.mxu0 %v1701_v59  ;;  %1317 = vmatprep.subr.bf16.mxu1 %v1703_v60  ;;  %v1690_v59 = vcombine.low %v325_v48, %v333_v49  ;;  %v1705_v60 = vcombine.high %v340_v54, %v348_v55  ;;  %v1707_v61 = vcombine.high %v341_v56, %v349_v57 }
  0xb5   : > { %1275 = vmatpush1.bf16.msra.mxu0 %v1700_v2  ;;  %1318 = vmatpush1.bf16.msra.mxu1 %v1702_v3  ;;  %v365_v2 = vld [vmem:[%s2101_s8 + $0x3f8] sm:$0xff]  ;;  %v1704_v3 = vcombine.low %v340_v54, %v348_v55 }
  0xb6   : > { %1276 = vmatprep.subr.bf16.mxu0 %v1717_v4  ;;  %1319 = vmatprep.subr.bf16.mxu1 %v1719_v5  ;;  %v1706_v4 = vcombine.low %v341_v56, %v349_v57  ;;  %v1721_v5 = vcombine.high %v356_v62, %v364_v63  ;;  %v1723_v6 = vcombine.high %v357_v1, %v365_v2 }
  0xb7   : > { %v1722_v8 = vcombine.low %v357_v1, %v365_v2 }
  0xb9   : > { %1277 = vmatpush1.bf16.msra.mxu0 %v1716_v10  ;;  %1320 = vmatpush1.bf16.msra.mxu1 %v1718_v11  ;;  %v2267_v10 = vshrl.u32 %v370_v9, 7 }
  0xba   : > { %1348 = vmatprep.subr.bf16.mxu0 %v1609_v13  ;;  %1391 = vmatprep.subr.bf16.mxu1 %v1611_v14  ;;  %v366_v13 = vld [vmem:[%s2109_s22] sm:$0xff] }
  0xbb   : > { %v372_v11 = vsub.s32 0, %v2267_v10  ;;  %v380_v14 = vsub.s32 2, %v2267_v10  ;;  %v376_v15 = vsub.s32 1, %v2267_v10  ;;  %v384_v16 = vsub.s32 3, %v2267_v10 }
  0xbc   : > { %1295 = vmatmul.mubr.bf16.vlgmr.msra.gmra.mrb[8].mxu0 %v2161_v12  ;;  %1338 = vmatmul.mubr.bf16.vlgmr.msra.gmra.mrb[8].mxu1 %v2161_v12  ;;  %v400_v39 = vsub.s32 7, %v2267_v10 }
  0xbd   : > { %1349 = vmatpush1.bf16.msra.mxu0 %v1608_v19  ;;  %1392 = vmatpush1.bf16.msra.mxu1 %v1610_v20  ;;  %v373_v17 = vrot.slane %v366_v13, %v372_v11  ;;  %v381_v18 = vrot.slane %v366_v13, %v380_v14  ;;  %v385_v19 = vrot.slane %v366_v13, %v384_v16 }
  0xbe   : > { %1350 = vmatprep.subr.bf16.mxu0 %v1625_v21  ;;  %1393 = vmatprep.subr.bf16.mxu1 %v1627_v22 }
  0xbf   : > { %1380 = vmatprep.mubr.bf16.mxu0 %v1932_v0  ;;  %1423 = vmatprep.mubr.bf16.mxu1 %v1932_v0  ;;  %v1658_v0 = vcombine.low %v293_v33, %v301_v34 }
  0xc1   : > { %1351 = vmatpush1.bf16.msra.mxu0 %v1624_v27  ;;  %1394 = vmatpush1.bf16.msra.mxu1 %v1626_v28 }
  0xc2   : > { %1352 = vmatprep.subr.bf16.mxu0 %v1641_v29  ;;  %1395 = vmatprep.subr.bf16.mxu1 %v1643_v30 }
  0xc5   : > { %1353 = vmatpush1.bf16.msra.mxu0 %v1640_v35  ;;  %1396 = vmatpush1.bf16.msra.mxu1 %v1642_v36  ;;  %v388_v36 = vsub.s32 4, %v2267_v10 }
  0xc6   : > { %1354 = vmatprep.subr.bf16.mxu0 %v1657_v37  ;;  %1397 = vmatprep.subr.bf16.mxu1 %v1659_v38  ;;  %v396_v37 = vsub.s32 6, %v2267_v10  ;;  %v392_v38 = vsub.s32 5, %v2267_v10 }
  0xc7   : > { %v389_v40 = vrot.slane %v366_v13, %v388_v36 }
  0xc8   : > { %v397_v41 = vrot.slane %v366_v13, %v396_v37  ;;  %v393_v42 = vrot.slane %v366_v13, %v392_v38 }
  0xc9   : > { %1355 = vmatpush1.bf16.msra.mxu0 %v1656_v43  ;;  %1398 = vmatpush1.bf16.msra.mxu1 %v1658_v0  ;;  %v401_v43 = vrot.slane %v366_v13, %v400_v39 }
  0xca   : > { %1356 = vmatprep.subr.bf16.mxu0 %v1673_v44  ;;  %1399 = vmatprep.subr.bf16.mxu1 %v1675_v45 }
  0xcd   : > { %1357 = vmatpush1.bf16.msra.mxu0 %v1672_v50  ;;  %1400 = vmatpush1.bf16.msra.mxu1 %v1674_v51 }
  0xce   : > { %1358 = vmatprep.subr.bf16.mxu0 %v1689_v52  ;;  %1401 = vmatprep.subr.bf16.mxu1 %v1691_v53 }
  0xd1   : > { %1359 = vmatpush1.bf16.msra.mxu0 %v1688_v58  ;;  %1402 = vmatpush1.bf16.msra.mxu1 %v1690_v59  ;;  %v367_v59 = vld [vmem:[%s2109_s22 + $0x8] sm:$0xff] }
  0xd2   : > { %1360 = vmatprep.subr.bf16.mxu0 %v1705_v60  ;;  %1403 = vmatprep.subr.bf16.mxu1 %v1707_v61  ;;  %v405_v60 = vrot.slane %v367_v59, %v372_v11  ;;  %v413_v61 = vrot.slane %v367_v59, %v380_v14  ;;  %v409_v62 = vrot.slane %v367_v59, %v376_v15 }
  0xd3   : > { %v417_v63 = vrot.slane %v367_v59, %v384_v16 }
  0xd5   : > { %1361 = vmatpush1.bf16.msra.mxu0 %v1704_v3  ;;  %1404 = vmatpush1.bf16.msra.mxu1 %v1706_v4 }
  0xd6   : > { %1362 = vmatprep.subr.bf16.mxu0 %v1721_v5  ;;  %1405 = vmatprep.subr.bf16.mxu1 %v1723_v6 }
  0xd9   : > { %1363 = vmatpush1.bf16.msra.mxu0 %v1720_v7  ;;  %1406 = vmatpush1.bf16.msra.mxu1 %v1722_v8 }
  0xdc   : > { %1381 = vmatmul.mubr.bf16.vlgmr.msra.gmra.mrb[12].mxu0 %v2161_v12  ;;  %1424 = vmatmul.mubr.bf16.vlgmr.msra.gmra.mrb[12].mxu1 %v2161_v12  ;;  %v377_v12 = vrot.slane %v366_v13, %v376_v15 }
 0x14f   : > { %v1124_v20 = vpop.f32.mrb[0].mxu0  ;;  %v1167_v22 = vpop.f32.mrb[0].mxu1 }
 0x150   : > { %v1125_v21 = vadd.f32 %v1124_v20, %v373_v17  ;;  %v1126_v23 = vpop.f32.mrb[1].mxu0  ;;  %v1168_v24 = vadd.f32 %v1167_v22, %v381_v18  ;;  %v1169_v26 = vpop.f32.mrb[1].mxu1  ;;  %v433_v20 = vrot.slane %v367_v59, %v400_v39 }
 0x151   : > { %v1127_v25 = vadd.f32 %v1126_v23, %v377_v12  ;;  %v1128_v27 = vpop.f32.mrb[2].mxu0  ;;  %v1170_v28 = vadd.f32 %v1169_v26, %v385_v19  ;;  %v1171_v30 = vpop.f32.mrb[2].mxu1 }
 0x152   : > { %1434 = vst [vmem:[%s2283_s5] sm:$0xff] %v1125_v21  ;;  %v1129_v29 = vadd.f32 %v1128_v27, %v373_v17  ;;  %v1130_v31 = vpop.f32.mrb[3].mxu0  ;;  %1436 = vst [vmem:[%s2283_s5 + $0x10] sm:$0xff] %v1168_v24  ;;  %v1172_v32 = vadd.f32 %v1171_v30, %v381_v18  ;;  %v1173_v34 = vpop.f32.mrb[3].mxu1  ;;  %v421_v18 = vrot.slane %v367_v59, %v388_v36 }
 0x153   : > { %1435 = vst [vmem:[%s2283_s5 + $0x8] sm:$0xff] %v1127_v25  ;;  %v1131_v33 = vadd.f32 %v1130_v31, %v377_v12  ;;  %1437 = vst [vmem:[%s2283_s5 + $0x18] sm:$0xff] %v1170_v28  ;;  %v1174_v35 = vadd.f32 %v1173_v34, %v385_v19  ;;  %v429_v12 = vrot.slane %v367_v59, %v396_v37 }
 0x154   : > { %1450 = vst [vmem:[%s2283_s5 + $0x80] sm:$0xff] %v1129_v29  ;;  %1452 = vst [vmem:[%s2283_s5 + $0x90] sm:$0xff] %v1172_v32  ;;  %v425_v19 = vrot.slane %v367_v59, %v392_v38 }
 0x155   : > { %1451 = vst [vmem:[%s2283_s5 + $0x88] sm:$0xff] %v1131_v33  ;;  %1453 = vst [vmem:[%s2283_s5 + $0x98] sm:$0xff] %v1174_v35 }
 0x16f   : > { %v1210_v0 = vpop.f32.mrb[4].mxu0  ;;  %v1253_v45 = vpop.f32.mrb[4].mxu1 }
 0x170   : > { %v1211_v44 = vadd.f32 %v1210_v0, %v389_v40  ;;  %v1212_v46 = vpop.f32.mrb[5].mxu0  ;;  %v1254_v47 = vadd.f32 %v1253_v45, %v397_v41  ;;  %v1255_v49 = vpop.f32.mrb[5].mxu1 }
 0x171   : > { %v1213_v48 = vadd.f32 %v1212_v46, %v393_v42  ;;  %v1214_v50 = vpop.f32.mrb[6].mxu0  ;;  %v1256_v51 = vadd.f32 %v1255_v49, %v401_v43  ;;  %v1257_v53 = vpop.f32.mrb[6].mxu1 }
 0x172   : > { %1438 = vst [vmem:[%s2283_s5 + $0x20] sm:$0xff] %v1211_v44  ;;  %v1215_v52 = vadd.f32 %v1214_v50, %v389_v40  ;;  %v1216_v54 = vpop.f32.mrb[7].mxu0  ;;  %1440 = vst [vmem:[%s2283_s5 + $0x30] sm:$0xff] %v1254_v47  ;;  %v1258_v55 = vadd.f32 %v1257_v53, %v397_v41  ;;  %v1259_v57 = vpop.f32.mrb[7].mxu1 }
 0x173   : > { %1439 = vst [vmem:[%s2283_s5 + $0x28] sm:$0xff] %v1213_v48  ;;  %v1217_v56 = vadd.f32 %v1216_v54, %v393_v42  ;;  %1441 = vst [vmem:[%s2283_s5 + $0x38] sm:$0xff] %v1256_v51  ;;  %v1260_v58 = vadd.f32 %v1259_v57, %v401_v43 }
 0x174   : > { %1454 = vst [vmem:[%s2283_s5 + $0xa0] sm:$0xff] %v1215_v52  ;;  %1456 = vst [vmem:[%s2283_s5 + $0xb0] sm:$0xff] %v1258_v55 }
 0x175   : > { %1455 = vst [vmem:[%s2283_s5 + $0xa8] sm:$0xff] %v1217_v56  ;;  %1457 = vst [vmem:[%s2283_s5 + $0xb8] sm:$0xff] %v1260_v58 }
 0x18f   : > { %v1296_v1 = vpop.f32.mrb[8].mxu0  ;;  %v1339_v3 = vpop.f32.mrb[8].mxu1 }
 0x190   : > { %v1297_v2 = vadd.f32 %v1296_v1, %v405_v60  ;;  %v1298_v4 = vpop.f32.mrb[9].mxu0  ;;  %v1340_v5 = vadd.f32 %v1339_v3, %v413_v61  ;;  %v1341_v7 = vpop.f32.mrb[9].mxu1 }
 0x191   : > { %v1299_v6 = vadd.f32 %v1298_v4, %v409_v62  ;;  %v1300_v8 = vpop.f32.mrb[10].mxu0  ;;  %v1342_v9 = vadd.f32 %v1341_v7, %v417_v63  ;;  %v1343_v13 = vpop.f32.mrb[10].mxu1 }
 0x192   : > { %1442 = vst [vmem:[%s2283_s5 + $0x40] sm:$0xff] %v1297_v2  ;;  %v1301_v11 = vadd.f32 %v1300_v8, %v405_v60  ;;  %v1302_v10 = vpop.f32.mrb[11].mxu0  ;;  %1444 = vst [vmem:[%s2283_s5 + $0x50] sm:$0xff] %v1340_v5  ;;  %v1344_v14 = vadd.f32 %v1343_v13, %v413_v61  ;;  %v1345_v16 = vpop.f32.mrb[11].mxu1 }
 0x193   : > { %1443 = vst [vmem:[%s2283_s5 + $0x48] sm:$0xff] %v1299_v6  ;;  %v1303_v15 = vadd.f32 %v1302_v10, %v409_v62  ;;  %1445 = vst [vmem:[%s2283_s5 + $0x58] sm:$0xff] %v1342_v9  ;;  %v1346_v17 = vadd.f32 %v1345_v16, %v417_v63 }
 0x194   : > { %1458 = vst [vmem:[%s2283_s5 + $0xc0] sm:$0xff] %v1301_v11  ;;  %1460 = vst [vmem:[%s2283_s5 + $0xd0] sm:$0xff] %v1344_v14 }
 0x195   : > { %1459 = vst [vmem:[%s2283_s5 + $0xc8] sm:$0xff] %v1303_v15  ;;  %1461 = vst [vmem:[%s2283_s5 + $0xd8] sm:$0xff] %v1346_v17 }
 0x1af   : > { %v1382_v21 = vpop.f32.mrb[12].mxu0  ;;  %v1425_v23 = vpop.f32.mrb[12].mxu1  ;;  %1473 = sbr.rel (!%p2412_p12) target bundleno = 467 (0x1d3), region = 44 }
 0x1b0   : > { %v1383_v22 = vadd.f32 %v1382_v21, %v421_v18  ;;  %v1384_v24 = vpop.f32.mrb[13].mxu0  ;;  %v1426_v25 = vadd.f32 %v1425_v23, %v429_v12  ;;  %v1427_v27 = vpop.f32.mrb[13].mxu1 }
 0x1b1   : > { %v1385_v26 = vadd.f32 %v1384_v24, %v425_v19  ;;  %v1386_v28 = vpop.f32.mrb[14].mxu0  ;;  %v1428_v29 = vadd.f32 %v1427_v27, %v433_v20  ;;  %v1429_v31 = vpop.f32.mrb[14].mxu1 }
 0x1b2   : > { %1446 = vst [vmem:[%s2283_s5 + $0x60] sm:$0xff] %v1383_v22  ;;  %v1387_v30 = vadd.f32 %v1386_v28, %v421_v18  ;;  %v1388_v32 = vpop.f32.mrb[15].mxu0  ;;  %1448 = vst [vmem:[%s2283_s5 + $0x70] sm:$0xff] %v1426_v25  ;;  %v1430_v33 = vadd.f32 %v1429_v31, %v429_v12  ;;  %v1431_v35 = vpop.f32.mrb[15].mxu1 }
 0x1b3   : > { %1447 = vst [vmem:[%s2283_s5 + $0x68] sm:$0xff] %v1385_v26  ;;  %v1389_v34 = vadd.f32 %v1388_v32, %v425_v19  ;;  %1449 = vst [vmem:[%s2283_s5 + $0x78] sm:$0xff] %v1428_v29  ;;  %v1432_v36 = vadd.f32 %v1431_v35, %v433_v20 }
 0x1b4   : > { %1462 = vst [vmem:[%s2283_s5 + $0xe0] sm:$0xff] %v1387_v30  ;;  %1464 = vst [vmem:[%s2283_s5 + $0xf0] sm:$0xff] %v1430_v33 }
 0x1b5   : > { %1463 = vst [vmem:[%s2283_s5 + $0xe8] sm:$0xff] %v1389_v34  ;;  %1465 = vst [vmem:[%s2283_s5 + $0xf8] sm:$0xff] %v1432_v36 }
 0x1b6   : > { %s2419_s10 = smov (!%p1476_p1, %s1475_s10), 16 }
 0x1b7   : > { %s2337_s11 = sshll.u32 %s2419_s10, 8 }
 0x1b8   : > { %s1480_s19 = ssub.s32 4096, %s2337_s11 }
 0x1b9   : > { %1481 = vsyncadd %s1467_s9, %s1480_s19  ;;  %p1727_p11 = scmp.ne.s32.totalorder %s2337_s11, 0  ;;  %s1736_s24 = sshll.u32 %s1977_s16, 11 }
 0x1ba   : > { %s2347_s8 = scalar_lea.hbm %s2401_s3, %s1736_s24  ;;  %s1729_s7 = sshll.u32 %s2419_s10, 3 }
 0x1bb   : > { %s1487_s17 = sshll.u32 %s2283_s5, 4  ;;  %s1933_s23 = smov [#allocation7]   ;;  %s2351_s17 = int_to_ptr.vmem [resolvable:$true] %s1487_s17 }
 0x1bc   : > { %s1855_s22 = scalar_lea.vmem %s2351_s17, %s2337_s11  ;;  %s1859_s28 = sshll.u32 %s1933_s23, 4  ;;  %s1860_s28 = int_to_ptr.vmem [resolvable:$false] %s1859_s28 }
 0x1bd   : > { %p1856_p4 = scmp.ne.s32.totalorder %s2351_s17, %s1855_s22  ;;  %s1861_s16 = scalar_lea.vmem %s1860_s28, 8192 }
 0x1be   : > { %p1862_p13 = scmp.lt.s32.totalorder %s2351_s17, %s1860_s28  ;;  %p1863_p10 = scmp.lt.s32.totalorder %s1861_s16, %s1855_s22 }
 0x1bf   : > { %p1857_p5 = pnand %p1856_p4, %p1727_p11 }
 0x1c0   : > { %p1864_p3 = por %p1863_p10, %p1862_p13 }
 0x1c1   : > { %p1858_p7 = pneg %p1857_p5 }
 0x1c3   : > { %p1865_p8 = pnand %p1864_p3, %p1858_p7 }
 0x1c5   : > { %1868 = shalt.err (!%p1865_p8)
}
 0x1c6   : > { %s1869_s4 = scalar_lea.hbm %s2347_s8, %s2337_s11  ;;  %s1873_s5 = scalar_lea.hbm %s2401_s3, 26112 }
 0x1c7   : > { %p1870_p0 = scmp.ne.s32.totalorder %s2347_s8, %s1869_s4  ;;  %p1874_p6 = scmp.lt.u32.totalorder %s2347_s8, %s2401_s3 }
 0x1c8   : > { %p1875_p12 = scmp.lt.u32.totalorder %s1873_s5, %s1869_s4  ;;  %p1877_p4 = scmp.lt.u32.totalorder %s1869_s4, %s2347_s8 }
 0x1c9   : > { %p1871_p2 = pnand %p1870_p0, %p1727_p11 }
 0x1ca   : > { %p1876_p1 = por %p1875_p12, %p1874_p6 }
 0x1cb   : > { %p1872_p9 = pneg %p1871_p2 }
 0x1cc   : > { %p1878_p5 = por %p1877_p4, %p1876_p1 }
 0x1ce   : > { %p1879_p7 = pnand %p1878_p5, %p1872_p9 }
 0x1d0   : > { %1882 = shalt.err (!%p1879_p7)
}
 0x1d1   : > { %s1934_s24 = smov 2048   ;;  %s1935_s27 = smov 13056  }
 0x1d2   : > { %1493 = dma.vmem_to_hbm [thread:$0]  (%p1727_p11), %s2351_s17, %s2337_s11, %s2347_s8, %s1467_s9, %s1934_s24, %s1935_s27, %s1729_s7  }
 0x1d3 PF: > { %p1756_p13 = scmp.ge.s32.totalorder %s1925_s15, 2  ;;  %s1502_s6 = sand.u32 1, %s1913_s12  }
 0x1d4   : > { %p2413_p10 = scmp.ne.s32.totalorder %s2406_s25, 0  ;;  %s1503_s22 = scalar_lea.sflag [#allocation4], %s1502_s6 }
 0x1d6   : > { %p1752_p3 = pnand %p1756_p13, %p2413_p10 }
 0x1d8   : > { %1908 = dma.done.wait (!%p1752_p3), %s1503_s22, 4096  }
 0x1d9   : > { %1910 = vsyncadd (!%p1752_p3), %s1503_s22, 4294963200  ;;  %p19_p8 = scmp.ge.s32.totalorder %s1981_s18, 9   ;;  %s2414_s12 = smov %s1917_s13 }
 0x1da   : > { %s2415_s13 = smov %s1921_s14  ;;  %s2416_s14 = smov %s1993_s21 }
 0x1db   : > { %s2417_s15 = smov %s1981_s18  ;;  %21 = sbr.rel (!%p19_p8) target bundleno = 7 (0x7), region = 90 }
 0x1e2   :  { %1508 = vsyncpa [#allocation3], 1 }
 0x1e3   :  { %1510 = vsyncpa [#allocation3 + $0x1], 1 }
 0x1e4   :  { %1511 = vsyncpa [#allocation6], 1 }
 0x1e5   :  { %1513 = vsyncpa [#allocation6 + $0x1], 1 }
 0x1e6   :  { %1514 = vsyncpa [#allocation4], 1 }
 0x1e7   :  { %1516 = vsyncpa [#allocation4 + $0x1], 1 }

// kernel: model_forward.2
= control target key start
LH: loop header
LB: loop body
LE: loop exit
PB: predicated region body
PF: predicated region fallthrough
CT: control target
= control target key end

     0   :  { %s7953_s0 = inlined_call_operand.vmem [shape: f32[2,8,128], index: 0, kind: input, shape index: {}]   ;;  %s7954_s1 = inlined_call_operand.hbm [shape: f32[183,1,128], index: 1, kind: input, shape index: {}]   ;;  %s7955_s2 = inlined_call_operand.hbm [shape: f32[2,128,384], index: 2, kind: input, shape index: {}]   ;;  %s7956_s3 = inlined_call_operand.hbm [shape: f32[2,1,384], index: 3, kind: input, shape index: {}]   ;;  %s7957_s4 = inlined_call_operand.hbm [shape: f32[2,128,128], index: 4, kind: input, shape index: {}]   ;;  %s7958_s5 = inlined_call_operand.hbm [shape: f32[2,1,128], index: 5, kind: input, shape index: {}]   ;;  %s7959_s6 = inlined_call_operand.hbm [shape: f32[2,1,128], index: 6, kind: input, shape index: {}]   ;;  %s7960_s7 = inlined_call_operand.hbm [shape: f32[2,1,128], index: 7, kind: input, shape index: {}]   ;;  %s7961_s8 = inlined_call_operand.hbm [shape: f32[2,128,512], index: 8, kind: input, shape index: {}]   ;;  %s7962_s9 = inlined_call_operand.hbm [shape: f32[2,1,512], index: 9, kind: input, shape index: {}]   ;;  %s7963_s10 = inlined_call_operand.hbm [shape: f32[2,512,128], index: 10, kind: input, shape index: {}]   ;;  %s7964_s11 = inlined_call_operand.hbm [shape: f32[2,1,128], index: 11, kind: input, shape index: {}]   ;;  %s7965_s12 = inlined_call_operand.hbm [shape: f32[2,1,128], index: 12, kind: input, shape index: {}]   ;;  %s7966_s13 = inlined_call_operand.hbm [shape: f32[2,1,128], index: 13, kind: input, shape index: {}]   ;;  %s7967_s14 = inlined_call_operand.vmem [shape: f32[2,8,128], index: 14, kind: output, shape index: {}]  }
   0x1   :  { %7980 = sst [smem:[#allocation31_spill]] %s7953_s0 }
   0x2   :  { %7981 = sst [smem:[#allocation32_spill]] %s7954_s1 }
   0x3   :  { %7982 = sst [smem:[#allocation33_spill]] %s7955_s2 }
   0x4   :  { %7983 = sst [smem:[#allocation34_spill]] %s7957_s4 }
   0x5   :  { %7984 = sst [smem:[#allocation35_spill]] %s7959_s6 }
   0x6   :  { %7985 = sst [smem:[#allocation36_spill]] %s7961_s8 }
   0x7   :  { %7986 = sst [smem:[#allocation37_spill]] %s7963_s10 }
   0x8   :  { %7987 = sst [smem:[#allocation38_spill]] %s7967_s14 }
   0x9   :  { %19 = vsyncpa [#allocation3], 0 }
   0xa   :  { %21 = vsyncpa [#allocation3 + $0x1], 0 }
   0xb   :  { %22 = vsyncpa [#allocation5], 0 }
   0xc   :  { %23 = vsyncpa [#allocation8], 0 }
   0xd   :  { %24 = vsyncpa [#allocation11], 0 }
   0xe   :  { %25 = vsyncpa [#allocation14], 0 }
   0xf   :  { %26 = vsyncpa [#allocation17], 0 }
  0x10   :  { %27 = vsyncpa [#allocation20], 0  ;;  %s7077_s29 = smov 0   ;;  %s7079_s30 = smov 0  }
  0x11   :  { %s7081_s15 = smov 0   ;;  %s7083_s16 = smov 0  }
  0x12 LB: > { %s6967_s17 = smov [#allocation4]   ;;  %s7098_s19 = sadd.s32 4294967295, %s6965_s16   ;;  %s6965_s16 = sphi %s7083_s16, %s8027_s16   ;;  %s6961_s15 = sphi %s7081_s15, %s8026_s15   ;;  %s6957_s30 = sphi %s7079_s30, %s8025_s30   ;;  %s6953_s29 = sphi %s7077_s29, %s8024_s29  }
  0x13   : > { %s380_s18 = sshll.u32 %s6967_s17, 4  ;;  %7988 = sst [smem:[#allocation29_spill]] %s7098_s19  ;;  %s7103_s18 = int_to_ptr.vmem [resolvable:$true] %s380_s18 }
  0x14   : > { %p5206_p0 = scmp.ge.s32.totalorder %s6965_s16, 1  ;;  %p7972_p1 = scmp.eq.s32.totalorder %s7098_s19, 0 }
  0x15   : > { %p368_p2 = scmp.lt.s32.totalorder %s6965_s16, 3  ;;  %s6968_s21 = smov [#allocation7]  }
  0x16   : > { %s406_s22 = sshll.u32 %s6968_s21, 4  ;;  %s7992_s2 = sld [smem:[#allocation33_spill]]  ;;  %s7117_s22 = int_to_ptr.vmem [resolvable:$true] %s406_s22 }
  0x17   : > { %p7105_p3 = pnand %p5206_p0, %p368_p2 }
  0x19   : > { %s7989_s20 = scalar_select %p7105_p3, 1, 0 }
  0x1a   : > { %p6337_p4 = pneg %p7105_p3 }
  0x1b   : > { %7990 = sst [smem:[#allocation30_spill]] %s7989_s20 }
  0x1c   : > { %p7113_p5 = pnand %p6337_p4, %p7972_p1  ;;  %s6541_s26 = scalar_lea.hbm %s7992_s2, 12288 }
  0x1d   : > { %p6542_p6 = scmp.ne.s32.totalorder %s7992_s2, %s6541_s26  ;;  %p6548_p10 = scmp.lt.u32.totalorder %s6541_s26, %s7992_s2 }
  0x1e   : > { %p7127_p7 = pneg %p7113_p5 }
  0x20   : > { %p6544_p8 = pnand %p7127_p7, %p6542_p6 }
  0x22   : > { %p6545_p9 = pneg %p6544_p8 }
  0x24   : > { %p6550_p11 = pnand %p6548_p10, %p6545_p9 }
  0x26   : > { %6553 = shalt.err (!%p6550_p11)
}
  0x27   : > { %s6554_s24 = scalar_lea.vmem %s7103_s18, 12288  ;;  %p6562_p2 = scmp.lt.s32.totalorder %s7103_s18, %s7103_s18 }
  0x28   : > { %p6555_p12 = scmp.ne.s32.totalorder %s7103_s18, %s6554_s24  ;;  %p6563_p4 = scmp.lt.s32.totalorder %s6554_s24, %s6554_s24 }
  0x2a   : > { %p6557_p13 = pnand %p6555_p12, %p7127_p7  ;;  %p6564_p6 = por %p6563_p4, %p6562_p2 }
  0x2c   : > { %p6558_p0 = pneg %p6557_p13 }
  0x2e   : > { %p6565_p8 = pnand %p6564_p6, %p6558_p0 }
  0x30   : > { %6568 = shalt.err (!%p6565_p8)
}
  0x31   : > { %s6969_s25 = smov 384   ;;  %s6970_s14 = smov 24  }
  0x32   : > { %6340 = dma.hbm_to_vmem [thread:$0]  (!%p7113_p5), %s7992_s2, 12288, %s7103_s18, [#allocation5], %s6969_s25, %s6969_s25, %s6970_s14  }
  0x33   : > { %s7994_s4 = sld [smem:[#allocation34_spill]] }
  0x39   : > { %s6569_s0 = scalar_lea.hbm %s7994_s4, 4096 }
  0x3a   : > { %p6570_p9 = scmp.ne.s32.totalorder %s7994_s4, %s6569_s0  ;;  %p6576_p12 = scmp.lt.u32.totalorder %s6569_s0, %s7994_s4 }
  0x3c   : > { %p6572_p10 = pnand %p6570_p9, %p7127_p7 }
  0x3e   : > { %p6573_p11 = pneg %p6572_p10 }
  0x40   : > { %p6578_p13 = pnand %p6576_p12, %p6573_p11 }
  0x42   : > { %6581 = shalt.err (!%p6578_p13)
}
  0x43   : > { %s6582_s18 = scalar_lea.vmem %s7117_s22, 4096  ;;  %p6590_p6 = scmp.lt.s32.totalorder %s7117_s22, %s7117_s22 }
  0x44   : > { %p6583_p0 = scmp.ne.s32.totalorder %s7117_s22, %s6582_s18  ;;  %p6591_p8 = scmp.lt.s32.totalorder %s6582_s18, %s6582_s18 }
  0x46   : > { %p6585_p2 = pnand %p6583_p0, %p7127_p7  ;;  %p6592_p9 = por %p6591_p8, %p6590_p6 }
  0x48   : > { %p6586_p4 = pneg %p6585_p2 }
  0x4a   : > { %p6593_p10 = pnand %p6592_p9, %p6586_p4 }
  0x4c   : > { %6596 = shalt.err (!%p6593_p10)
}
  0x4d   : > { %s7974_s1 = smov 128   ;;  %s7979_s0 = smov 8  }
  0x4e   : > { %6346 = dma.hbm_to_vmem [thread:$0]  (!%p7113_p5), %s7994_s4, 4096, %s7117_s22, [#allocation8], %s7974_s1, %s7974_s1, %s7979_s0  }
  0x4f   : > { %s6973_s25 = smov [#allocation10]   ;;  %s6974_s26 = smov [#allocation13]  }
  0x50   : > { %s432_s14 = sshll.u32 %s6973_s25, 4  ;;  %s458_s27 = sshll.u32 %s6974_s26, 4  ;;  %s433_s14 = int_to_ptr.vmem [resolvable:$true] %s432_s14  ;;  %s7174_s27 = int_to_ptr.vmem [resolvable:$true] %s458_s27 }
  0x51   : > { %s7995_s6 = sld [smem:[#allocation35_spill]] }
  0x57   : > { %s6597_s24 = scalar_lea.hbm %s7995_s6, 32 }
  0x58   : > { %p6598_p11 = scmp.ne.s32.totalorder %s7995_s6, %s6597_s24  ;;  %p6604_p0 = scmp.lt.u32.totalorder %s6597_s24, %s7995_s6 }
  0x5a   : > { %p6600_p12 = pnand %p6598_p11, %p7127_p7 }
  0x5c   : > { %p6601_p13 = pneg %p6600_p12 }
  0x5e   : > { %p6606_p2 = pnand %p6604_p0, %p6601_p13 }
  0x60   : > { %6609 = shalt.err (!%p6606_p2)
}
  0x61   : > { %s6610_s20 = scalar_lea.vmem %s433_s14, 32  ;;  %p6618_p9 = scmp.lt.s32.totalorder %s433_s14, %s433_s14 }
  0x62   : > { %p6611_p4 = scmp.ne.s32.totalorder %s433_s14, %s6610_s20  ;;  %p6619_p10 = scmp.lt.s32.totalorder %s6610_s20, %s6610_s20 }
  0x64   : > { %p6613_p6 = pnand %p6611_p4, %p7127_p7  ;;  %p6620_p1 = por %p6619_p10, %p6618_p9 }
  0x66   : > { %p6614_p8 = pneg %p6613_p6 }
  0x68   : > { %p6621_p3 = pnand %p6620_p1, %p6614_p8 }
  0x6a   : > { %6624 = shalt.err (!%p6621_p3)
}
  0x6b   : > { %s7975_s2 = smov 16   ;;  %s7977_s25 = smov 1  }
  0x6c   : > { %6352 = dma.hbm_to_vmem [thread:$0]  (!%p7113_p5), %s7995_s6, 32, %s433_s14, [#allocation11], %s7975_s2, %s7975_s2, %s7977_s25  }
  0x6d   : > { %s7996_s8 = sld [smem:[#allocation36_spill]] }
  0x73   : > { %s6625_s18 = scalar_lea.hbm %s7996_s8, 16384 }
  0x74   : > { %p6626_p1 = scmp.ne.s32.totalorder %s7996_s8, %s6625_s18  ;;  %p6632_p12 = scmp.lt.u32.totalorder %s6625_s18, %s7996_s8 }
  0x76   : > { %p6628_p3 = pnand %p6626_p1, %p7127_p7 }
  0x78   : > { %p6629_p11 = pneg %p6628_p3 }
  0x7a   : > { %p6634_p13 = pnand %p6632_p12, %p6629_p11 }
  0x7c   : > { %6637 = shalt.err (!%p6634_p13)
}
  0x7d   : > { %s6638_s14 = scalar_lea.vmem %s7174_s27, 16384  ;;  %p6646_p6 = scmp.lt.s32.totalorder %s7174_s27, %s7174_s27 }
  0x7e   : > { %p6639_p0 = scmp.ne.s32.totalorder %s7174_s27, %s6638_s14  ;;  %p6647_p8 = scmp.lt.s32.totalorder %s6638_s14, %s6638_s14 }
  0x80   : > { %p6641_p2 = pnand %p6639_p0, %p7127_p7  ;;  %p6648_p9 = por %p6647_p8, %p6646_p6 }
  0x82   : > { %p6642_p4 = pneg %p6641_p2 }
  0x84   : > { %p6649_p10 = pnand %p6648_p9, %p6642_p4 }
  0x86   : > { %6652 = shalt.err (!%p6649_p10)
}
  0x87   : > { %s6977_s26 = smov 512   ;;  %s6978_s1 = smov 32  }
  0x88   : > { %6358 = dma.hbm_to_vmem [thread:$0]  (!%p7113_p5), %s7996_s8, 16384, %s7174_s27, [#allocation14], %s6977_s26, %s6977_s26, %s6978_s1  }
  0x89   : > { %s6979_s24 = smov [#allocation16]   ;;  %s6980_s19 = smov [#allocation19]  }
  0x8a   : > { %s484_s18 = sshll.u32 %s6979_s24, 4  ;;  %s510_s22 = sshll.u32 %s6980_s19, 4  ;;  %s485_s18 = int_to_ptr.vmem [resolvable:$true] %s484_s18  ;;  %s7220_s22 = int_to_ptr.vmem [resolvable:$true] %s510_s22 }
  0x8b   : > { %s7997_s10 = sld [smem:[#allocation37_spill]] }
  0x91   : > { %s6653_s2 = scalar_lea.hbm %s7997_s10, 16384 }
  0x92   : > { %p6654_p1 = scmp.ne.s32.totalorder %s7997_s10, %s6653_s2  ;;  %p6660_p12 = scmp.lt.u32.totalorder %s6653_s2, %s7997_s10 }
  0x94   : > { %p6656_p3 = pnand %p6654_p1, %p7127_p7 }
  0x96   : > { %p6657_p11 = pneg %p6656_p3 }
  0x98   : > { %p6662_p13 = pnand %p6660_p12, %p6657_p11 }
  0x9a   : > { %6665 = shalt.err (!%p6662_p13)
}
  0x9b   : > { %s6666_s26 = scalar_lea.vmem %s485_s18, 16384  ;;  %p6674_p6 = scmp.lt.s32.totalorder %s485_s18, %s485_s18 }
  0x9c   : > { %p6667_p0 = scmp.ne.s32.totalorder %s485_s18, %s6666_s26  ;;  %p6675_p8 = scmp.lt.s32.totalorder %s6666_s26, %s6666_s26 }
  0x9e   : > { %p6669_p2 = pnand %p6667_p0, %p7127_p7  ;;  %p6676_p9 = por %p6675_p8, %p6674_p6 }
  0xa0   : > { %p6670_p4 = pneg %p6669_p2 }
  0xa2   : > { %p6677_p10 = pnand %p6676_p9, %p6670_p4 }
  0xa4   : > { %6680 = shalt.err (!%p6677_p10)
}
  0xa5   : > { %s7998_s0 = smov 8   ;;  %s7999_s25 = smov 128  }
  0xa6   : > { %6364 = dma.hbm_to_vmem [thread:$0]  (!%p7113_p5), %s7997_s10, 16384, %s485_s18, [#allocation17], %s7999_s25, %s7999_s25, %s7998_s0  }
  0xa7   : > { %s6681_s19 = scalar_lea.hbm %s7965_s12, 32 }
  0xa8   : > { %p6682_p1 = scmp.ne.s32.totalorder %s7965_s12, %s6681_s19  ;;  %p6688_p12 = scmp.lt.u32.totalorder %s6681_s19, %s7965_s12 }
  0xaa   : > { %p6684_p3 = pnand %p6682_p1, %p7127_p7 }
  0xac   : > { %p6685_p11 = pneg %p6684_p3 }
  0xae   : > { %p6690_p13 = pnand %p6688_p12, %p6685_p11 }
  0xb0   : > { %6693 = shalt.err (!%p6690_p13)
}
  0xb1   : > { %s6694_s18 = scalar_lea.vmem %s7220_s22, 32  ;;  %p6702_p6 = scmp.lt.s32.totalorder %s7220_s22, %s7220_s22 }
  0xb2   : > { %p6695_p0 = scmp.ne.s32.totalorder %s7220_s22, %s6694_s18  ;;  %p6703_p8 = scmp.lt.s32.totalorder %s6694_s18, %s6694_s18 }
  0xb4   : > { %p6697_p2 = pnand %p6695_p0, %p7127_p7  ;;  %p6704_p9 = por %p6703_p8, %p6702_p6 }
  0xb6   : > { %p6698_p4 = pneg %p6697_p2 }
  0xb8   : > { %p6705_p10 = pnand %p6704_p9, %p6698_p4 }
  0xba   : > { %6708 = shalt.err (!%p6705_p10)
}
  0xbb   : > { %s8000_s26 = smov 1   ;;  %s8001_s0 = smov 16  }
  0xbc   : > { %6370 = dma.hbm_to_vmem [thread:$0]  (!%p7113_p5), %s7965_s12, 32, %s7220_s22, [#allocation20], %s8001_s0, %s8001_s0, %s8000_s26  }
  0xbd   : > { %s6981_s2 = smov [#allocation6]   ;;  %s6709_s20 = scalar_lea.hbm %s7956_s3, 96 }
  0xbe   : > { %s393_s21 = sshll.u32 %s6981_s2, 4  ;;  %p6710_p1 = scmp.ne.s32.totalorder %s7956_s3, %s6709_s20  ;;  %s394_s21 = int_to_ptr.vmem [resolvable:$true] %s393_s21 }
  0xbf   : > { %p6716_p12 = scmp.lt.u32.totalorder %s6709_s20, %s7956_s3 }
  0xc0   : > { %p6712_p3 = pnand %p6710_p1, %p7127_p7 }
  0xc2   : > { %p6713_p11 = pneg %p6712_p3 }
  0xc4   : > { %p6718_p13 = pnand %p6716_p12, %p6713_p11 }
  0xc6   : > { %6721 = shalt.err (!%p6718_p13)
}
  0xc7   : > { %s6722_s22 = scalar_lea.vmem %s394_s21, 96  ;;  %p6730_p6 = scmp.lt.s32.totalorder %s394_s21, %s394_s21 }
  0xc8   : > { %p6723_p0 = scmp.ne.s32.totalorder %s394_s21, %s6722_s22  ;;  %p6731_p8 = scmp.lt.s32.totalorder %s6722_s22, %s6722_s22 }
  0xca   : > { %p6725_p2 = pnand %p6723_p0, %p7127_p7  ;;  %p6732_p9 = por %p6731_p8, %p6730_p6 }
  0xcc   : > { %p6726_p4 = pneg %p6725_p2 }
  0xce   : > { %p6733_p10 = pnand %p6732_p9, %p6726_p4 }
  0xd0   : > { %6736 = shalt.err (!%p6733_p10)
}
  0xd1   : > { %s6982_s25 = smov 48   ;;  %s6983_s1 = smov 3  }
  0xd2   : > { %6343 = dma.hbm_to_vmem [thread:$0]  (!%p7113_p5), %s7956_s3, 96, %s394_s21, [#allocation5], %s6982_s25, %s6982_s25, %s6983_s1  }
  0xd3   : > { %s6984_s19 = smov [#allocation9]   ;;  %s6985_s14 = smov [#allocation12]  }
  0xd4   : > { %s419_s20 = sshll.u32 %s6984_s19, 4  ;;  %s445_s28 = sshll.u32 %s6985_s14, 4  ;;  %s420_s20 = int_to_ptr.vmem [resolvable:$true] %s419_s20  ;;  %s446_s28 = int_to_ptr.vmem [resolvable:$true] %s445_s28 }
  0xd5   : > { %s6737_s22 = scalar_lea.hbm %s7958_s5, 32 }
  0xd6   : > { %p6738_p1 = scmp.ne.s32.totalorder %s7958_s5, %s6737_s22  ;;  %p6744_p12 = scmp.lt.u32.totalorder %s6737_s22, %s7958_s5 }
  0xd8   : > { %p6740_p3 = pnand %p6738_p1, %p7127_p7 }
  0xda   : > { %p6741_p11 = pneg %p6740_p3 }
  0xdc   : > { %p6746_p13 = pnand %p6744_p12, %p6741_p11 }
  0xde   : > { %6749 = shalt.err (!%p6746_p13)
}
  0xdf   : > { %s6750_s21 = scalar_lea.vmem %s420_s20, 32  ;;  %p6758_p6 = scmp.lt.s32.totalorder %s420_s20, %s420_s20 }
  0xe0   : > { %p6751_p0 = scmp.ne.s32.totalorder %s420_s20, %s6750_s21  ;;  %p6759_p8 = scmp.lt.s32.totalorder %s6750_s21, %s6750_s21 }
  0xe2   : > { %p6753_p2 = pnand %p6751_p0, %p7127_p7  ;;  %p6760_p9 = por %p6759_p8, %p6758_p6 }
  0xe4   : > { %p6754_p4 = pneg %p6753_p2 }
  0xe6   : > { %p6761_p10 = pnand %p6760_p9, %p6754_p4 }
  0xe8   : > { %6764 = shalt.err (!%p6761_p10)
}
  0xe9   : > { %6349 = dma.hbm_to_vmem [thread:$0]  (!%p7113_p5), %s7958_s5, 32, %s420_s20, [#allocation8], %s8001_s0, %s8001_s0, %s8000_s26  }
  0xea   : > { %s6765_s25 = scalar_lea.hbm %s7960_s7, 32 }
  0xeb   : > { %p6766_p1 = scmp.ne.s32.totalorder %s7960_s7, %s6765_s25  ;;  %p6772_p12 = scmp.lt.u32.totalorder %s6765_s25, %s7960_s7 }
  0xed   : > { %p6768_p3 = pnand %p6766_p1, %p7127_p7 }
  0xef   : > { %p6769_p11 = pneg %p6768_p3 }
  0xf1   : > { %p6774_p13 = pnand %p6772_p12, %p6769_p11 }
  0xf3   : > { %6777 = shalt.err (!%p6774_p13)
}
  0xf4   : > { %s6778_s14 = scalar_lea.vmem %s446_s28, 32  ;;  %p6786_p6 = scmp.lt.s32.totalorder %s446_s28, %s446_s28 }
  0xf5   : > { %p6779_p0 = scmp.ne.s32.totalorder %s446_s28, %s6778_s14  ;;  %p6787_p8 = scmp.lt.s32.totalorder %s6778_s14, %s6778_s14 }
  0xf7   : > { %p6781_p2 = pnand %p6779_p0, %p7127_p7  ;;  %p6788_p9 = por %p6787_p8, %p6786_p6 }
  0xf9   : > { %p6782_p4 = pneg %p6781_p2 }
  0xfb   : > { %p6789_p10 = pnand %p6788_p9, %p6782_p4 }
  0xfd   : > { %6792 = shalt.err (!%p6789_p10)
}
  0xfe   : > { %6355 = dma.hbm_to_vmem [thread:$0]  (!%p7113_p5), %s7960_s7, 32, %s446_s28, [#allocation11], %s8001_s0, %s8001_s0, %s8000_s26  }
  0xff   : > { %s6986_s18 = smov [#allocation15]   ;;  %s6793_s6 = scalar_lea.hbm %s7962_s9, 128 }
 0x100   : > { %s471_s22 = sshll.u32 %s6986_s18, 4  ;;  %p6794_p1 = scmp.ne.s32.totalorder %s7962_s9, %s6793_s6  ;;  %s472_s22 = int_to_ptr.vmem [resolvable:$true] %s471_s22 }
 0x101   : > { %p6800_p12 = scmp.lt.u32.totalorder %s6793_s6, %s7962_s9 }
 0x102   : > { %p6796_p3 = pnand %p6794_p1, %p7127_p7 }
 0x104   : > { %p6797_p11 = pneg %p6796_p3 }
 0x106   : > { %p6802_p13 = pnand %p6800_p12, %p6797_p11 }
 0x108   : > { %6805 = shalt.err (!%p6802_p13)
}
 0x109   : > { %s6806_s28 = scalar_lea.vmem %s472_s22, 128  ;;  %p6814_p6 = scmp.lt.s32.totalorder %s472_s22, %s472_s22 }
 0x10a   : > { %p6807_p0 = scmp.ne.s32.totalorder %s472_s22, %s6806_s28  ;;  %p6815_p8 = scmp.lt.s32.totalorder %s6806_s28, %s6806_s28 }
 0x10c   : > { %p6809_p2 = pnand %p6807_p0, %p7127_p7  ;;  %p6816_p9 = por %p6815_p8, %p6814_p6 }
 0x10e   : > { %p6810_p4 = pneg %p6809_p2 }
 0x110   : > { %p6817_p10 = pnand %p6816_p9, %p6810_p4 }
 0x112   : > { %6820 = shalt.err (!%p6817_p10)
}
 0x113   : > { %s6987_s2 = smov 64   ;;  %s6988_s24 = smov 4  }
 0x114   : > { %6361 = dma.hbm_to_vmem [thread:$0]  (!%p7113_p5), %s7962_s9, 128, %s472_s22, [#allocation14], %s6987_s2, %s6987_s2, %s6988_s24  }
 0x115   : > { %s6989_s20 = smov [#allocation18]   ;;  %s6990_s18 = smov [#allocation21]  }
 0x116   : > { %s497_s27 = sshll.u32 %s6989_s20, 4  ;;  %s523_s21 = sshll.u32 %s6990_s18, 4  ;;  %s498_s27 = int_to_ptr.vmem [resolvable:$true] %s497_s27  ;;  %s7347_s21 = int_to_ptr.vmem [resolvable:$true] %s523_s21 }
 0x117   : > { %s6821_s8 = scalar_lea.hbm %s7964_s11, 32 }
 0x118   : > { %p6822_p1 = scmp.ne.s32.totalorder %s7964_s11, %s6821_s8  ;;  %p6828_p12 = scmp.lt.u32.totalorder %s6821_s8, %s7964_s11 }
 0x11a   : > { %p6824_p3 = pnand %p6822_p1, %p7127_p7 }
 0x11c   : > { %p6825_p11 = pneg %p6824_p3 }
 0x11e   : > { %p6830_p13 = pnand %p6828_p12, %p6825_p11 }
 0x120   : > { %6833 = shalt.err (!%p6830_p13)
}
 0x121   : > { %s6834_s28 = scalar_lea.vmem %s498_s27, 32  ;;  %p6842_p6 = scmp.lt.s32.totalorder %s498_s27, %s498_s27 }
 0x122   : > { %p6835_p0 = scmp.ne.s32.totalorder %s498_s27, %s6834_s28  ;;  %p6843_p8 = scmp.lt.s32.totalorder %s6834_s28, %s6834_s28 }
 0x124   : > { %p6837_p2 = pnand %p6835_p0, %p7127_p7  ;;  %p6844_p9 = por %p6843_p8, %p6842_p6 }
 0x126   : > { %p6838_p4 = pneg %p6837_p2 }
 0x128   : > { %p6845_p10 = pnand %p6844_p9, %p6838_p4 }
 0x12a   : > { %6848 = shalt.err (!%p6845_p10)
}
 0x12b   : > { %6367 = dma.hbm_to_vmem [thread:$0]  (!%p7113_p5), %s7964_s11, 32, %s498_s27, [#allocation17], %s8001_s0, %s8001_s0, %s8000_s26  }
 0x12c   : > { %s6849_s20 = scalar_lea.hbm %s7966_s13, 32 }
 0x12d   : > { %p6850_p1 = scmp.ne.s32.totalorder %s7966_s13, %s6849_s20  ;;  %p6856_p12 = scmp.lt.u32.totalorder %s6849_s20, %s7966_s13 }
 0x12f   : > { %p6852_p3 = pnand %p6850_p1, %p7127_p7 }
 0x131   : > { %p6853_p11 = pneg %p6852_p3 }
 0x133   : > { %p6858_p13 = pnand %p6856_p12, %p6853_p11 }
 0x135   : > { %6861 = shalt.err (!%p6858_p13)
}
 0x136   : > { %s6862_s27 = scalar_lea.vmem %s7347_s21, 32  ;;  %p6870_p6 = scmp.lt.s32.totalorder %s7347_s21, %s7347_s21 }
 0x137   : > { %p6863_p0 = scmp.ne.s32.totalorder %s7347_s21, %s6862_s27  ;;  %p6871_p8 = scmp.lt.s32.totalorder %s6862_s27, %s6862_s27 }
 0x139   : > { %p6865_p2 = pnand %p6863_p0, %p7127_p7  ;;  %p6872_p9 = por %p6871_p8, %p6870_p6 }
 0x13b   : > { %p6866_p4 = pneg %p6865_p2 }
 0x13d   : > { %p6873_p10 = pnand %p6872_p9, %p6866_p4 }
 0x13f   : > { %6876 = shalt.err (!%p6873_p10)
}
 0x140   : > { %s8002_s17 = sld [smem:[#allocation29_spill]]  ;;  %s7397_s23 = sadd.s32 1, %s6965_s16  }
 0x141   : > { %6373 = dma.hbm_to_vmem [thread:$0]  (!%p7113_p5), %s7966_s13, 32, %s7347_s21, [#allocation20], %s8001_s0, %s8001_s0, %s8000_s26  }
 0x142   : > { %s66_s1 = sadd.s32 1, %s6961_s15  ;;  %s63_s22 = ssub.s32 %s6965_s16, %s7397_s23 }
 0x143   : > { %p73_p7 = scmp.ne.s32.totalorder %s6961_s15, %s6957_s30  ;;  %p64_p1 = scmp.eq.s32.totalorder %s63_s22, 0 }
 0x144   : > { %p74_p3 = scmp.eq.s32.totalorder %s6965_s16, 0  ;;  %p79_p11 = scmp.ne.s32.totalorder %s6957_s30, %s6953_s29 }
 0x145   : > { %p6390_p12 = scmp.lt.s32.totalorder %s6965_s16, 2  ;;  %s544_s24 = sand.u32 1, %s6961_s15  }
 0x146   : > { %s7409_s28 = scalar_select %p64_p1, %s6961_s15, %s66_s1  }
 0x147   : > { %p75_p13 = por %p74_p3, %p73_p7  ;;  %p8003_p0 = scmp.eq.s32.totalorder %s8002_s17, 0 }
 0x148   : > { %s5220_s26 = sshll.u32 %s6965_s16, 4  ;;  %s8005_s19 = sld [smem:[#allocation32_spill]] }
 0x149   : > { %p7413_p2 = por %p8003_p0, %p79_p11  ;;  %s547_s29 = scalar_lea.vmem [#allocation2], %s544_s24 }
 0x14a   : > { %s554_s20 = sshll.u32 %s547_s29, 4  ;;  %p7426_p5 = pnand %p6390_p12, %p75_p13  ;;  %s7424_s20 = int_to_ptr.vmem [resolvable:$true] %s554_s20 }
 0x14b   : > { %s545_s16 = scalar_lea.sflag [#allocation3], %s544_s24 }
 0x14c   : > { %p6879_p6 = pneg %p7426_p5 }
 0x14e   : > { %s7422_s14 = scalar_lea.hbm %s8005_s19, %s5220_s26  ;;  %s6882_s27 = scalar_lea.hbm %s8005_s19, 2928 }
 0x14f   : > { %s6877_s4 = scalar_lea.hbm %s7422_s14, 16  ;;  %p6883_p10 = scmp.lt.u32.totalorder %s7422_s14, %s8005_s19 }
 0x150   : > { %p6878_p4 = scmp.ne.s32.totalorder %s7422_s14, %s6877_s4  ;;  %p6884_p7 = scmp.lt.u32.totalorder %s6882_s27, %s6877_s4 }
 0x151   : > { %p6886_p3 = scmp.lt.u32.totalorder %s6877_s4, %s7422_s14 }
 0x152   : > { %p6880_p8 = pnand %p6879_p6, %p6878_p4  ;;  %p6885_p1 = por %p6884_p7, %p6883_p10 }
 0x154   : > { %p6881_p9 = pneg %p6880_p8  ;;  %p6887_p11 = por %p6886_p3, %p6885_p1 }
 0x156   : > { %p6888_p12 = pnand %p6887_p11, %p6881_p9 }
 0x158   : > { %6891 = shalt.err (!%p6888_p12)
}
 0x159   : > { %s6892_s17 = scalar_lea.vmem %s7424_s20, 16  ;;  %s6991_s1 = smov [#allocation2]  }
 0x15a   : > { %p6893_p13 = scmp.ne.s32.totalorder %s7424_s20, %s6892_s17  ;;  %s6897_s22 = sshll.u32 %s6991_s1, 4  ;;  %s6898_s22 = int_to_ptr.vmem [resolvable:$false] %s6897_s22 }
 0x15b   : > { %s6899_s24 = scalar_lea.vmem %s6898_s22, 32  ;;  %p6900_p8 = scmp.lt.s32.totalorder %s7424_s20, %s6898_s22 }
 0x15c   : > { %p6895_p0 = pnand %p6893_p13, %p6879_p6  ;;  %p6901_p10 = scmp.lt.s32.totalorder %s6899_s24, %s6892_s17 }
 0x15e   : > { %p6896_p4 = pneg %p6895_p0  ;;  %p6902_p7 = por %p6901_p10, %p6900_p8 }
 0x160   : > { %p6903_p1 = pnand %p6902_p7, %p6896_p4 }
 0x162   : > { %6906 = shalt.err (!%p6903_p1)
}
 0x163   : > { %6377 = dma.hbm_to_vmem [thread:$0]  (!%p7426_p5), %s7422_s14, 16, %s7424_s20, %s545_s16  }
 0x164   : > { %s8007_s26 = sld [smem:[#allocation30_spill]] }
 0x16a   : > { %p8008_p9 = scmp.ne.s32.totalorder %s8007_s26, 0 }
 0x16b   : > { %s565_s0 = sand.u32 (!%p8008_p9), 1, %s6957_s30  }
 0x16c   : > { %563 = sbr.rel (%p8008_p9) target bundleno = 8462 (0x210e), region = 76  ;;  %s566_s21 = scalar_lea.sflag (!%p8008_p9), [#allocation3], %s565_s0 }
 0x16d   : > { %s7458_s29 = scalar_lea.vmem (!%p8008_p9), [#allocation2], %s565_s0 }
 0x173   : > { %6924 = dma.done.wait (%p7413_p2), %s566_s21, 16  }
 0x174   : > { %6926 = vsyncadd (%p7413_p2), %s566_s21, 4294967280  ;;  %s8009_s4 = sld [smem:[#allocation29_spill]] }
 0x17a   : > { %p8010_p6 = scmp.eq.s32.totalorder %s8009_s4, 0 }
 0x17c   : > { %6928 = dma.done.wait (%p8010_p6), [#allocation5], 12384   ;;  %p8011_p3 = pmov %p8010_p6 }
 0x17e   : > { %6930 = vsyncadd (%p8011_p3), [#allocation5], 4294954912  ;;  %p8012_p5 = pmov %p8011_p3 }
 0x17f   : > { %p8013_p11 = pmov %p8011_p3 }
 0x180   : > { %6932 = dma.done.wait (%p8012_p5), [#allocation8], 4128  }
 0x181   : > { %6934 = vsyncadd (%p8013_p11), [#allocation8], 4294963168  ;;  %p8014_p12 = pmov %p8011_p3 }
 0x182   : > { %p8015_p13 = pmov %p8011_p3 }
 0x183   : > { %6936 = dma.done.wait (%p8014_p12), [#allocation11], 64  }
 0x184   : > { %6938 = vsyncadd (%p8015_p13), [#allocation11], 4294967232  ;;  %p8016_p2 = pmov %p8011_p3 }
 0x186   : > { %6940 = dma.done.wait (%p8016_p2), [#allocation14], 16512   ;;  %p8017_p0 = pmov %p8016_p2 }
 0x188   : > { %6942 = vsyncadd (%p8017_p0), [#allocation14], 4294950784  ;;  %p8018_p4 = pmov %p8017_p0 }
 0x189   : > { %p8019_p8 = pmov %p8017_p0 }
 0x18a   : > { %6944 = dma.done.wait (%p8018_p4), [#allocation17], 16416  }
 0x18b   : > { %6946 = vsyncadd (%p8019_p8), [#allocation17], 4294950880  ;;  %p8020_p10 = pmov %p8017_p0 }
 0x18c   : > { %p8021_p7 = pmov %p8017_p0 }
 0x18d   : > { %6948 = dma.done.wait (%p8020_p10), [#allocation20], 64  }
 0x18e   : > { %6950 = vsyncadd (%p8021_p7), [#allocation20], 4294967232  ;;  %v6992_v0 = vmov 0.0   ;;  %v6993_v1 = vmov 0.0|0.0   ;;  %v682_v2 = vld [vmem:[#allocation4 + $0x8] sm:$0xff]  ;;  %v685_v3 = vld [vmem:[#allocation4 + $0x20] sm:$0xff] }
 0x18f   : > { %810 = vmatprep.mubr.f32.mxu0 %v6992_v0  ;;  %5903 = vmatprep.subr.bf16.mxu1 %v6993_v1  ;;  %v681_v4 = vld [vmem:[#allocation4] sm:$0xff]  ;;  %v5871_v5 = vpack.c.bf16 %v685_v3, %v682_v2  ;;  %v684_v6 = vld [vmem:[#allocation4 + $0x18] sm:$0xff]  ;;  %v691_v8 = vld [vmem:[#allocation4 + $0x50] sm:$0xff]  ;;  %p663_p1 = scmp.lt.s32.totalorder %s8009_s4, 1  ;;  %s8022_s18 = sld [smem:[#allocation31_spill]]  ;;  %vm6994_vm0 = vmmov 0  }
 0x190   : > { %v688_v7 = vld [vmem:[#allocation4 + $0x38] sm:$0xff]  ;;  %v5873_v9 = vpack.c.bf16 %v684_v6, %v681_v4  ;;  %v687_v11 = vld [vmem:[#allocation4 + $0x30] sm:$0xff]  ;;  %v690_v12 = vld [vmem:[#allocation4 + $0x48] sm:$0xff]  ;;  %5603 = vmatprep.mubr.msk.f32.mxu1 %vm6994_vm0, %v6992_v0  ;;  %vm887_vm1 = vcmask 130048   ;;  %s6995_s6 = smov 112   ;;  %vm965_vm2 = vcmask 64512  }
 0x191   : > { %v5875_v10 = vpack.c.bf16 %v691_v8, %v688_v7  ;;  %v694_v13 = vld [vmem:[#allocation4 + $0x68] sm:$0xff]  ;;  %5872 = vmatprep.subr.bf16.mxu0 %v5871_v5  ;;  %v697_v14 = vld [vmem:[#allocation4 + $0x80] sm:$0xff]  ;;  %v5877_v15 = vpack.c.bf16 %v690_v12, %v687_v11  ;;  %v696_v18 = vld [vmem:[#allocation4 + $0x78] sm:$0xff]  ;;  %s8029_s4 = smov (!%p663_p1, %s8009_s4), 1  ;;  %s6996_s8 = smov 96   ;;  %vm2242_vm3 = vcmask 261120  }
 0x192   : > { %5874 = vmatpush1.bf16.msra.mxu0 %v5873_v9  ;;  %v5879_v16 = vpack.c.bf16 %v697_v14, %v694_v13  ;;  %v693_v17 = vld [vmem:[#allocation4 + $0x60] sm:$0xff]  ;;  %v700_v19 = vld [vmem:[#allocation4 + $0x98] sm:$0xff]  ;;  %v703_v20 = vld [vmem:[#allocation4 + $0xb0] sm:$0xff]  ;;  %s5234_s2 = sshll.u32 %s8029_s4, 3  ;;  %s6997_s27 = smov 80   ;;  %vm2244_vm4 = vcmask 392192  }
 0x193   : > { %5876 = vmatprep.subr.bf16.mxu0 %v5875_v10  ;;  %v5881_v21 = vpack.c.bf16 %v696_v18, %v693_v17  ;;  %v5883_v22 = vpack.c.bf16 %v703_v20, %v700_v19  ;;  %v699_v23 = vld [vmem:[#allocation4 + $0x90] sm:$0xff]  ;;  %v702_v24 = vld [vmem:[#allocation4 + $0xa8] sm:$0xff]  ;;  %v709_v26 = vld [vmem:[#allocation4 + $0xe0] sm:$0xff]  ;;  %s6998_s10 = smov 64   ;;  %s6999_s25 = smov 48   ;;  %vm2246_vm5 = vcmask 523264  }
 0x194   : > { %v706_v25 = vld [vmem:[#allocation4 + $0xc8] sm:$0xff]  ;;  %v683_v27 = vld [vmem:[#allocation4 + $0x10] sm:$0xff]  ;;  %v5885_v29 = vpack.c.bf16 %v702_v24, %v699_v23  ;;  %v689_v31 = vld [vmem:[#allocation4 + $0x40] sm:$0xff]  ;;  %s7000_s17 = smov 16   ;;  %s7001_s1 = smov 32   ;;  %vm2248_vm6 = vcmask 654336  }
 0x195   : > { %v686_v28 = vld [vmem:[#allocation4 + $0x28] sm:$0xff]  ;;  %v692_v32 = vld [vmem:[#allocation4 + $0x58] sm:$0xff]  ;;  %v5887_v33 = vpack.c.bf16 %v709_v26, %v706_v25  ;;  %v705_v34 = vld [vmem:[#allocation4 + $0xc0] sm:$0xff]  ;;  %s666_s16 = scalar_lea.vmem %s8022_s18, %s5234_s2  ;;  %vm2250_vm7 = vcmask 785408   ;;  %vm2252_vm8 = vcmask 916480   ;;  %s8023_s26 = sld [smem:[#allocation38_spill]] }
 0x196   : > { %5878 = vmatpush1.bf16.msra.mxu0 %v5877_v15  ;;  %v5904_v30 = vpack.c.bf16 %v686_v28, %v683_v27  ;;  %v708_v35 = vld [vmem:[#allocation4 + $0xd8] sm:$0xff]  ;;  %v715_v37 = vld [vmem:[#allocation4 + $0x110] sm:$0xff]  ;;  %v5907_v38 = vpack.c.bf16 %v692_v32, %v689_v31  ;;  %v698_v40 = vld [vmem:[#allocation4 + $0x88] sm:$0xff] }
 0x197   : > { %5880 = vmatprep.subr.bf16.mxu0 %v5879_v16  ;;  %v712_v36 = vld [vmem:[#allocation4 + $0xf8] sm:$0xff]  ;;  %v695_v39 = vld [vmem:[#allocation4 + $0x70] sm:$0xff]  ;;  %v5889_v41 = vpack.c.bf16 %v708_v35, %v705_v34  ;;  %v714_v44 = vld [vmem:[#allocation4 + $0x108] sm:$0xff]  ;;  %v731_v16 = vlaneseq }
 0x198   : > { %5905 = vmatpush3.bf16.msra.mxu1 %v5904_v30  ;;  %v5891_v42 = vpack.c.bf16 %v715_v37, %v712_v36  ;;  %v711_v43 = vld [vmem:[#allocation4 + $0xf0] sm:$0xff]  ;;  %v718_v45 = vld [vmem:[#allocation4 + $0x128] sm:$0xff]  ;;  %v721_v46 = vld [vmem:[#allocation4 + $0x140] sm:$0xff]  ;;  %v5910_v47 = vpack.c.bf16 %v698_v40, %v695_v39 }
 0x199   : > { %5906 = vmatprep.subr.bf16.mxu1 %v6993_v1  ;;  %v701_v48 = vld [vmem:[#allocation4 + $0xa0] sm:$0xff]  ;;  %v704_v49 = vld [vmem:[#allocation4 + $0xb8] sm:$0xff]  ;;  %v5893_v50 = vpack.c.bf16 %v714_v44, %v711_v43  ;;  %v5895_v51 = vpack.c.bf16 %v721_v46, %v718_v45  ;;  %v727_v55 = vld [vmem:[#allocation4 + $0x170] sm:$0xff]  ;;  %v7522_v17 = vshrl.u32 %v731_v16, 7 }
 0x19a   : > { %5882 = vmatpush1.bf16.msra.mxu0 %v5881_v21  ;;  %v717_v52 = vld [vmem:[#allocation4 + $0x120] sm:$0xff]  ;;  %v720_v53 = vld [vmem:[#allocation4 + $0x138] sm:$0xff]  ;;  %v5913_v56 = vpack.c.bf16 %v704_v49, %v701_v48  ;;  %v707_v57 = vld [vmem:[#allocation4 + $0xd0] sm:$0xff] }
 0x19b   : > { %5884 = vmatprep.subr.bf16.mxu0 %v5883_v22  ;;  %v724_v54 = vld [vmem:[#allocation4 + $0x158] sm:$0xff]  ;;  %v710_v58 = vld [vmem:[#allocation4 + $0xe8] sm:$0xff]  ;;  %v5897_v59 = vpack.c.bf16 %v720_v53, %v717_v52  ;;  %v723_v62 = vld [vmem:[#allocation4 + $0x150] sm:$0xff]  ;;  %v7525_v18 = vsub.s32 1, %v7522_v17  ;;  %v7528_v20 = vsub.s32 0, %v7522_v17  ;;  %v7548_v27 = vsub.s32 2, %v7522_v17  ;;  %s670_s0 = scalar_lea.vmem %s8023_s26, %s5234_s2 }
 0x19c   : > { %5908 = vmatpush3.bf16.msra.mxu1 %v5907_v38  ;;  %v671_v60 = vld [vmem:[%s666_s16] sm:$0xff]  ;;  %v5899_v61 = vpack.c.bf16 %v727_v55, %v724_v54  ;;  %v726_v63 = vld [vmem:[#allocation4 + $0x168] sm:$0xff]  ;;  %v5916_v2 = vpack.c.bf16 %v710_v58, %v707_v57  ;;  %v719_v10 = vld [vmem:[#allocation4 + $0x130] sm:$0xff] }
 0x19d   : > { %5909 = vmatprep.subr.bf16.mxu1 %v6993_v1  ;;  %v672_v3 = vmul.f32 11.313708, %v671_v60  ;;  %v713_v4 = vld [vmem:[#allocation4 + $0x100] sm:$0xff]  ;;  %v716_v5 = vld [vmem:[#allocation4 + $0x118] sm:$0xff]  ;;  %v5901_v6 = vpack.c.bf16 %v726_v63, %v723_v62  ;;  %v722_v11 = vld [vmem:[#allocation4 + $0x148] sm:$0xff] }
 0x19e   : > { %5886 = vmatpush1.bf16.msra.mxu0 %v5885_v29  ;;  %v5236_v7 = vld [vmem:[%s7458_s29] ss:$0 sm:$0xff]  ;;  %v5919_v8 = vpack.c.bf16 %v716_v5, %v713_v4  ;;  %v5922_v12 = vpack.c.bf16 %v722_v11, %v719_v10  ;;  %v725_v13 = vld [vmem:[#allocation4 + $0x160] sm:$0xff] }
 0x19f   : > { %5888 = vmatprep.subr.bf16.mxu0 %v5887_v33  ;;  %v7507_v9 = vadd.f32 %v5236_v7, %v672_v3  ;;  %v728_v14 = vld [vmem:[#allocation4 + $0x178] sm:$0xff]  ;;  %v729_v19 = vld [vmem:[#allocation6] sm:$0x7] }
 0x1a0   : > { %5911 = vmatpush3.bf16.msra.mxu1 %v5910_v47  ;;  %v5925_v15 = vpack.c.bf16 %v728_v14, %v725_v13  ;;  %v738_v21 = vrot.slane %v729_v19, %v7525_v18  ;;  %v734_v23 = vrot.slane %v729_v19, %v7528_v20  ;;  %v742_v28 = vrot.slane %v729_v19, %v7548_v27 }
 0x1a1   : > { %5912 = vmatprep.subr.bf16.mxu1 %v6993_v1 }
 0x1a2   : > { %5890 = vmatpush1.bf16.msra.mxu0 %v5889_v41 }
 0x1a3   : > { %5892 = vmatprep.subr.bf16.mxu0 %v5891_v42 }
 0x1a4   : > { %5914 = vmatpush3.bf16.msra.mxu1 %v5913_v56 }
 0x1a5   : > { %5915 = vmatprep.subr.bf16.mxu1 %v6993_v1 }
 0x1a6   : > { %5894 = vmatpush1.bf16.msra.mxu0 %v5893_v50 }
 0x1a7   : > { %5896 = vmatprep.subr.bf16.mxu0 %v5895_v51 }
 0x1a8   : > { %5917 = vmatpush3.bf16.msra.mxu1 %v5916_v2 }
 0x1a9   : > { %5918 = vmatprep.subr.bf16.mxu1 %v6993_v1 }
 0x1aa   : > { %5898 = vmatpush1.bf16.msra.mxu0 %v5897_v59 }
 0x1ab   : > { %5900 = vmatprep.subr.bf16.mxu0 %v5899_v61 }
 0x1ac   : > { %5920 = vmatpush3.bf16.msra.mxu1 %v5919_v8 }
 0x1ad   : > { %5921 = vmatprep.subr.bf16.mxu1 %v6993_v1 }
 0x1ae   : > { %5902 = vmatpush1.bf16.msra.mxu0 %v5901_v6 }
 0x1af   : > { %5646 = vmatprep.subr.mxu0 %v6992_v0 }
 0x1b0   : > { %5923 = vmatpush3.bf16.msra.mxu1 %v5922_v12 }
 0x1b1   : > { %811 = vmatmul.mubr.f32.vlgmr.msra.gmra.mrb[0].mxu0 %v7507_v9  ;;  %5924 = vmatprep.subr.bf16.mxu1 %v6993_v1 }
 0x1b2   : > { %5648 = vmatprep.mubr.msk.f32.mxu0 %vm6994_vm0, %v6992_v0 }
 0x1b4   : > { %5926 = vmatpush3.bf16.msra.mxu1 %v5925_v15 }
 0x1b5   : > { %5606 = vmatprep.subr.mxu1 %v6992_v0 }
 0x1b7   : > { %5604 = vmatmul.mubr.f32.vlgmr.msra.gmra.mrb[0].mxu1 %v7507_v9 }
 0x1b8   : > { %5608 = vmatprep.mubr.msk.f32.mxu1 %vm6994_vm0, %v6992_v0 }
 0x284   : > { %v812_v22 = vpop.f32.mrb[0].mxu0 }
 0x285   : > { %v814_v24 = vpop.f32.mrb[1].mxu0  ;;  %v7538_v26 = vadd.f32 %v812_v22, %v734_v23 }
 0x286   : > { %v7532_v25 = vadd.f32 %v814_v24, %v738_v21 }
 0x288   : > { %1052 = vrot.lane.b32.xlu1 %v7532_v25, %s6995_s6  ;;  %5607 = vmatpush3.xpose.msk.msra.mxu1 %vm887_vm1, %v7532_v25 }
 0x289   : > { %5611 = vmatprep.subr.mxu1 %v6992_v0 }
 0x28a   : > { %v883_v29 = vpop.f32.mrb[0].mxu1 }
 0x28b   : > { %5609 = vmatmul.mubr.msk.f32.vlgmr.msra.gmra.mrb[2].mxu1 %vm887_vm1, %v7538_v26  ;;  %v7551_v30 = vadd.f32 %v883_v29, %v742_v28  ;;  %v5605_v31 = vpop.f32.mrb[1].mxu1 }
 0x28c   : > { %1050 = vrot.lane.b32.xlu1 %v7538_v26, %s6995_s6  ;;  %5613 = vmatprep.mubr.msk.f32.mxu1 %vm6994_vm0, %v6992_v0 }
 0x28d   : > { %5612 = vmatpush3.msra.mxu1 %v7551_v30 }
 0x28e   : > { %5616 = vmatprep.subr.mxu1 %v6992_v0 }
 0x2fa   : > { %v1053_v43 = vpop.permute.xlu1 %1052 }
 0x2fe   : > { %v1051_v45 = vpop.permute.xlu1 %1050 }
 0x35e   : > { %v960_v32 = vpop.f32.mrb[2].mxu1 }
 0x35f   : > { %v964_v33 = vmul.f32 0.25, %v960_v32  ;;  %v5610_v34 = vpop.f32.mrb[3].mxu1 }
 0x361   : > { %v966_v35 = vsel %vm965_vm2, %v964_v33, -inf }
 0x362   : > { %967 = vmax.xlane.f32.xlu0 %v966_v35 }
 0x3ef   : > { %v968_v36 = vpop.xlane.xlu0 %967 }
 0x3f0   : > { %v969_v37 = vsub.f32 %v964_v33, %v968_v36 }
 0x3f2   : > { %v970_v38 = vmul.f32 1.442695, %v969_v37 }
 0x3f4   : > { %6469 = vpow2.f32 %v970_v38 }
 0x3fe   : > { %v6470_v39 = vpop.eup %6469 }
 0x3ff   : > { %v972_v40 = vsel %vm965_vm2, %v6470_v39, 0.0 }
 0x400   : > { %973 = vadd.xlane.f32.xlu0 %v972_v40 }
 0x48d   : > { %v974_v41 = vpop.xlane.xlu0 %973 }
 0x48e   : > { %6471 = vrcp.f32 %v974_v41 }
 0x498   : > { %v6472_v42 = vpop.eup %6471 }
 0x499   : > { %v976_v44 = vmul.f32 %v6472_v42, %v6470_v39 }
 0x49b   : > { %5614 = vmatmul.mubr.msk.f32.vlgmr.msra.gmra.mrb[4].mxu1 %vm965_vm2, %v976_v44 }
 0x49c   : > { %5617 = vmatpush3.xpose.msk.msra.mxu1 %vm887_vm1, %v1053_v43  ;;  %5618 = vmatprep.mubr.msk.f32.mxu1 %vm6994_vm0, %v6992_v0 }
 0x49d   : > { %5621 = vmatprep.subr.mxu1 %v6992_v0 }
 0x49f   : > { %5619 = vmatmul.mubr.msk.f32.vlgmr.msra.gmra.mrb[6].mxu1 %vm887_vm1, %v1051_v45 }
 0x4a0   : > { %5623 = vmatprep.mubr.msk.f32.mxu1 %vm6994_vm0, %v6992_v0 }
 0x56e   : > { %v7565_v46 = vpop.f32.mrb[4].mxu1 }
 0x56f   : > { %v5615_v47 = vpop.f32.mrb[5].mxu1 }
 0x572   : > { %v1124_v48 = vpop.f32.mrb[6].mxu1 }
 0x573   : > { %v1128_v49 = vmul.f32 0.25, %v1124_v48  ;;  %v5620_v50 = vpop.f32.mrb[7].mxu1 }
 0x575   : > { %v1129_v51 = vsel %vm965_vm2, %v1128_v49, -inf }
 0x576   : > { %1130 = vmax.xlane.f32.xlu0 %v1129_v51 }
 0x58c   : > { %1141 = vrot.lane.b32.xlu0 %v7551_v30, %s6995_s6 }
 0x590   : > { %1219 = vrot.lane.b32.xlu0 %v7532_v25, %s6996_s8 }
 0x594   : > { %1217 = vrot.lane.b32.xlu0 %v7538_v26, %s6996_s8 }
 0x603   : > { %v1131_v52 = vpop.xlane.xlu0 %1130 }
 0x604   : > { %v1132_v53 = vsub.f32 %v1128_v49, %v1131_v52 }
 0x606   : > { %v1133_v54 = vmul.f32 1.442695, %v1132_v53 }
 0x607   : > { %v1142_v55 = vpop.permute.xlu0 %1141 }
 0x608   : > { %6473 = vpow2.f32 %v1133_v54  ;;  %5622 = vmatpush3.msra.mxu1 %v1142_v55 }
 0x609   : > { %5626 = vmatprep.subr.mxu1 %v6992_v0 }
 0x60b   : > { %v1220_v60 = vpop.permute.xlu0 %1219 }
 0x60f   : > { %v1218_v62 = vpop.permute.xlu0 %1217 }
 0x612   : > { %v6474_v56 = vpop.eup %6473 }
 0x613   : > { %v1135_v57 = vsel %vm965_vm2, %v6474_v56, 0.0 }
 0x614   : > { %1136 = vadd.xlane.f32.xlu1 %v1135_v57 }
 0x625   : > { %1307 = vrot.lane.b32.xlu1 %v7551_v30, %s6996_s8 }
 0x629   : > { %1385 = vrot.lane.b32.xlu1 %v7532_v25, %s6997_s27 }
 0x62d   : > { %1383 = vrot.lane.b32.xlu1 %v7538_v26, %s6997_s27 }
 0x631   : > { %1549 = vrot.lane.b32.xlu1 %v7538_v26, %s6998_s10 }
 0x635   : > { %1717 = vrot.lane.b32.xlu1 %v7532_v25, %s6999_s25 }
 0x639   : > { %1715 = vrot.lane.b32.xlu1 %v7538_v26, %s6999_s25 }
 0x6a1   : > { %v1137_v58 = vpop.xlane.xlu1 %1136 }
 0x6a2   : > { %6475 = vrcp.f32 %v1137_v58 }
 0x6a5   : > { %v1308_v63 = vpop.permute.xlu1 %1307 }
 0x6a9   : > { %v1386_v8 = vpop.permute.xlu1 %1385 }
 0x6ac   : > { %v6476_v59 = vpop.eup %6475 }
 0x6ad   : > { %v1139_v61 = vmul.f32 %v6476_v59, %v6474_v56  ;;  %v1384_v10 = vpop.permute.xlu1 %1383 }
 0x6af   : > { %5624 = vmatmul.mubr.msk.f32.vlgmr.msra.gmra.mrb[8].mxu1 %vm965_vm2, %v1139_v61 }
 0x6b0   : > { %5627 = vmatpush3.xpose.msk.msra.mxu1 %vm887_vm1, %v1220_v60  ;;  %5628 = vmatprep.mubr.msk.f32.mxu1 %vm6994_vm0, %v6992_v0 }
 0x6b1   : > { %5631 = vmatprep.subr.mxu1 %v6992_v0  ;;  %v1550_v11 = vpop.permute.xlu1 %1549 }
 0x6b3   : > { %5629 = vmatmul.mubr.msk.f32.vlgmr.msra.gmra.mrb[10].mxu1 %vm887_vm1, %v1218_v62 }
 0x6b4   : > { %5632 = vmatpush3.msra.mxu1 %v1308_v63  ;;  %5633 = vmatprep.mubr.msk.f32.mxu1 %vm6994_vm0, %v6992_v0 }
 0x6b5   : > { %5636 = vmatprep.subr.mxu1 %v6992_v0  ;;  %v1718_v16 = vpop.permute.xlu1 %1717 }
 0x6b9   : > { %v1716_v19 = vpop.permute.xlu1 %1715 }
 0x782   : > { %v7597_v2 = vpop.f32.mrb[8].mxu1 }
 0x783   : > { %v5625_v3 = vpop.f32.mrb[9].mxu1 }
 0x786   : > { %v1291_v4 = vpop.f32.mrb[10].mxu1 }
 0x787   : > { %v1295_v5 = vmul.f32 0.25, %v1291_v4  ;;  %v5630_v6 = vpop.f32.mrb[11].mxu1 }
 0x789   : > { %v1296_v7 = vsel %vm965_vm2, %v1295_v5, -inf }
 0x78a   : > { %1297 = vmax.xlane.f32.xlu0 %v1296_v7 }
 0x7a0   : > { %1551 = vrot.lane.b32.xlu0 %v7532_v25, %s6998_s10 }
 0x7a4   : > { %2047 = vrot.lane.b32.xlu0 %v7538_v26, %s7000_s17 }
 0x817   : > { %v1298_v12 = vpop.xlane.xlu0 %1297 }
 0x818   : > { %v1299_v13 = vsub.f32 %v1295_v5, %v1298_v12 }
 0x81a   : > { %v1300_v14 = vmul.f32 1.442695, %v1299_v13 }
 0x81b   : > { %v1552_v15 = vpop.permute.xlu0 %1551 }
 0x81c   : > { %6477 = vpow2.f32 %v1300_v14  ;;  %5647 = vmatpush3.xpose.msk.msra.mxu0 %vm887_vm1, %v1552_v15 }
 0x81d   : > { %5656 = vmatprep.subr.mxu0 %v6992_v0 }
 0x81f   : > { %5649 = vmatmul.mubr.msk.f32.vlgmr.msra.gmra.mrb[2].mxu0 %vm887_vm1, %v1550_v11 }
 0x820   : > { %5657 = vmatpush3.xpose.msk.msra.mxu0 %vm887_vm1, %v1718_v16  ;;  %5658 = vmatprep.mubr.msk.f32.mxu0 %vm6994_vm0, %v6992_v0 }
 0x821   : > { %5666 = vmatprep.subr.mxu0 %v6992_v0 }
 0x823   : > { %5659 = vmatmul.mubr.msk.f32.vlgmr.msra.gmra.mrb[4].mxu0 %vm887_vm1, %v1716_v19 }
 0x824   : > { %5668 = vmatprep.mubr.msk.f32.mxu0 %vm6994_vm0, %v6992_v0 }
 0x826   : > { %v6478_v21 = vpop.eup %6477 }
 0x827   : > { %v1302_v22 = vsel %vm965_vm2, %v6478_v21, 0.0 }
 0x828   : > { %1303 = vadd.xlane.f32.xlu1 %v1302_v22 }
 0x839   : > { %1883 = vrot.lane.b32.xlu1 %v7532_v25, %s7001_s1 }
 0x83d   : > { %1881 = vrot.lane.b32.xlu1 %v7538_v26, %s7001_s1 }
 0x841   : > { %2049 = vrot.lane.b32.xlu1 %v7532_v25, %s7000_s17  ;;  %v2048_v25 = vpop.permute.xlu0 %2047 }
 0x8b5   : > { %v1304_v23 = vpop.xlane.xlu1 %1303 }
 0x8b6   : > { %6479 = vrcp.f32 %v1304_v23 }
 0x8b9   : > { %v1884_v24 = vpop.permute.xlu1 %1883 }
 0x8ba   : > { %5667 = vmatpush3.xpose.msk.msra.mxu0 %vm887_vm1, %v1884_v24 }
 0x8bb   : > { %5676 = vmatprep.subr.mxu0 %v6992_v0 }
 0x8bd   : > { %v1882_v28 = vpop.permute.xlu1 %1881 }
 0x8be   : > { %5669 = vmatmul.mubr.msk.f32.vlgmr.msra.gmra.mrb[6].mxu0 %vm887_vm1, %v1882_v28 }
 0x8bf   : > { %5678 = vmatprep.mubr.msk.f32.mxu0 %vm6994_vm0, %v6992_v0 }
 0x8c0   : > { %v6480_v29 = vpop.eup %6479 }
 0x8c1   : > { %v1306_v31 = vmul.f32 %v6480_v29, %v6478_v21  ;;  %v2050_v32 = vpop.permute.xlu1 %2049 }
 0x8c2   : > { %5677 = vmatpush3.xpose.msk.msra.mxu0 %vm887_vm1, %v2050_v32 }
 0x8c3   : > { %5634 = vmatmul.mubr.msk.f32.vlgmr.msra.gmra.mrb[12].mxu1 %vm965_vm2, %v1306_v31  ;;  %5927 = vmatprep.subr.bf16.mxu0 %v6993_v1 }
 0x8c4   : > { %5637 = vmatpush3.xpose.msk.msra.mxu1 %vm887_vm1, %v1386_v8  ;;  %5638 = vmatprep.mubr.msk.f32.mxu1 %vm6994_vm0, %v6992_v0 }
 0x8c5   : > { %5679 = vmatmul.mubr.msk.f32.vlgmr.msra.gmra.mrb[8].mxu0 %vm887_vm1, %v2048_v25  ;;  %5641 = vmatprep.subr.mxu1 %v6992_v0 }
 0x8c6   : > { %5718 = vmatprep.mubr.msk.f32.mxu0 %vm6994_vm0, %v6992_v0 }
 0x8c7   : > { %5639 = vmatmul.mubr.msk.f32.vlgmr.msra.gmra.mrb[14].mxu1 %vm887_vm1, %v1384_v10 }
 0x8c8   : > { %5643 = vmatprep.mubr.msk.f32.mxu1 %vm6994_vm0, %v6992_v0 }
 0x8f2   : > { %v1623_v26 = vpop.f32.mrb[2].mxu0 }
 0x8f3   : > { %v1627_v33 = vmul.f32 0.25, %v1623_v26  ;;  %v5650_v34 = vpop.f32.mrb[3].mxu0 }
 0x8f5   : > { %v1628_v35 = vsel %vm965_vm2, %v1627_v33, -inf }
 0x8f6   : > { %1629 = vmax.xlane.f32.xlu0 %v1628_v35  ;;  %v1789_v36 = vpop.f32.mrb[4].mxu0 }
 0x8f7   : > { %v1793_v37 = vmul.f32 0.25, %v1789_v36  ;;  %v5660_v38 = vpop.f32.mrb[5].mxu0 }
 0x8f9   : > { %v1794_v39 = vsel %vm965_vm2, %v1793_v37, -inf }
 0x8fa   : > { %1795 = vmax.xlane.f32.xlu0 %v1794_v39 }
 0x983   : > { %v1630_v40 = vpop.xlane.xlu0 %1629 }
 0x984   : > { %v1631_v41 = vsub.f32 %v1627_v33, %v1630_v40 }
 0x986   : > { %v1632_v43 = vmul.f32 1.442695, %v1631_v41 }
 0x987   : > { %v1796_v42 = vpop.xlane.xlu0 %1795 }
 0x988   : > { %v1797_v44 = vsub.f32 %v1793_v37, %v1796_v42  ;;  %6481 = vpow2.f32 %v1632_v43  ;;  %v2254_v43 = vld [vmem:[#allocation7] sm:$0xff] }
 0x98a   : > { %v1798_v48 = vmul.f32 1.442695, %v1797_v44  ;;  %v2255_v44 = vld [vmem:[#allocation7 + $0x8] sm:$0xff] }
 0x98c   : > { %6483 = vpow2.f32 %v1798_v48  ;;  %v2257_v48 = vld [vmem:[#allocation7 + $0x18] sm:$0xff] }
 0x991   : > { %v1955_v45 = vpop.f32.mrb[6].mxu0 }
 0x992   : > { %v5670_v47 = vpop.f32.mrb[7].mxu0  ;;  %v6482_v58 = vpop.eup %6481  ;;  %v1959_v59 = vmul.f32 0.25, %v1955_v45  ;;  %v2256_v45 = vld [vmem:[#allocation7 + $0x10] sm:$0xff] }
 0x993   : > { %v1634_v61 = vsel %vm965_vm2, %v6482_v58, 0.0  ;;  %v5928_v47 = vpack.c.bf16 %v2255_v44, %v2254_v43  ;;  %v2383_v43 = vld [vmem:[#allocation13 + $0x38] sm:$0xff]  ;;  %v2376_v44 = vld [vmem:[#allocation13] sm:$0xff] }
 0x994   : > { %v1960_v62 = vsel %vm965_vm2, %v1959_v59, -inf }
 0x995   : > { %5929 = vmatpush3.bf16.msra.mxu0 %v5928_v47 }
 0x996   : > { %v1379_v49 = vpop.f32.mrb[12].mxu1  ;;  %v6484_v63 = vpop.eup %6483  ;;  %5930 = vmatprep.subr.bf16.mxu0 %v6993_v1 }
 0x997   : > { %v5635_v50 = vpop.f32.mrb[13].mxu1  ;;  %v1800_v3 = vsel %vm965_vm2, %v6484_v63, 0.0 }
 0x998   : > { %v2121_v51 = vpop.f32.mrb[8].mxu0  ;;  %v2258_v50 = vld [vmem:[#allocation7 + $0x20] sm:$0xff] }
 0x999   : > { %v2125_v52 = vmul.f32 0.25, %v2121_v51  ;;  %v5680_v53 = vpop.f32.mrb[9].mxu0  ;;  %v2259_v51 = vld [vmem:[#allocation7 + $0x28] sm:$0xff] }
 0x99a   : > { %v1457_v54 = vpop.f32.mrb[14].mxu1  ;;  %v2260_v53 = vld [vmem:[#allocation7 + $0x30] sm:$0xff] }
 0x99b   : > { %v1461_v55 = vmul.f32 0.25, %v1457_v54  ;;  %v5640_v56 = vpop.f32.mrb[15].mxu1  ;;  %v2126_v57 = vsel %vm965_vm2, %v2125_v52, -inf  ;;  %v2261_v54 = vld [vmem:[#allocation7 + $0x38] sm:$0xff] }
 0x99c   : > { %2127 = vmax.xlane.f32.xlu0 %v2126_v57  ;;  %v2262_v56 = vld [vmem:[#allocation7 + $0x40] sm:$0xff]  ;;  %v2263_v57 = vld [vmem:[#allocation7 + $0x48] sm:$0xff] }
 0x99d   : > { %v1462_v60 = vsel %vm965_vm2, %v1461_v55, -inf }
 0x99e   : > { %1463 = vmax.xlane.f32.xlu1 %v1462_v60  ;;  %v2265_v60 = vld [vmem:[#allocation7 + $0x58] sm:$0xff] }
 0x9a0   : > { %1635 = vadd.xlane.f32.xlu0 %v1634_v61 }
 0x9a2   : > { %1961 = vmax.xlane.f32.xlu1 %v1960_v62  ;;  %v2266_v62 = vld [vmem:[#allocation7 + $0x60] sm:$0xff] }
 0x9a6   : > { %1801 = vadd.xlane.f32.xlu1 %v1800_v3 }
 0xa29   : > { %v2128_v4 = vpop.xlane.xlu0 %2127 }
 0xa2a   : > { %v2129_v5 = vsub.f32 %v2125_v52, %v2128_v4  ;;  %v5934_v52 = vpack.c.bf16 %v2259_v51, %v2258_v50  ;;  %v2382_v50 = vld [vmem:[#allocation13 + $0x30] sm:$0xff]  ;;  %v2385_v51 = vld [vmem:[#allocation13 + $0x48] sm:$0xff] }
 0xa2b   : > { %v1464_v6 = vpop.xlane.xlu1 %1463 }
 0xa2c   : > { %v2130_v7 = vmul.f32 1.442695, %v2129_v5  ;;  %v1465_v16 = vsub.f32 %v1461_v55, %v1464_v6  ;;  %v5937_v55 = vpack.c.bf16 %v2261_v54, %v2260_v53  ;;  %v2268_v5 = vld [vmem:[#allocation7 + $0x70] sm:$0xff]  ;;  %v2269_v6 = vld [vmem:[#allocation7 + $0x78] sm:$0xff] }
 0xa2d   : > { %v1636_v23 = vpop.xlane.xlu0 %1635  ;;  %v2389_v53 = vld [vmem:[#allocation13 + $0x68] sm:$0xff]  ;;  %v2387_v54 = vld [vmem:[#allocation13 + $0x58] sm:$0xff] }
 0xa2e   : > { %6485 = vpow2.f32 %v2130_v7  ;;  %v1466_v19 = vmul.f32 1.442695, %v1465_v16 }
 0xa2f   : > { %v1962_v8 = vpop.xlane.xlu1 %1961 }
 0xa30   : > { %v1963_v10 = vsub.f32 %v1959_v59, %v1962_v8  ;;  %v2264_v59 = vld [vmem:[#allocation7 + $0x50] sm:$0xff]  ;;  %v5949_v8 = vpack.c.bf16 %v2269_v6, %v2268_v5  ;;  %v2395_v5 = vld [vmem:[#allocation13 + $0x98] sm:$0xff] }
 0xa31   : > { %v5943_v61 = vpack.c.bf16 %v2265_v60, %v2264_v59  ;;  %v2386_v59 = vld [vmem:[#allocation13 + $0x50] sm:$0xff]  ;;  %v2399_v6 = vld [vmem:[#allocation13 + $0xb8] sm:$0xff] }
 0xa32   : > { %v1964_v11 = vmul.f32 1.442695, %v1963_v10 }
 0xa34   : > { %6487 = vpow2.f32 %v1964_v11 }
 0xa35   : > { %6489 = vpow2.f32 %v1466_v19 }
 0xa38   : > { %v6486_v12 = vpop.eup %6485 }
 0xa39   : > { %v2132_v13 = vsel %vm965_vm2, %v6486_v12, 0.0 }
 0xa3a   : > { %2133 = vadd.xlane.f32.xlu1 %v2132_v13 }
 0xa3e   : > { %v6488_v14 = vpop.eup %6487 }
 0xa3f   : > { %v1966_v15 = vsel %vm965_vm2, %v6488_v14, 0.0  ;;  %v6490_v21 = vpop.eup %6489 }
 0xa40   : > { %1967 = vadd.xlane.f32.xlu0 %v1966_v15  ;;  %v1468_v22 = vsel %vm965_vm2, %v6490_v21, 0.0 }
 0xa4b   : > { %1639 = vrot.lane.b32.xlu1 %v7551_v30, %s6998_s10 }
 0xa56   : > { %1473 = vrot.lane.b32.xlu0 %v7551_v30, %s6997_s27 }
 0xa5a   : > { %1971 = vrot.lane.b32.xlu0 %v7551_v30, %s7001_s1 }
 0xa5e   : > { %2214 = vrot.lane.b32.xlu0 %v7597_v2, %s7000_s17  ;;  %v1802_v2 = vpop.xlane.xlu1 %1801 }
 0xa6f   : > { %1469 = vadd.xlane.f32.xlu1 %v1468_v22 }
 0xa80   : > { %1805 = vrot.lane.b32.xlu1 %v7551_v30, %s6999_s25 }
 0xa84   : > { %2137 = vrot.lane.b32.xlu1 %v7551_v30, %s7000_s17 }
 0xa88   : > { %2218 = vrot.lane.b32.xlu1 %v1379_v49, %s7001_s1  ;;  %v5931_v49 = vpack.c.bf16 %v2257_v48, %v2256_v45  ;;  %v2380_v45 = vld [vmem:[#allocation13 + $0x20] sm:$0xff] }
 0xa89   : > { %v5953_v48 = vpack.c.bf16 %v2380_v45, %v2376_v44  ;;  %v2417_v44 = vld [vmem:[#allocation13 + $0x148] sm:$0xff] }
 0xa8a   : > { %5932 = vmatpush3.bf16.msra.mxu0 %v5931_v49  ;;  %v2378_v49 = vld [vmem:[#allocation13 + $0x10] sm:$0xff] }
 0xa8b   : > { %5933 = vmatprep.subr.bf16.mxu0 %v6993_v1 }
 0xa8e   : > { %5935 = vmatpush3.bf16.msra.mxu0 %v5934_v52  ;;  %v5985_v52 = vpack.c.bf16 %v2382_v50, %v2378_v49  ;;  %v2423_v49 = vld [vmem:[#allocation13 + $0x178] sm:$0xff] }
 0xa8f   : > { %5936 = vmatprep.subr.bf16.mxu0 %v6993_v1 }
 0xa92   : > { %5938 = vmatpush3.bf16.msra.mxu0 %v5937_v55  ;;  %v2391_v55 = vld [vmem:[#allocation13 + $0x78] sm:$0xff] }
 0xa93   : > { %5939 = vmatprep.subr.bf16.mxu0 %v6993_v1 }
 0xac7   : > { %v2134_v29 = vpop.xlane.xlu1 %2133 }
 0xacb   : > { %v1640_v31 = vpop.permute.xlu1 %1639 }
 0xacd   : > { %v1968_v24 = vpop.xlane.xlu0 %1967 }
 0xad1   : > { %v1474_v28 = vpop.permute.xlu0 %1473 }
 0xad2   : > { %5642 = vmatpush3.msra.mxu1 %v1474_v28 }
 0xad3   : > { %5651 = vmatprep.subr.mxu1 %v6992_v0 }
 0xad5   : > { %v1972_v38 = vpop.permute.xlu0 %1971 }
 0xafc   : > { %v1470_v32 = vpop.xlane.xlu1 %1469 }
 0xafd   : > { %6491 = vrcp.f32 %v1470_v32 }
 0xafe   : > { %6493 = vrcp.f32 %v1636_v23 }
 0xaff   : > { %6495 = vrcp.f32 %v1802_v2 }
 0xb00   : > { %6497 = vrcp.f32 %v1968_v24  ;;  %v1806_v35 = vpop.permute.xlu1 %1805 }
 0xb01   : > { %6499 = vrcp.f32 %v2134_v29 }
 0xb04   : > { %v2138_v41 = vpop.permute.xlu1 %2137 }
 0xb07   : > { %v6492_v25 = vpop.eup %6491 }
 0xb08   : > { %v1472_v26 = vmul.f32 %v6492_v25, %v6490_v21  ;;  %v6494_v33 = vpop.eup %6493  ;;  %v2215_v21 = vpop.permute.xlu0 %2214 }
 0xb09   : > { %v1638_v30 = vmul.f32 %v6494_v33, %v6482_v58  ;;  %v6496_v34 = vpop.eup %6495  ;;  %v5940_v58 = vpack.c.bf16 %v2263_v57, %v2262_v56  ;;  %v2219_v22 = vpop.permute.xlu1 %2218  ;;  %v2241_v28 = vsel %vm887_vm1, %v7565_v46, %v2215_v21  ;;  %v5261_v46 = vld [vmem:[#allocation9] ss:$0 sm:$0xff]  ;;  %v5987_v56 = vpack.c.bf16 %v2391_v55, %v2387_v54  ;;  %v2384_v57 = vld [vmem:[#allocation13 + $0x40] sm:$0xff]  ;;  %v2418_v54 = vld [vmem:[#allocation13 + $0x150] sm:$0xff] }
 0xb0a   : > { %5644 = vmatmul.mubr.msk.f32.vlgmr.msra.gmra.mrb[16].mxu1 %vm965_vm2, %v1472_v26  ;;  %v1804_v36 = vmul.f32 %v6496_v34, %v6484_v63  ;;  %v6498_v37 = vpop.eup %6497  ;;  %v2267_v63 = vld [vmem:[#allocation7 + $0x68] sm:$0xff]  ;;  %v2243_v2 = vsel %vm2242_vm3, %v2241_v28, %v2219_v22 }
 0xb0b   : > { %5652 = vmatpush3.msra.mxu1 %v1640_v31  ;;  %5653 = vmatprep.mubr.msk.f32.mxu1 %vm6994_vm0, %v6992_v0  ;;  %v1970_v39 = vmul.f32 %v6498_v37, %v6488_v14  ;;  %v6500_v40 = vpop.eup %6499  ;;  %v5946_v3 = vpack.c.bf16 %v2267_v63, %v2266_v62  ;;  %v2393_v62 = vld [vmem:[#allocation13 + $0x88] sm:$0xff] }
 0xb0c   : > { %5661 = vmatprep.subr.mxu1 %v6992_v0  ;;  %v2136_v42 = vmul.f32 %v6500_v40, %v6486_v12  ;;  %5941 = vmatpush3.bf16.msra.mxu0 %v5940_v58  ;;  %v2381_v40 = vld [vmem:[#allocation13 + $0x28] sm:$0xff]  ;;  %v2388_v58 = vld [vmem:[#allocation13 + $0x60] sm:$0xff] }
 0xb0d   : > { %5942 = vmatprep.subr.bf16.mxu0 %v6993_v1  ;;  %v5957_v60 = vpack.c.bf16 %v2388_v58, %v2384_v57  ;;  %v2397_v63 = vld [vmem:[#allocation13 + $0xa8] sm:$0xff] }
 0xb0e   : > { %5654 = vmatmul.mubr.msk.f32.vlgmr.msra.gmra.mrb[18].mxu1 %vm965_vm2, %v1638_v30  ;;  %v2401_v22 = vld [vmem:[#allocation13 + $0xc8] sm:$0xff] }
 0xb0f   : > { %5662 = vmatpush3.msra.mxu1 %v1806_v35  ;;  %5663 = vmatprep.mubr.msk.f32.mxu1 %vm6994_vm0, %v6992_v0  ;;  %v2429_v57 = vld [vmem:[#allocation13 + $0x1a8] sm:$0xff] }
 0xb10   : > { %5671 = vmatprep.subr.mxu1 %v6992_v0  ;;  %5944 = vmatpush3.bf16.msra.mxu0 %v5943_v61  ;;  %v2390_v61 = vld [vmem:[#allocation13 + $0x70] sm:$0xff] }
 0xb11   : > { %5945 = vmatprep.subr.bf16.mxu0 %v6993_v1 }
 0xb12   : > { %5664 = vmatmul.mubr.msk.f32.vlgmr.msra.gmra.mrb[20].mxu1 %vm965_vm2, %v1804_v36 }
 0xb13   : > { %5672 = vmatpush3.msra.mxu1 %v1972_v38  ;;  %5673 = vmatprep.mubr.msk.f32.mxu1 %vm6994_vm0, %v6992_v0 }
 0xb14   : > { %5681 = vmatprep.subr.mxu1 %v6992_v0  ;;  %5947 = vmatpush3.bf16.msra.mxu0 %v5946_v3  ;;  %v5989_v3 = vpack.c.bf16 %v2390_v61, %v2386_v59  ;;  %v2431_v61 = vld [vmem:[#allocation13 + $0x1b8] sm:$0xff] }
 0xb15   : > { %5948 = vmatprep.subr.bf16.mxu0 %v6993_v1 }
 0xb16   : > { %5674 = vmatmul.mubr.msk.f32.vlgmr.msra.gmra.mrb[22].mxu1 %vm965_vm2, %v1970_v39  ;;  %v2377_v39 = vld [vmem:[#allocation13 + $0x8] sm:$0xff] }
 0xb17   : > { %5682 = vmatpush3.msra.mxu1 %v2138_v41  ;;  %5683 = vmatprep.mubr.msk.f32.mxu1 %vm6994_vm0, %v6992_v0  ;;  %v2379_v41 = vld [vmem:[#allocation13 + $0x18] sm:$0xff] }
 0xb18   : > { %5950 = vmatpush3.bf16.msra.mxu0 %v5949_v8  ;;  %v5983_v47 = vpack.c.bf16 %v2383_v43, %v2379_v41  ;;  %v5991_v8 = vpack.c.bf16 %v2399_v6, %v2395_v5  ;;  %v2414_v43 = vld [vmem:[#allocation13 + $0x130] sm:$0xff] }
 0xb19   : > { %v2430_v5 = vld [vmem:[#allocation13 + $0x1b0] sm:$0xff] }
 0xb1a   : > { %5684 = vmatmul.mubr.msk.f32.vlgmr.msra.gmra.mrb[24].mxu1 %vm965_vm2, %v2136_v42  ;;  %v5951_v42 = vpack.c.bf16 %v2381_v40, %v2377_v39  ;;  %5984 = vmatprep.subr.bf16.mxu0 %v5983_v47  ;;  %v2412_v39 = vld [vmem:[#allocation13 + $0x120] sm:$0xff]  ;;  %v2421_v47 = vld [vmem:[#allocation13 + $0x168] sm:$0xff] }
 0xb1b   : > { %2526 = vmatprep.mubr.f32.mxu1 %v6992_v0  ;;  %v5971_v50 = vpack.c.bf16 %v2421_v47, %v2417_v44  ;;  %v2659_v44 = vld [vmem:[#allocation16 + $0x198] sm:$0xff] }
 0xb1c   : > { %5952 = vmatprep.subr.bf16.mxu1 %v5951_v42  ;;  %v2410_v42 = vld [vmem:[#allocation13 + $0x110] sm:$0xff] }
 0xb1d   : > { %5954 = vmatpush1.bf16.msra.mxu1 %v5953_v48  ;;  %v6001_v45 = vpack.c.bf16 %v2414_v43, %v2410_v42  ;;  %v2419_v48 = vld [vmem:[#allocation13 + $0x158] sm:$0xff]  ;;  %v2627_v42 = vld [vmem:[#allocation16 + $0x98] sm:$0xff] }
 0xb1e   : > { %v2658_v43 = vld [vmem:[#allocation16 + $0x190] sm:$0xff] }
 0xbdd   : > { %v1545_v4 = vpop.f32.mrb[16].mxu1 }
 0xbde   : > { %2222 = vrot.lane.b32.xlu0 %v1545_v4, %s6999_s25  ;;  %v5645_v7 = vpop.f32.mrb[17].mxu1  ;;  %v5959_v4 = vpack.c.bf16 %v2397_v63, %v2393_v62  ;;  %v2424_v62 = vld [vmem:[#allocation13 + $0x180] sm:$0xff] }
 0xbdf   : > { %v2392_v7 = vld [vmem:[#allocation13 + $0x80] sm:$0xff] }
 0xbe1   : > { %v1711_v10 = vpop.f32.mrb[18].mxu1 }
 0xbe2   : > { %2226 = vrot.lane.b32.xlu1 %v1711_v10, %s6998_s10  ;;  %v5655_v11 = vpop.f32.mrb[19].mxu1  ;;  %v2396_v10 = vld [vmem:[#allocation13 + $0xa0] sm:$0xff] }
 0xbe3   : > { %v2394_v11 = vld [vmem:[#allocation13 + $0x90] sm:$0xff] }
 0xbe5   : > { %v1877_v12 = vpop.f32.mrb[20].mxu1 }
 0xbe6   : > { %2230 = vrot.lane.b32.xlu0 %v1877_v12, %s6997_s27  ;;  %v5665_v13 = vpop.f32.mrb[21].mxu1  ;;  %v2398_v12 = vld [vmem:[#allocation13 + $0xb0] sm:$0xff] }
 0xbe7   : > { %v5961_v13 = vpack.c.bf16 %v2396_v10, %v2392_v7  ;;  %v2433_v7 = vld [vmem:[#allocation13 + $0x1c8] sm:$0xff]  ;;  %v2435_v10 = vld [vmem:[#allocation13 + $0x1d8] sm:$0xff] }
 0xbe9   : > { %v2043_v14 = vpop.f32.mrb[22].mxu1 }
 0xbea   : > { %2234 = vrot.lane.b32.xlu1 %v2043_v14, %s6996_s8  ;;  %v5675_v15 = vpop.f32.mrb[23].mxu1  ;;  %v5993_v14 = vpack.c.bf16 %v2398_v12, %v2394_v11 }
 0xbed   : > { %v2209_v16 = vpop.f32.mrb[24].mxu1 }
 0xbee   : > { %2238 = vrot.lane.b32.xlu0 %v2209_v16, %s6995_s6  ;;  %v5685_v19 = vpop.f32.mrb[25].mxu1 }
 0xc50   : > { %v2223_v23 = vpop.permute.xlu0 %2222 }
 0xc51   : > { %v2245_v31 = vsel %vm2244_vm4, %v2243_v2, %v2223_v23  ;;  %v2405_v23 = vld [vmem:[#allocation13 + $0xe8] sm:$0xff]  ;;  %v2407_v2 = vld [vmem:[#allocation13 + $0xf8] sm:$0xff] }
 0xc52   : > { %v5963_v28 = vpack.c.bf16 %v2405_v23, %v2401_v22  ;;  %v2438_v22 = vld [vmem:[#allocation13 + $0x1f0] sm:$0xff] }
 0xc54   : > { %v2227_v24 = vpop.permute.xlu1 %2226 }
 0xc55   : > { %v2247_v25 = vsel %vm2246_vm5, %v2245_v31, %v2227_v24  ;;  %v2403_v24 = vld [vmem:[#allocation13 + $0xd8] sm:$0xff]  ;;  %v2404_v31 = vld [vmem:[#allocation13 + $0xe0] sm:$0xff] }
 0xc58   : > { %v2231_v29 = vpop.permute.xlu0 %2230 }
 0xc59   : > { %v2249_v26 = vsel %vm2248_vm6, %v2247_v25, %v2231_v29  ;;  %v2400_v29 = vld [vmem:[#allocation13 + $0xc0] sm:$0xff] }
 0xc5a   : > { %v5965_v25 = vpack.c.bf16 %v2404_v31, %v2400_v29  ;;  %v2656_v29 = vld [vmem:[#allocation16 + $0x180] sm:$0xff] }
 0xc5c   : > { %v2235_v32 = vpop.permute.xlu1 %2234 }
 0xc5d   : > { %v2251_v33 = vsel %vm2250_vm7, %v2249_v26, %v2235_v32  ;;  %v5995_v32 = vpack.c.bf16 %v2407_v2, %v2403_v24  ;;  %v2402_v26 = vld [vmem:[#allocation13 + $0xd0] sm:$0xff] }
 0xc5e   : > { %v2625_v2 = vld [vmem:[#allocation16 + $0x88] sm:$0xff] }
 0xc60   : > { %v2239_v30 = vpop.permute.xlu0 %2238 }
 0xc61   : > { %v2253_v34 = vsel %vm2252_vm8, %v2251_v33, %v2239_v30  ;;  %v2406_v33 = vld [vmem:[#allocation13 + $0xf0] sm:$0xff] }
 0xc62   : > { %5719 = vmatmul.mubr.f32.vlgmr.msra.gmra.mrb[10].mxu0 %v2253_v34  ;;  %v5997_v30 = vpack.c.bf16 %v2406_v33, %v2402_v26  ;;  %v2409_v34 = vld [vmem:[#allocation13 + $0x108] sm:$0xff] }
 0xc63   : > { %2597 = vmatprep.mubr.f32.mxu0 %v6992_v0  ;;  %5986 = vmatpush1.bf16.msra.mxu0 %v5985_v52  ;;  %v2416_v52 = vld [vmem:[#allocation13 + $0x140] sm:$0xff] }
 0xc64   : > { %5988 = vmatprep.subr.bf16.mxu0 %v5987_v56  ;;  %v2425_v56 = vld [vmem:[#allocation13 + $0x188] sm:$0xff] }
 0xc65   : > { %v5975_v59 = vpack.c.bf16 %v2429_v57, %v2425_v56  ;;  %v2629_v56 = vld [vmem:[#allocation16 + $0xa8] sm:$0xff] }
 0xc66   : > { %v2661_v57 = vld [vmem:[#allocation16 + $0x1a8] sm:$0xff] }
 0xc67   : > { %5990 = vmatpush1.bf16.msra.mxu0 %v5989_v3  ;;  %v2428_v3 = vld [vmem:[#allocation13 + $0x1a0] sm:$0xff] }
 0xc68   : > { %5992 = vmatprep.subr.bf16.mxu0 %v5991_v8  ;;  %v5977_v6 = vpack.c.bf16 %v2428_v3, %v2424_v62  ;;  %v2437_v8 = vld [vmem:[#allocation13 + $0x1e8] sm:$0xff] }
 0xc69   : > { %v5979_v12 = vpack.c.bf16 %v2437_v8, %v2433_v7  ;;  %v2644_v3 = vld [vmem:[#allocation16 + $0x120] sm:$0xff]  ;;  %v2662_v7 = vld [vmem:[#allocation16 + $0x1b0] sm:$0xff]  ;;  %v2663_v8 = vld [vmem:[#allocation16 + $0x1b8] sm:$0xff] }
 0xc6b   : > { %5994 = vmatpush1.bf16.msra.mxu0 %v5993_v14  ;;  %v2432_v14 = vld [vmem:[#allocation13 + $0x1c0] sm:$0xff] }
 0xc6c   : > { %5996 = vmatprep.subr.bf16.mxu0 %v5995_v32  ;;  %v2657_v32 = vld [vmem:[#allocation16 + $0x188] sm:$0xff] }
 0xc6f   : > { %5998 = vmatpush1.bf16.msra.mxu0 %v5997_v30 }
 0xd35   : > { %v2343_v35 = vpop.f32.mrb[10].mxu0 }
 0xd36   : > { %v2344_v36 = vadd.f32 %v5261_v46, %v2343_v35  ;;  %v5720_v37 = vpop.f32.mrb[11].mxu0  ;;  %v2413_v46 = vld [vmem:[#allocation13 + $0x128] sm:$0xff]  ;;  %v2411_v35 = vld [vmem:[#allocation13 + $0x118] sm:$0xff] }
 0xd37   : > { %v2415_v37 = vld [vmem:[#allocation13 + $0x138] sm:$0xff] }
 0xd38   : > { %v2347_v38 = vadd.f32 %v2344_v36, %v7507_v9  ;;  %v5955_v9 = vpack.c.bf16 %v2389_v53, %v2385_v51  ;;  %v5967_v36 = vpack.c.bf16 %v2413_v46, %v2409_v34  ;;  %v5999_v40 = vpack.c.bf16 %v2415_v37, %v2411_v35  ;;  %v2420_v53 = vld [vmem:[#allocation13 + $0x160] sm:$0xff]  ;;  %v5262_v34 = vld [vmem:[#allocation10] ss:$0 sm:$0xff]  ;;  %v5263_v35 = vld [vmem:[#allocation12] ss:$0 sm:$0xff] }
 0xd39   : > { %v6003_v51 = vpack.c.bf16 %v2423_v49, %v2419_v48  ;;  %v5973_v55 = vpack.c.bf16 %v2420_v53, %v2416_v52  ;;  %v2609_v37 = vld [vmem:[#allocation16 + $0x8] sm:$0xff]  ;;  %v2610_v49 = vld [vmem:[#allocation16 + $0x10] sm:$0xff]  ;;  %v6051_v53 = vpack.c.bf16 %v2659_v44, %v2658_v43  ;;  %v2651_v44 = vld [vmem:[#allocation16 + $0x158] sm:$0xff] }
 0xd3a   : > { %2350 = vadd.xlane.f32.xlu1 %v2347_v38  ;;  %5956 = vmatprep.subr.bf16.mxu1 %v5955_v9  ;;  %v2422_v9 = vld [vmem:[#allocation13 + $0x170] sm:$0xff]  ;;  %v2650_v43 = vld [vmem:[#allocation16 + $0x150] sm:$0xff] }
 0xd3b   : > { %5958 = vmatpush1.bf16.msra.mxu1 %v5957_v60  ;;  %6000 = vmatprep.subr.bf16.mxu0 %v5999_v40  ;;  %v6005_v58 = vpack.c.bf16 %v2422_v9, %v2418_v54  ;;  %v2427_v60 = vld [vmem:[#allocation13 + $0x198] sm:$0xff]  ;;  %v2641_v40 = vld [vmem:[#allocation16 + $0x108] sm:$0xff]  ;;  %v2628_v9 = vld [vmem:[#allocation16 + $0xa0] sm:$0xff] }
 0xd3c   : > { %5960 = vmatprep.subr.bf16.mxu1 %v5959_v4  ;;  %6002 = vmatpush1.bf16.msra.mxu0 %v6001_v45  ;;  %v6007_v63 = vpack.c.bf16 %v2431_v61, %v2427_v60  ;;  %v2426_v4 = vld [vmem:[#allocation13 + $0x190] sm:$0xff]  ;;  %v2642_v54 = vld [vmem:[#allocation16 + $0x110] sm:$0xff]  ;;  %v2612_v60 = vld [vmem:[#allocation16 + $0x20] sm:$0xff]  ;;  %v6023_v62 = vpack.c.bf16 %v2629_v56, %v2628_v9 }
 0xd3d   : > { %6004 = vmatprep.subr.bf16.mxu0 %v6003_v51  ;;  %v6009_v11 = vpack.c.bf16 %v2430_v5, %v2426_v4  ;;  %v2613_v61 = vld [vmem:[#allocation16 + $0x28] sm:$0xff]  ;;  %v2630_v5 = vld [vmem:[#allocation16 + $0xb0] sm:$0xff]  ;;  %v2652_v56 = vld [vmem:[#allocation16 + $0x160] sm:$0xff] }
 0xd3e   : > { %v2645_v4 = vld [vmem:[#allocation16 + $0x128] sm:$0xff] }
 0xd3f   : > { %5962 = vmatpush1.bf16.msra.mxu1 %v5961_v13  ;;  %v2439_v13 = vld [vmem:[#allocation13 + $0x1f8] sm:$0xff]  ;;  %v2621_v9 = vld [vmem:[#allocation16 + $0x68] sm:$0xff] }
 0xd40   : > { %5964 = vmatprep.subr.bf16.mxu1 %v5963_v28  ;;  %6006 = vmatpush1.bf16.msra.mxu0 %v6005_v58  ;;  %v2624_v28 = vld [vmem:[#allocation16 + $0x80] sm:$0xff] }
 0xd41   : > { %6008 = vmatprep.subr.bf16.mxu0 %v6007_v63  ;;  %v6015_v31 = vpack.c.bf16 %v2625_v2, %v2624_v28  ;;  %v2665_v28 = vld [vmem:[#allocation16 + $0x1c8] sm:$0xff] }
 0xd43   : > { %5966 = vmatpush1.bf16.msra.mxu1 %v5965_v25  ;;  %v6047_v25 = vpack.c.bf16 %v2657_v32, %v2656_v29  ;;  %v2617_v32 = vld [vmem:[#allocation16 + $0x48] sm:$0xff] }
 0xd44   : > { %5968 = vmatprep.subr.bf16.mxu1 %v5967_v36  ;;  %6010 = vmatpush1.bf16.msra.mxu0 %v6009_v11  ;;  %v2608_v36 = vld [vmem:[#allocation16] sm:$0xff]  ;;  %v6057_v11 = vpack.c.bf16 %v2645_v4, %v2644_v3  ;;  %v2622_v3 = vld [vmem:[#allocation16 + $0x70] sm:$0xff]  ;;  %v2623_v4 = vld [vmem:[#allocation16 + $0x78] sm:$0xff] }
 0xd45   : > { %v6017_v47 = vpack.c.bf16 %v2609_v37, %v2608_v36  ;;  %v2667_v36 = vld [vmem:[#allocation16 + $0x1d8] sm:$0xff] }
 0xdc7   : > { %v2351_v15 = vpop.xlane.xlu1 %2350 }
 0xdc8   : > { %v2353_v16 = vmul.f32 0.0078125, %v2351_v15  ;;  %v2436_v15 = vld [vmem:[#allocation13 + $0x1e0] sm:$0xff] }
 0xdc9   : > { %v5981_v23 = vpack.c.bf16 %v2436_v15, %v2432_v14  ;;  %v6059_v15 = vpack.c.bf16 %v2663_v8, %v2662_v7  ;;  %v2654_v7 = vld [vmem:[#allocation16 + $0x170] sm:$0xff]  ;;  %v2655_v8 = vld [vmem:[#allocation16 + $0x178] sm:$0xff] }
 0xdca   : > { %v7702_v19 = vsub.f32 %v2347_v38, %v2353_v16  ;;  %v2408_v38 = vld [vmem:[#allocation13 + $0x100] sm:$0xff]  ;;  %v6011_v16 = vpack.c.bf16 %v2439_v13, %v2435_v10  ;;  %v6025_v10 = vpack.c.bf16 %v2613_v61, %v2612_v60  ;;  %v2670_v61 = vld [vmem:[#allocation16 + $0x1f0] sm:$0xff] }
 0xdcb   : > { %v5969_v41 = vpack.c.bf16 %v2412_v39, %v2408_v38  ;;  %v2640_v39 = vld [vmem:[#allocation16 + $0x100] sm:$0xff]  ;;  %v2615_v13 = vld [vmem:[#allocation16 + $0x38] sm:$0xff] }
 0xdcc   : > { %v2355_v21 = vmul.f32 %v7702_v19, %v7702_v19  ;;  %6012 = vmatprep.subr.bf16.mxu0 %v6011_v16  ;;  %v6049_v48 = vpack.c.bf16 %v2641_v40, %v2640_v39  ;;  %v2646_v16 = vld [vmem:[#allocation16 + $0x130] sm:$0xff]  ;;  %v2619_v40 = vld [vmem:[#allocation16 + $0x58] sm:$0xff] }
 0xdcd   : > { %5970 = vmatpush1.bf16.msra.mxu1 %v5969_v41  ;;  %v2626_v41 = vld [vmem:[#allocation16 + $0x90] sm:$0xff]  ;;  %v2639_v60 = vld [vmem:[#allocation16 + $0xf8] sm:$0xff] }
 0xdce   : > { %2356 = vadd.xlane.f32.xlu0 %v2355_v21  ;;  %5972 = vmatprep.subr.bf16.mxu1 %v5971_v50  ;;  %v2434_v21 = vld [vmem:[#allocation13 + $0x1d0] sm:$0xff]  ;;  %v2611_v50 = vld [vmem:[#allocation16 + $0x18] sm:$0xff]  ;;  %v6019_v52 = vpack.c.bf16 %v2627_v42, %v2626_v41  ;;  %v2618_v39 = vld [vmem:[#allocation16 + $0x50] sm:$0xff] }
 0xdcf   : > { %v6013_v24 = vpack.c.bf16 %v2438_v22, %v2434_v21  ;;  %v6021_v58 = vpack.c.bf16 %v2611_v50, %v2610_v49  ;;  %v2647_v21 = vld [vmem:[#allocation16 + $0x138] sm:$0xff]  ;;  %v2632_v22 = vld [vmem:[#allocation16 + $0xc0] sm:$0xff]  ;;  %v2669_v49 = vld [vmem:[#allocation16 + $0x1e8] sm:$0xff]  ;;  %v6037_v50 = vpack.c.bf16 %v2619_v40, %v2618_v39 }
 0xdd0   : > { %v6061_v29 = vpack.c.bf16 %v2647_v21, %v2646_v16 }
 0xdd1   : > { %5974 = vmatpush1.bf16.msra.mxu1 %v5973_v55  ;;  %6014 = vmatpush1.bf16.msra.mxu0 %v6013_v24  ;;  %v2643_v55 = vld [vmem:[#allocation16 + $0x118] sm:$0xff]  ;;  %v2664_v24 = vld [vmem:[#allocation16 + $0x1c0] sm:$0xff] }
 0xdd2   : > { %5976 = vmatprep.subr.bf16.mxu1 %v5975_v59  ;;  %6048 = vmatprep.subr.bf16.mxu0 %v6047_v25  ;;  %v6053_v59 = vpack.c.bf16 %v2643_v55, %v2642_v54  ;;  %v2620_v55 = vld [vmem:[#allocation16 + $0x60] sm:$0xff] }
 0xdd5   : > { %5978 = vmatpush1.bf16.msra.mxu1 %v5977_v6  ;;  %v2631_v6 = vld [vmem:[#allocation16 + $0xb8] sm:$0xff] }
 0xdd6   : > { %5980 = vmatprep.subr.bf16.mxu1 %v5979_v12  ;;  %v2614_v12 = vld [vmem:[#allocation16 + $0x30] sm:$0xff]  ;;  %v6027_v14 = vpack.c.bf16 %v2631_v6, %v2630_v5  ;;  %v6045_v6 = vpack.c.bf16 %v2623_v4, %v2622_v3  ;;  %v2862_v3 = vld [vmem:[#allocation4 + $0x1f0] sm:$0xff] }
 0xdd7   : > { %v6029_v2 = vpack.c.bf16 %v2615_v13, %v2614_v12  ;;  %v2456_v12 = vsub.s32 3, %v7522_v17  ;;  %v2865_v4 = vld [vmem:[#allocation4 + $0x208] sm:$0xff]  ;;  %v5294_v17 = vld [vmem:[#allocation18 + $0x1] ss:$0 sm:$0xff] }
 0xdd9   : > { %5982 = vmatpush1.bf16.msra.mxu1 %v5981_v23  ;;  %v2633_v23 = vld [vmem:[#allocation16 + $0xc8] sm:$0xff] }
 0xdda   : > { %6016 = vmatprep.subr.bf16.mxu1 %v6015_v31  ;;  %v2616_v31 = vld [vmem:[#allocation16 + $0x40] sm:$0xff]  ;;  %v6031_v25 = vpack.c.bf16 %v2633_v23, %v2632_v22 }
 0xddb   : > { %v6033_v37 = vpack.c.bf16 %v2617_v32, %v2616_v31 }
 0xe5b   : > { %v2357_v26 = vpop.xlane.xlu0 %2356 }
 0xe5c   : > { %v2358_v33 = vmul.f32 0.0078125, %v2357_v26  ;;  %v6063_v26 = vpack.c.bf16 %v2665_v28, %v2664_v24 }
 0xe5e   : > { %v2359_v30 = vadd.f32 1e-05, %v2358_v33  ;;  %v2648_v33 = vld [vmem:[#allocation16 + $0x140] sm:$0xff] }
 0xe60   : > { %6501 = vrsqrt.f32 %v2359_v30  ;;  %v2649_v30 = vld [vmem:[#allocation16 + $0x148] sm:$0xff] }
 0xe6a   : > { %v6502_v46 = vpop.eup %6501 }
 0xe6b   : > { %v2361_v38 = vmul.f32 %v6502_v46, %v7702_v19  ;;  %v2660_v19 = vld [vmem:[#allocation16 + $0x1a0] sm:$0xff]  ;;  %v2635_v46 = vld [vmem:[#allocation16 + $0xd8] sm:$0xff] }
 0xe6c   : > { %v6055_v63 = vpack.c.bf16 %v2661_v57, %v2660_v19  ;;  %v6041_v19 = vpack.c.bf16 %v2621_v9, %v2620_v55  ;;  %v2653_v57 = vld [vmem:[#allocation16 + $0x168] sm:$0xff]  ;;  %v2854_v55 = vld [vmem:[#allocation4 + $0x1b0] sm:$0xff] }
 0xe6d   : > { %v2368_v45 = vmul.f32 %v5262_v34, %v2361_v38  ;;  %v2634_v34 = vld [vmem:[#allocation16 + $0xd0] sm:$0xff]  ;;  %v6065_v38 = vpack.c.bf16 %v2649_v30, %v2648_v33 }
 0xe6e   : > { %v6035_v41 = vpack.c.bf16 %v2635_v46, %v2634_v34  ;;  %v5264_v46 = vld [vmem:[#allocation18] ss:$0 sm:$0xff] }
 0xe6f   : > { %v7707_v51 = vadd.f32 %v5263_v35, %v2368_v45  ;;  %v2666_v35 = vld [vmem:[#allocation16 + $0x1d0] sm:$0xff]  ;;  %v2636_v45 = vld [vmem:[#allocation16 + $0xe0] sm:$0xff] }
 0xe70   : > { %v6067_v42 = vpack.c.bf16 %v2667_v36, %v2666_v35 }
 0xe71   : > { %2527 = vmatmul.mubr.f32.vlgmr.msra.gmra.mrb[26].mxu1 %v7707_v51  ;;  %2598 = vmatmul.mubr.f32.vlgmr.msra.gmra.mrb[12].mxu0 %v7707_v51 }
 0xe72   : > { %6018 = vmatpush3.bf16.msra.mxu1 %v6017_v47  ;;  %6050 = vmatpush3.bf16.msra.mxu0 %v6049_v48  ;;  %v2637_v47 = vld [vmem:[#allocation16 + $0xe8] sm:$0xff]  ;;  %v2668_v48 = vld [vmem:[#allocation16 + $0x1e0] sm:$0xff] }
 0xe73   : > { %6020 = vmatprep.subr.bf16.mxu1 %v6019_v52  ;;  %6052 = vmatprep.subr.bf16.mxu0 %v6051_v53  ;;  %v6069_v52 = vpack.c.bf16 %v2651_v44, %v2650_v43  ;;  %v6039_v53 = vpack.c.bf16 %v2637_v47, %v2636_v45  ;;  %v6071_v54 = vpack.c.bf16 %v2669_v49, %v2668_v48  ;;  %v2852_v43 = vld [vmem:[#allocation4 + $0x1a0] sm:$0xff]  ;;  %v2851_v47 = vld [vmem:[#allocation4 + $0x198] sm:$0xff]  ;;  %v2850_v48 = vld [vmem:[#allocation4 + $0x190] sm:$0xff] }
 0xe74   : > { %v2848_v44 = vld [vmem:[#allocation4 + $0x180] sm:$0xff]  ;;  %v2853_v49 = vld [vmem:[#allocation4 + $0x1a8] sm:$0xff] }
 0xe76   : > { %6022 = vmatpush3.bf16.msra.mxu1 %v6021_v58  ;;  %6054 = vmatpush3.bf16.msra.mxu0 %v6053_v59  ;;  %v6073_v58 = vpack.c.bf16 %v2653_v57, %v2652_v56  ;;  %v2638_v59 = vld [vmem:[#allocation16 + $0xf0] sm:$0xff]  ;;  %v2859_v57 = vld [vmem:[#allocation4 + $0x1d8] sm:$0xff] }
 0xe77   : > { %6024 = vmatprep.subr.bf16.mxu1 %v6023_v62  ;;  %6056 = vmatprep.subr.bf16.mxu0 %v6055_v63  ;;  %v6043_v62 = vpack.c.bf16 %v2639_v60, %v2638_v59  ;;  %v2671_v63 = vld [vmem:[#allocation16 + $0x1f8] sm:$0xff]  ;;  %v2864_v60 = vld [vmem:[#allocation4 + $0x200] sm:$0xff] }
 0xe78   : > { %v6075_v5 = vpack.c.bf16 %v2671_v63, %v2670_v61  ;;  %v2857_v56 = vld [vmem:[#allocation4 + $0x1c8] sm:$0xff]  ;;  %v2860_v61 = vld [vmem:[#allocation4 + $0x1e0] sm:$0xff]  ;;  %v2863_v63 = vld [vmem:[#allocation4 + $0x1f8] sm:$0xff] }
 0xe79   : > { %v2861_v59 = vld [vmem:[#allocation4 + $0x1e8] sm:$0xff] }
 0xe7a   : > { %6026 = vmatpush3.bf16.msra.mxu1 %v6025_v10  ;;  %6058 = vmatpush3.bf16.msra.mxu0 %v6057_v11  ;;  %v6077_v10 = vpack.c.bf16 %v2655_v8, %v2654_v7  ;;  %v2440_v11 = vld [vmem:[#allocation15] sm:$0xf] }
 0xe7b   : > { %6028 = vmatprep.subr.bf16.mxu1 %v6027_v14  ;;  %6060 = vmatprep.subr.bf16.mxu0 %v6059_v15  ;;  %v2445_v13 = vrot.slane %v2440_v11, %v7528_v20  ;;  %v2453_v14 = vrot.slane %v2440_v11, %v7548_v27  ;;  %v2449_v15 = vrot.slane %v2440_v11, %v7525_v18 }
 0xe7c   : > { %v2457_v16 = vrot.slane %v2440_v11, %v2456_v12 }
 0xe7e   : > { %6030 = vmatpush3.bf16.msra.mxu1 %v6029_v2  ;;  %6062 = vmatpush3.bf16.msra.mxu0 %v6061_v29 }
 0xe7f   : > { %6032 = vmatprep.subr.bf16.mxu1 %v6031_v25  ;;  %6064 = vmatprep.subr.bf16.mxu0 %v6063_v26 }
 0xe82   : > { %6034 = vmatpush3.bf16.msra.mxu1 %v6033_v37  ;;  %6066 = vmatpush3.bf16.msra.mxu0 %v6065_v38 }
 0xe83   : > { %6036 = vmatprep.subr.bf16.mxu1 %v6035_v41  ;;  %6068 = vmatprep.subr.bf16.mxu0 %v6067_v42  ;;  %v2849_v42 = vld [vmem:[#allocation4 + $0x188] sm:$0xff] }
 0xe84   : > { %v6079_v45 = vpack.c.bf16 %v2852_v43, %v2849_v42  ;;  %v2885_v42 = vld [vmem:[#allocation4 + $0x2a8] sm:$0xff]  ;;  %v2888_v43 = vld [vmem:[#allocation4 + $0x2c0] sm:$0xff] }
 0xe86   : > { %6038 = vmatpush3.bf16.msra.mxu1 %v6037_v50  ;;  %6070 = vmatpush3.bf16.msra.mxu0 %v6069_v52  ;;  %v6081_v50 = vpack.c.bf16 %v2851_v47, %v2848_v44  ;;  %v6112_v52 = vpack.c.bf16 %v2853_v49, %v2850_v48  ;;  %v2884_v47 = vld [vmem:[#allocation4 + $0x2a0] sm:$0xff]  ;;  %v2887_v48 = vld [vmem:[#allocation4 + $0x2b8] sm:$0xff]  ;;  %v2886_v49 = vld [vmem:[#allocation4 + $0x2b0] sm:$0xff] }
 0xe87   : > { %6040 = vmatprep.subr.bf16.mxu1 %v6039_v53  ;;  %6072 = vmatprep.subr.bf16.mxu0 %v6071_v54  ;;  %v2855_v53 = vld [vmem:[#allocation4 + $0x1b8] sm:$0xff]  ;;  %v2858_v54 = vld [vmem:[#allocation4 + $0x1d0] sm:$0xff] }
 0xe88   : > { %v6083_v9 = vpack.c.bf16 %v2858_v54, %v2855_v53  ;;  %v2894_v53 = vld [vmem:[#allocation4 + $0x2f0] sm:$0xff]  ;;  %v6105_v54 = vpack.c.bf16 %v2887_v48, %v2884_v47 }
 0xe8a   : > { %6042 = vmatpush3.bf16.msra.mxu1 %v6041_v19  ;;  %6074 = vmatpush3.bf16.msra.mxu0 %v6073_v58  ;;  %v2856_v19 = vld [vmem:[#allocation4 + $0x1c0] sm:$0xff] }
 0xe8b   : > { %6044 = vmatprep.subr.bf16.mxu1 %v6043_v62  ;;  %6076 = vmatprep.subr.bf16.mxu0 %v6075_v5  ;;  %v6115_v58 = vpack.c.bf16 %v2859_v57, %v2856_v19  ;;  %v6087_v62 = vpack.c.bf16 %v2864_v60, %v2861_v59  ;;  %v6089_v5 = vpack.c.bf16 %v2863_v63, %v2860_v61  ;;  %v2893_v19 = vld [vmem:[#allocation4 + $0x2e8] sm:$0xff]  ;;  %v2892_v57 = vld [vmem:[#allocation4 + $0x2e0] sm:$0xff] }
 0xe8e   : > { %6046 = vmatpush3.bf16.msra.mxu1 %v6045_v6  ;;  %6078 = vmatpush3.bf16.msra.mxu0 %v6077_v10  ;;  %v6118_v6 = vpack.c.bf16 %v2865_v4, %v2862_v3  ;;  %v5265_v3 = vld [vmem:[#allocation19] ss:$0 sm:$0xff] }
 0xe8f   : > { %6111 = vmatprep.subr.bf16.mxu0 %v6993_v1  ;;  %6080 = vmatprep.subr.bf16.mxu1 %v6079_v45  ;;  %v6103_v45 = vpack.c.bf16 %v2888_v43, %v2885_v42 }
 0xf44   : > { %v2528_v21 = vpop.f32.mrb[26].mxu1  ;;  %v2599_v22 = vpop.f32.mrb[12].mxu0 }
 0xf45   : > { %v2529_v23 = vadd.f32 %v2528_v21, %v2445_v13  ;;  %v2600_v24 = vadd.f32 %v2599_v22, %v2453_v14  ;;  %v2530_v28 = vpop.f32.mrb[27].mxu1  ;;  %v2601_v2 = vpop.f32.mrb[13].mxu0  ;;  %v2867_v13 = vld [vmem:[#allocation4 + $0x218] sm:$0xff]  ;;  %v2870_v14 = vld [vmem:[#allocation4 + $0x230] sm:$0xff]  ;;  %v2869_v21 = vld [vmem:[#allocation4 + $0x228] sm:$0xff] }
 0xf46   : > { %v2531_v29 = vadd.f32 %v2530_v28, %v2449_v15  ;;  %v2602_v31 = vadd.f32 %v2601_v2, %v2457_v16  ;;  %v6091_v15 = vpack.c.bf16 %v2870_v14, %v2867_v13  ;;  %v2866_v16 = vld [vmem:[#allocation4 + $0x210] sm:$0xff]  ;;  %v2868_v22 = vld [vmem:[#allocation4 + $0x220] sm:$0xff]  ;;  %v2873_v2 = vld [vmem:[#allocation4 + $0x248] sm:$0xff] }
 0xf47   : > { %v2604_v26 = vmax.f32 %v2529_v23, 0.0  ;;  %v2606_v33 = vmax.f32 %v2600_v24, 0.0  ;;  %v6093_v23 = vpack.c.bf16 %v2869_v21, %v2866_v16  ;;  %v2871_v24 = vld [vmem:[#allocation4 + $0x238] sm:$0xff] }
 0xf48   : > { %v2605_v32 = vmax.f32 %v2531_v29, 0.0  ;;  %v2607_v25 = vmax.f32 %v2602_v31, 0.0  ;;  %v6121_v28 = vpack.c.bf16 %v2871_v24, %v2868_v22  ;;  %v2876_v29 = vld [vmem:[#allocation4 + $0x260] sm:$0xff] }
 0xf49   : > { %v6095_v31 = vpack.c.bf16 %v2876_v29, %v2873_v2 }
 0xf4a   : > { %2743 = vmatprep.mubr.f32.mxu1 %v2605_v32  ;;  %2813 = vmatprep.mubr.f32.mxu0 %v2607_v25  ;;  %v2872_v32 = vld [vmem:[#allocation4 + $0x240] sm:$0xff]  ;;  %v2875_v25 = vld [vmem:[#allocation4 + $0x258] sm:$0xff] }
 0xf4b   : > { %2744 = vmatmul.mubr.f32.vlgmr.msra.gmra.mrb[28].mxu1 %v2604_v26  ;;  %2814 = vmatmul.mubr.f32.vlgmr.msra.gmra.mrb[14].mxu0 %v2606_v33  ;;  %v2874_v26 = vld [vmem:[#allocation4 + $0x250] sm:$0xff]  ;;  %v6097_v33 = vpack.c.bf16 %v2875_v25, %v2872_v32 }
 0xf4c   : > { %2978 = vmatprep.mubr.f32.mxu1 %v6992_v0  ;;  %5753 = vmatprep.mubr.msk.f32.mxu0 %vm6994_vm0, %v6992_v0 }
 0xf4d   : > { %6082 = vmatpush1.bf16.msra.mxu1 %v6081_v50  ;;  %6113 = vmatpush3.bf16.msra.mxu0 %v6112_v52  ;;  %v2889_v50 = vld [vmem:[#allocation4 + $0x2c8] sm:$0xff]  ;;  %v2891_v52 = vld [vmem:[#allocation4 + $0x2d8] sm:$0xff] }
 0xf4e   : > { %6084 = vmatprep.subr.bf16.mxu1 %v6083_v9  ;;  %6114 = vmatprep.subr.bf16.mxu0 %v6993_v1  ;;  %v6107_v9 = vpack.c.bf16 %v2894_v53, %v2891_v52 }
 0xf51   : > { %6116 = vmatpush3.bf16.msra.mxu0 %v6115_v58 }
 0xf52   : > { %6117 = vmatprep.subr.bf16.mxu0 %v6993_v1 }
 0xf55   : > { %6119 = vmatpush3.bf16.msra.mxu0 %v6118_v6 }
 0xf56   : > { %6120 = vmatprep.subr.bf16.mxu0 %v6993_v1 }
 0xf59   : > { %6122 = vmatpush3.bf16.msra.mxu0 %v6121_v28 }
 0xf5a   : > { %6123 = vmatprep.subr.bf16.mxu0 %v6993_v1 }
0x101e   : > { %v5397_v30 = vpop.f32.mrb[28].mxu1  ;;  %v5432_v34 = vpop.f32.mrb[14].mxu0 }
0x101f   : > { %v5398_v35 = vpop.f32.mrb[29].mxu1  ;;  %v5433_v36 = vpop.f32.mrb[15].mxu0 }
0x1020   : > { %v5399_v37 = vadd.f32 %v5398_v35, %v5397_v30  ;;  %v5434_v38 = vadd.f32 %v5433_v36, %v5432_v34  ;;  %v2877_v30 = vld [vmem:[#allocation4 + $0x268] sm:$0xff]  ;;  %v2879_v34 = vld [vmem:[#allocation4 + $0x278] sm:$0xff] }
0x1021   : > { %v6124_v35 = vpack.c.bf16 %v2877_v30, %v2874_v26 }
0x1022   : > { %v2746_v39 = vadd.f32 %v5399_v37, %v5264_v46  ;;  %v2882_v46 = vld [vmem:[#allocation4 + $0x290] sm:$0xff] }
0x1023   : > { %v6099_v36 = vpack.c.bf16 %v2882_v46, %v2879_v34  ;;  %v2878_v37 = vld [vmem:[#allocation4 + $0x270] sm:$0xff]  ;;  %6125 = vmatpush3.bf16.msra.mxu0 %v6124_v35 }
0x1024   : > { %v2816_v40 = vadd.f32 %v5434_v38, %v2746_v39  ;;  %v2881_v38 = vld [vmem:[#allocation4 + $0x288] sm:$0xff]  ;;  %v2880_v39 = vld [vmem:[#allocation4 + $0x280] sm:$0xff]  ;;  %6126 = vmatprep.subr.bf16.mxu0 %v6993_v1 }
0x1026   : > { %v2819_v41 = vadd.f32 %v2816_v40, %v7707_v51  ;;  %v6085_v51 = vpack.c.bf16 %v2857_v56, %v2854_v55  ;;  %v6101_v40 = vpack.c.bf16 %v2881_v38, %v2878_v37  ;;  %v6130_v55 = vpack.c.bf16 %v2889_v50, %v2886_v49  ;;  %v2890_v56 = vld [vmem:[#allocation4 + $0x2d0] sm:$0xff] }
0x1027   : > { %v6109_v58 = vpack.c.bf16 %v2893_v19, %v2890_v56 }
0x1028   : > { %2822 = vadd.xlane.f32.xlu0 %v2819_v41  ;;  %6086 = vmatpush1.bf16.msra.mxu1 %v6085_v51  ;;  %v2895_v51 = vld [vmem:[#allocation4 + $0x2f8] sm:$0xff] }
0x1029   : > { %6088 = vmatprep.subr.bf16.mxu1 %v6087_v62  ;;  %v6133_v59 = vpack.c.bf16 %v2895_v51, %v2892_v57 }
0x102c   : > { %6090 = vmatpush1.bf16.msra.mxu1 %v6089_v5  ;;  %v5266_v5 = vld [vmem:[#allocation21] ss:$0 sm:$0xff] }
0x102d   : > { %6092 = vmatprep.subr.bf16.mxu1 %v6091_v15 }
0x1030   : > { %6094 = vmatpush1.bf16.msra.mxu1 %v6093_v23 }
0x1031   : > { %6096 = vmatprep.subr.bf16.mxu1 %v6095_v31 }
0x1034   : > { %6098 = vmatpush1.bf16.msra.mxu1 %v6097_v33 }
0x1035   : > { %6100 = vmatprep.subr.bf16.mxu1 %v6099_v36 }
0x1038   : > { %6102 = vmatpush1.bf16.msra.mxu1 %v6101_v40 }
0x1039   : > { %6104 = vmatprep.subr.bf16.mxu1 %v6103_v45 }
0x103c   : > { %6106 = vmatpush1.bf16.msra.mxu1 %v6105_v54 }
0x103d   : > { %6108 = vmatprep.subr.bf16.mxu1 %v6107_v9 }
0x1040   : > { %6110 = vmatpush1.bf16.msra.mxu1 %v6109_v58 }
0x1041   : > { %5756 = vmatprep.subr.mxu1 %v6992_v0 }
0x10b5   : > { %v2823_v7 = vpop.xlane.xlu0 %2822 }
0x10b6   : > { %v2824_v8 = vmul.f32 0.0078125, %v2823_v7 }
0x10b8   : > { %v7725_v10 = vsub.f32 %v2819_v41, %v2824_v8  ;;  %v2883_v41 = vld [vmem:[#allocation4 + $0x298] sm:$0xff]  ;;  %v2897_v8 = vld [vmem:[#allocation6 + $0x3] sm:$0x7] }
0x10b9   : > { %v6127_v44 = vpack.c.bf16 %v2883_v41, %v2880_v39  ;;  %v2910_v21 = vrot.slane %v2897_v8, %v7548_v27 }
0x10ba   : > { %v2826_v11 = vmul.f32 %v7725_v10, %v7725_v10 }
0x10bb   : > { %6128 = vmatpush3.bf16.msra.mxu0 %v6127_v44 }
0x10bc   : > { %2827 = vadd.xlane.f32.xlu1 %v2826_v11  ;;  %6129 = vmatprep.subr.bf16.mxu0 %v6993_v1  ;;  %v2906_v11 = vrot.slane %v2897_v8, %v7525_v18 }
0x10bf   : > { %6131 = vmatpush3.bf16.msra.mxu0 %v6130_v55 }
0x10c0   : > { %6132 = vmatprep.subr.bf16.mxu0 %v6993_v1 }
0x10c3   : > { %6134 = vmatpush3.bf16.msra.mxu0 %v6133_v59 }
0x10c4   : > { %5796 = vmatprep.subr.mxu0 %v6992_v0 }
0x1149   : > { %v2828_v60 = vpop.xlane.xlu1 %2827 }
0x114a   : > { %v2829_v61 = vmul.f32 0.0078125, %v2828_v60 }
0x114c   : > { %v2830_v62 = vadd.f32 1e-05, %v2829_v61 }
0x114e   : > { %6503 = vrsqrt.f32 %v2830_v62 }
0x1158   : > { %v6504_v63 = vpop.eup %6503 }
0x1159   : > { %v2832_v4 = vmul.f32 %v6504_v63, %v7725_v10  ;;  %v2902_v10 = vrot.slane %v2897_v8, %v7528_v20 }
0x115b   : > { %v2839_v6 = vmul.f32 %v5265_v3, %v2832_v4 }
0x115d   : > { %v7736_v7 = vadd.f32 %v5266_v5, %v2839_v6 }
0x115f   : > { %2979 = vmatmul.mubr.f32.vlgmr.msra.gmra.mrb[30].mxu1 %v7736_v7  ;;  %5754 = vmatmul.mubr.f32.vlgmr.msra.gmra.mrb[16].mxu0 %v7736_v7 }
0x1160   : > { %5758 = vmatprep.mubr.msk.f32.mxu1 %vm6994_vm0, %v6992_v0  ;;  %5798 = vmatprep.mubr.msk.f32.mxu0 %vm6994_vm0, %v6992_v0 }
0x1232   : > { %v2980_v13 = vpop.f32.mrb[30].mxu1  ;;  %v3051_v14 = vpop.f32.mrb[16].mxu0 }
0x1233   : > { %v2982_v15 = vpop.f32.mrb[31].mxu1  ;;  %v5755_v16 = vpop.f32.mrb[17].mxu0  ;;  %v7751_v23 = vadd.f32 %v2980_v13, %v2902_v10  ;;  %v7754_v24 = vadd.f32 %v3051_v14, %v2910_v21 }
0x1234   : > { %v7747_v22 = vadd.f32 %v2982_v15, %v2906_v11 }
0x1236   : > { %5757 = vmatpush3.xpose.msk.msra.mxu1 %vm887_vm1, %v7747_v22 }
0x1237   : > { %5761 = vmatprep.subr.mxu1 %v6992_v0 }
0x1239   : > { %5759 = vmatmul.mubr.msk.f32.vlgmr.msra.gmra.mrb[32].mxu1 %vm887_vm1, %v7751_v23 }
0x123a   : > { %5762 = vmatpush3.msra.mxu1 %v7754_v24  ;;  %5763 = vmatprep.mubr.msk.f32.mxu1 %vm6994_vm0, %v6992_v0 }
0x123b   : > { %5766 = vmatprep.subr.mxu1 %v6992_v0 }
0x130c   : > { %v3127_v28 = vpop.f32.mrb[32].mxu1 }
0x130d   : > { %v3131_v2 = vmul.f32 0.25, %v3127_v28  ;;  %v5760_v29 = vpop.f32.mrb[33].mxu1 }
0x130f   : > { %v3132_v31 = vsel %vm965_vm2, %v3131_v2, -inf }
0x1310   : > { %3133 = vmax.xlane.f32.xlu0 %v3132_v31 }
0x1326   : > { %3218 = vrot.lane.b32.xlu0 %v7747_v22, %s6995_s6 }
0x139d   : > { %v3134_v32 = vpop.xlane.xlu0 %3133 }
0x139e   : > { %v3135_v25 = vsub.f32 %v3131_v2, %v3134_v32 }
0x13a0   : > { %v3136_v26 = vmul.f32 1.442695, %v3135_v25 }
0x13a1   : > { %v3219_v36 = vpop.permute.xlu0 %3218 }
0x13a2   : > { %6505 = vpow2.f32 %v3136_v26 }
0x13ac   : > { %v6506_v33 = vpop.eup %6505 }
0x13ad   : > { %v3138_v30 = vsel %vm965_vm2, %v6506_v33, 0.0 }
0x13ae   : > { %3139 = vadd.xlane.f32.xlu1 %v3138_v30 }
0x13bf   : > { %3216 = vrot.lane.b32.xlu1 %v7751_v23, %s6995_s6 }
0x143b   : > { %v3140_v34 = vpop.xlane.xlu1 %3139 }
0x143c   : > { %6507 = vrcp.f32 %v3140_v34 }
0x143f   : > { %v3217_v37 = vpop.permute.xlu1 %3216 }
0x1446   : > { %v6508_v46 = vpop.eup %6507 }
0x1447   : > { %v3142_v35 = vmul.f32 %v6508_v46, %v6506_v33 }
0x1449   : > { %5764 = vmatmul.mubr.msk.f32.vlgmr.msra.gmra.mrb[34].mxu1 %vm965_vm2, %v3142_v35 }
0x144a   : > { %5767 = vmatpush3.xpose.msk.msra.mxu1 %vm887_vm1, %v3219_v36  ;;  %5768 = vmatprep.mubr.msk.f32.mxu1 %vm6994_vm0, %v6992_v0 }
0x144b   : > { %5771 = vmatprep.subr.mxu1 %v6992_v0 }
0x144d   : > { %5769 = vmatmul.mubr.msk.f32.vlgmr.msra.gmra.mrb[36].mxu1 %vm887_vm1, %v3217_v37 }
0x144e   : > { %5773 = vmatprep.mubr.msk.f32.mxu1 %vm6994_vm0, %v6992_v0 }
0x151c   : > { %v7776_v38 = vpop.f32.mrb[34].mxu1 }
0x151d   : > { %v5765_v39 = vpop.f32.mrb[35].mxu1 }
0x1520   : > { %v3290_v40 = vpop.f32.mrb[36].mxu1 }
0x1521   : > { %v3294_v41 = vmul.f32 0.25, %v3290_v40  ;;  %v5770_v42 = vpop.f32.mrb[37].mxu1 }
0x1523   : > { %v3295_v43 = vsel %vm965_vm2, %v3294_v41, -inf }
0x1524   : > { %3296 = vmax.xlane.f32.xlu1 %v3295_v43 }
0x1535   : > { %3385 = vrot.lane.b32.xlu1 %v7747_v22, %s6996_s8 }
0x1539   : > { %3383 = vrot.lane.b32.xlu1 %v7751_v23, %s6996_s8 }
0x153d   : > { %3551 = vrot.lane.b32.xlu1 %v7747_v22, %s6997_s27 }
0x1541   : > { %3717 = vrot.lane.b32.xlu1 %v7747_v22, %s6998_s10 }
0x15b1   : > { %v3297_v44 = vpop.xlane.xlu1 %3296 }
0x15b2   : > { %v3298_v45 = vsub.f32 %v3294_v41, %v3297_v44 }
0x15b4   : > { %v3299_v47 = vmul.f32 1.442695, %v3298_v45 }
0x15b5   : > { %v3386_v48 = vpop.permute.xlu1 %3385 }
0x15b6   : > { %6509 = vpow2.f32 %v3299_v47 }
0x15b9   : > { %v3384_v49 = vpop.permute.xlu1 %3383 }
0x15bd   : > { %v7787_v50 = vpop.permute.xlu1 %3551 }
0x15c0   : > { %v6510_v52 = vpop.eup %6509 }
0x15c1   : > { %v3718_v53 = vpop.permute.xlu1 %3717  ;;  %v3301_v54 = vsel %vm965_vm2, %v6510_v52, 0.0 }
0x15c2   : > { %3302 = vadd.xlane.f32.xlu0 %v3301_v54  ;;  %5797 = vmatpush3.xpose.msk.msra.mxu0 %vm887_vm1, %v3718_v53 }
0x15c3   : > { %5806 = vmatprep.subr.mxu0 %v6992_v0 }
0x15d8   : > { %3307 = vrot.lane.b32.xlu0 %v7754_v24, %s6995_s6 }
0x164f   : > { %v3303_v55 = vpop.xlane.xlu0 %3302 }
0x1650   : > { %6511 = vrcp.f32 %v3303_v55 }
0x1653   : > { %v3308_v9 = vpop.permute.xlu0 %3307 }
0x1654   : > { %5772 = vmatpush3.msra.mxu1 %v3308_v9 }
0x1655   : > { %5776 = vmatprep.subr.mxu1 %v6992_v0 }
0x165a   : > { %v6512_v56 = vpop.eup %6511 }
0x165b   : > { %v3305_v19 = vmul.f32 %v6512_v56, %v6510_v52 }
0x165d   : > { %5774 = vmatmul.mubr.msk.f32.vlgmr.msra.gmra.mrb[38].mxu1 %vm965_vm2, %v3305_v19 }
0x165e   : > { %5777 = vmatpush3.xpose.msk.msra.mxu1 %vm887_vm1, %v3386_v48  ;;  %5778 = vmatprep.mubr.msk.f32.mxu1 %vm6994_vm0, %v6992_v0 }
0x165f   : > { %5781 = vmatprep.subr.mxu1 %v6992_v0 }
0x1661   : > { %5779 = vmatmul.mubr.msk.f32.vlgmr.msra.gmra.mrb[40].mxu1 %vm887_vm1, %v3384_v49 }
0x1662   : > { %5783 = vmatprep.mubr.msk.f32.mxu1 %vm6994_vm0, %v6992_v0 }
0x1730   : > { %v7803_v57 = vpop.f32.mrb[38].mxu1 }
0x1731   : > { %v5775_v51 = vpop.f32.mrb[39].mxu1 }
0x1734   : > { %v3457_v58 = vpop.f32.mrb[40].mxu1 }
0x1735   : > { %v3461_v59 = vmul.f32 0.25, %v3457_v58  ;;  %v5780_v60 = vpop.f32.mrb[41].mxu1 }
0x1737   : > { %v3462_v61 = vsel %vm965_vm2, %v3461_v59, -inf }
0x1738   : > { %3463 = vmax.xlane.f32.xlu0 %v3462_v61 }
0x174e   : > { %3473 = vrot.lane.b32.xlu0 %v7754_v24, %s6996_s8 }
0x1752   : > { %3549 = vrot.lane.b32.xlu0 %v7751_v23, %s6997_s27 }
0x1756   : > { %3715 = vrot.lane.b32.xlu0 %v7751_v23, %s6998_s10 }
0x175a   : > { %3881 = vrot.lane.b32.xlu0 %v7751_v23, %s6999_s25 }
0x175e   : > { %4047 = vrot.lane.b32.xlu0 %v7751_v23, %s7001_s1 }
0x1762   : > { %4213 = vrot.lane.b32.xlu0 %v7751_v23, %s7000_s17 }
0x17c5   : > { %v3464_v62 = vpop.xlane.xlu0 %3463 }
0x17c6   : > { %v3465_v63 = vsub.f32 %v3461_v59, %v3464_v62 }
0x17c8   : > { %v3466_v3 = vmul.f32 1.442695, %v3465_v63 }
0x17c9   : > { %v3474_v4 = vpop.permute.xlu0 %3473 }
0x17ca   : > { %6513 = vpow2.f32 %v3466_v3  ;;  %5782 = vmatpush3.msra.mxu1 %v3474_v4 }
0x17cb   : > { %5786 = vmatprep.subr.mxu1 %v6992_v0 }
0x17cd   : > { %v3550_v5 = vpop.permute.xlu0 %3549 }
0x17d1   : > { %v3716_v6 = vpop.permute.xlu0 %3715 }
0x17d2   : > { %5799 = vmatmul.mubr.msk.f32.vlgmr.msra.gmra.mrb[18].mxu0 %vm887_vm1, %v3716_v6 }
0x17d3   : > { %5808 = vmatprep.mubr.msk.f32.mxu0 %vm6994_vm0, %v6992_v0 }
0x17d4   : > { %v6514_v8 = vpop.eup %6513 }
0x17d5   : > { %v3468_v11 = vsel %vm965_vm2, %v6514_v8, 0.0  ;;  %v3882_v14 = vpop.permute.xlu0 %3881 }
0x17d6   : > { %3469 = vadd.xlane.f32.xlu1 %v3468_v11 }
0x17d9   : > { %v4048_v16 = vpop.permute.xlu0 %4047 }
0x17dd   : > { %v4214_v28 = vpop.permute.xlu0 %4213 }
0x17e7   : > { %3883 = vrot.lane.b32.xlu1 %v7747_v22, %s6999_s25 }
0x17eb   : > { %4049 = vrot.lane.b32.xlu1 %v7747_v22, %s7001_s1 }
0x17ef   : > { %4215 = vrot.lane.b32.xlu1 %v7747_v22, %s7000_s17 }
0x1863   : > { %v3470_v13 = vpop.xlane.xlu1 %3469 }
0x1864   : > { %6515 = vrcp.f32 %v3470_v13 }
0x1867   : > { %v3884_v10 = vpop.permute.xlu1 %3883 }
0x1868   : > { %5807 = vmatpush3.xpose.msk.msra.mxu0 %vm887_vm1, %v3884_v10 }
0x1869   : > { %5816 = vmatprep.subr.mxu0 %v6992_v0 }
0x186b   : > { %v4050_v15 = vpop.permute.xlu1 %4049  ;;  %5809 = vmatmul.mubr.msk.f32.vlgmr.msra.gmra.mrb[20].mxu0 %vm887_vm1, %v3882_v14 }
0x186c   : > { %5817 = vmatpush3.xpose.msk.msra.mxu0 %vm887_vm1, %v4050_v15  ;;  %5818 = vmatprep.mubr.msk.f32.mxu0 %vm6994_vm0, %v6992_v0 }
0x186d   : > { %5826 = vmatprep.subr.mxu0 %v6992_v0 }
0x186e   : > { %v6516_v21 = vpop.eup %6515 }
0x186f   : > { %v3472_v22 = vmul.f32 %v6516_v21, %v6514_v8  ;;  %v4216_v23 = vpop.permute.xlu1 %4215  ;;  %5819 = vmatmul.mubr.msk.f32.vlgmr.msra.gmra.mrb[22].mxu0 %vm887_vm1, %v4048_v16 }
0x1870   : > { %5827 = vmatpush3.xpose.msk.msra.mxu0 %vm887_vm1, %v4216_v23  ;;  %5828 = vmatprep.mubr.msk.f32.mxu0 %vm6994_vm0, %v6992_v0 }
0x1871   : > { %5784 = vmatmul.mubr.msk.f32.vlgmr.msra.gmra.mrb[42].mxu1 %vm965_vm2, %v3472_v22  ;;  %6135 = vmatprep.subr.bf16.mxu0 %v6993_v1 }
0x1872   : > { %5787 = vmatpush3.xpose.msk.msra.mxu1 %vm887_vm1, %v7787_v50  ;;  %5788 = vmatprep.mubr.msk.f32.mxu1 %vm6994_vm0, %v6992_v0 }
0x1873   : > { %5829 = vmatmul.mubr.msk.f32.vlgmr.msra.gmra.mrb[24].mxu0 %vm887_vm1, %v4214_v28  ;;  %5791 = vmatprep.subr.mxu1 %v6992_v0 }
0x1874   : > { %5868 = vmatprep.mubr.msk.f32.mxu0 %vm6994_vm0, %v6992_v0 }
0x1875   : > { %5789 = vmatmul.mubr.msk.f32.vlgmr.msra.gmra.mrb[44].mxu1 %vm887_vm1, %v3550_v5 }
0x1876   : > { %5793 = vmatprep.mubr.msk.f32.mxu1 %vm6994_vm0, %v6992_v0 }
0x18a5   : > { %v3789_v2 = vpop.f32.mrb[18].mxu0 }
0x18a6   : > { %v3793_v29 = vmul.f32 0.25, %v3789_v2  ;;  %v5800_v31 = vpop.f32.mrb[19].mxu0 }
0x18a8   : > { %v3794_v32 = vsel %vm965_vm2, %v3793_v29, -inf }
0x18a9   : > { %3795 = vmax.xlane.f32.xlu0 %v3794_v32 }
0x1936   : > { %v3796_v25 = vpop.xlane.xlu0 %3795 }
0x1937   : > { %v3797_v26 = vsub.f32 %v3793_v29, %v3796_v25 }
0x1939   : > { %v3798_v33 = vmul.f32 1.442695, %v3797_v26 }
0x193b   : > { %6517 = vpow2.f32 %v3798_v33 }
0x193e   : > { %v3955_v30 = vpop.f32.mrb[20].mxu0 }
0x193f   : > { %v3959_v34 = vmul.f32 0.25, %v3955_v30  ;;  %v5810_v46 = vpop.f32.mrb[21].mxu0 }
0x1941   : > { %v3960_v35 = vsel %vm965_vm2, %v3959_v34, -inf }
0x1942   : > { %3961 = vmax.xlane.f32.xlu0 %v3960_v35  ;;  %v4121_v36 = vpop.f32.mrb[22].mxu0 }
0x1943   : > { %v5820_v37 = vpop.f32.mrb[23].mxu0  ;;  %v4125_v50 = vmul.f32 0.25, %v4121_v36 }
0x1944   : > { %v3545_v39 = vpop.f32.mrb[42].mxu1  ;;  %v4415_v37 = vld [vmem:[#allocation7 + $0x80] sm:$0xff] }
0x1945   : > { %v5785_v40 = vpop.f32.mrb[43].mxu1  ;;  %v7856_v49 = vpop.eup %6517  ;;  %v4126_v54 = vsel %vm965_vm2, %v4125_v50, -inf }
0x1946   : > { %v4287_v41 = vpop.f32.mrb[24].mxu0  ;;  %v3800_v53 = vsel %vm965_vm2, %v7856_v49, 0.0  ;;  %v4417_v40 = vld [vmem:[#allocation7 + $0x90] sm:$0xff] }
0x1947   : > { %v4291_v42 = vmul.f32 0.25, %v4287_v41  ;;  %v5830_v43 = vpop.f32.mrb[25].mxu0 }
0x1948   : > { %v3623_v44 = vpop.f32.mrb[44].mxu1 }
0x1949   : > { %v3627_v45 = vmul.f32 0.25, %v3623_v44  ;;  %v5790_v47 = vpop.f32.mrb[45].mxu1  ;;  %v4292_v48 = vsel %vm965_vm2, %v4291_v42, -inf  ;;  %v4419_v44 = vld [vmem:[#allocation7 + $0xa0] sm:$0xff] }
0x194a   : > { %4293 = vmax.xlane.f32.xlu0 %v4292_v48  ;;  %v4421_v48 = vld [vmem:[#allocation7 + $0xb0] sm:$0xff] }
0x194b   : > { %v3628_v52 = vsel %vm965_vm2, %v3627_v45, -inf }
0x194c   : > { %3629 = vmax.xlane.f32.xlu1 %v3628_v52  ;;  %v4423_v52 = vld [vmem:[#allocation7 + $0xc0] sm:$0xff] }
0x194e   : > { %3801 = vadd.xlane.f32.xlu0 %v3800_v53  ;;  %v4424_v53 = vld [vmem:[#allocation7 + $0xc8] sm:$0xff] }
0x1950   : > { %4127 = vmax.xlane.f32.xlu1 %v4126_v54  ;;  %v6148_v54 = vpack.c.bf16 %v4424_v53, %v4423_v52  ;;  %v4548_v52 = vld [vmem:[#allocation13 + $0x240] sm:$0xff] }
0x1951   : > { %v4552_v53 = vld [vmem:[#allocation13 + $0x260] sm:$0xff] }
0x19cf   : > { %v3962_v55 = vpop.xlane.xlu0 %3961 }
0x19d0   : > { %v3963_v9 = vsub.f32 %v3959_v34, %v3962_v55  ;;  %v4425_v55 = vld [vmem:[#allocation7 + $0xd0] sm:$0xff] }
0x19d2   : > { %v3964_v56 = vmul.f32 1.442695, %v3963_v9  ;;  %v4426_v9 = vld [vmem:[#allocation7 + $0xd8] sm:$0xff] }
0x19d4   : > { %6519 = vpow2.f32 %v3964_v56  ;;  %v6151_v56 = vpack.c.bf16 %v4426_v9, %v4425_v55  ;;  %v6165_v55 = vpack.c.bf16 %v4552_v53, %v4548_v52  ;;  %v4554_v9 = vld [vmem:[#allocation13 + $0x270] sm:$0xff] }
0x19d7   : > { %v4294_v19 = vpop.xlane.xlu0 %4293 }
0x19d8   : > { %v4295_v51 = vsub.f32 %v4291_v42, %v4294_v19  ;;  %v4418_v42 = vld [vmem:[#allocation7 + $0x98] sm:$0xff]  ;;  %v4427_v19 = vld [vmem:[#allocation7 + $0xe0] sm:$0xff] }
0x19d9   : > { %v3630_v58 = vpop.xlane.xlu1 %3629  ;;  %v6139_v43 = vpack.c.bf16 %v4418_v42, %v4417_v40  ;;  %v4544_v40 = vld [vmem:[#allocation13 + $0x220] sm:$0xff] }
0x19da   : > { %v4296_v59 = vmul.f32 1.442695, %v4295_v51  ;;  %v3631_v11 = vsub.f32 %v3627_v45, %v3630_v58  ;;  %v4420_v45 = vld [vmem:[#allocation7 + $0xa8] sm:$0xff] }
0x19db   : > { %v3802_v15 = vpop.xlane.xlu0 %3801  ;;  %v6142_v47 = vpack.c.bf16 %v4420_v45, %v4419_v44  ;;  %v4428_v51 = vld [vmem:[#allocation7 + $0xe8] sm:$0xff]  ;;  %v4546_v44 = vld [vmem:[#allocation13 + $0x230] sm:$0xff] }
0x19dc   : > { %6521 = vpow2.f32 %v4296_v59  ;;  %v3632_v13 = vmul.f32 1.442695, %v3631_v11  ;;  %v6154_v58 = vpack.c.bf16 %v4428_v51, %v4427_v19  ;;  %v4549_v45 = vld [vmem:[#allocation13 + $0x248] sm:$0xff] }
0x19dd   : > { %v4128_v60 = vpop.xlane.xlu1 %4127  ;;  %v4561_v19 = vld [vmem:[#allocation13 + $0x2a8] sm:$0xff] }
0x19de   : > { %v6520_v61 = vpop.eup %6519  ;;  %v4129_v62 = vsub.f32 %v4125_v50, %v4128_v60  ;;  %v4429_v60 = vld [vmem:[#allocation7 + $0xf0] sm:$0xff] }
0x19df   : > { %v3966_v63 = vsel %vm965_vm2, %v6520_v61, 0.0 }
0x19e0   : > { %v4130_v3 = vmul.f32 1.442695, %v4129_v62  ;;  %3967 = vadd.xlane.f32.xlu1 %v3966_v63 }
0x19e2   : > { %6523 = vpow2.f32 %v4130_v3 }
0x19e3   : > { %6525 = vpow2.f32 %v3632_v13 }
0x19e6   : > { %v6522_v4 = vpop.eup %6521 }
0x19e7   : > { %v4298_v5 = vsel %vm965_vm2, %v6522_v4, 0.0 }
0x19e8   : > { %4299 = vadd.xlane.f32.xlu1 %v4298_v5 }
0x19ec   : > { %v6524_v6 = vpop.eup %6523 }
0x19ed   : > { %v4132_v8 = vsel %vm965_vm2, %v6524_v6, 0.0  ;;  %v6526_v14 = vpop.eup %6525 }
0x19ee   : > { %4133 = vadd.xlane.f32.xlu0 %v4132_v8  ;;  %v3634_v10 = vsel %vm965_vm2, %v6526_v14, 0.0 }
0x19f9   : > { %3805 = vrot.lane.b32.xlu1 %v7754_v24, %s6998_s10 }
0x1a04   : > { %3639 = vrot.lane.b32.xlu0 %v7754_v24, %s6997_s27 }
0x1a08   : > { %4137 = vrot.lane.b32.xlu0 %v7754_v24, %s7001_s1 }
0x1a0c   : > { %4380 = vrot.lane.b32.xlu0 %v7803_v57, %s7000_s17 }
0x1a1d   : > { %3635 = vadd.xlane.f32.xlu1 %v3634_v10 }
0x1a2e   : > { %3971 = vrot.lane.b32.xlu1 %v7754_v24, %s6999_s25 }
0x1a32   : > { %4303 = vrot.lane.b32.xlu1 %v7754_v24, %s7000_s17 }
0x1a36   : > { %4384 = vrot.lane.b32.xlu1 %v3545_v39, %s7001_s1  ;;  %v4416_v39 = vld [vmem:[#allocation7 + $0x88] sm:$0xff] }
0x1a37   : > { %v6136_v41 = vpack.c.bf16 %v4416_v39, %v4415_v37  ;;  %v4547_v37 = vld [vmem:[#allocation13 + $0x238] sm:$0xff]  ;;  %v4540_v39 = vld [vmem:[#allocation13 + $0x200] sm:$0xff] }
0x1a38   : > { %v6161_v42 = vpack.c.bf16 %v4544_v40, %v4540_v39  ;;  %v4585_v40 = vld [vmem:[#allocation13 + $0x368] sm:$0xff] }
0x1a39   : > { %6137 = vmatpush3.bf16.msra.mxu0 %v6136_v41 }
0x1a3a   : > { %6138 = vmatprep.subr.bf16.mxu0 %v6993_v1 }
0x1a3d   : > { %6140 = vmatpush3.bf16.msra.mxu0 %v6139_v43  ;;  %v4542_v43 = vld [vmem:[#allocation13 + $0x210] sm:$0xff] }
0x1a3e   : > { %6141 = vmatprep.subr.bf16.mxu0 %v6993_v1 }
0x1a41   : > { %6143 = vmatpush3.bf16.msra.mxu0 %v6142_v47  ;;  %v4553_v47 = vld [vmem:[#allocation13 + $0x268] sm:$0xff] }
0x1a42   : > { %6144 = vmatprep.subr.bf16.mxu0 %v6993_v1 }
0x1a6d   : > { %v3968_v57 = vpop.xlane.xlu1 %3967 }
0x1a75   : > { %v4300_v22 = vpop.xlane.xlu1 %4299 }
0x1a79   : > { %v3806_v23 = vpop.permute.xlu1 %3805 }
0x1a7b   : > { %v4134_v16 = vpop.xlane.xlu0 %4133 }
0x1a7f   : > { %v3640_v21 = vpop.permute.xlu0 %3639 }
0x1a80   : > { %5792 = vmatpush3.msra.mxu1 %v3640_v21 }
0x1a81   : > { %5801 = vmatprep.subr.mxu1 %v6992_v0 }
0x1a83   : > { %v4138_v30 = vpop.permute.xlu0 %4137 }
0x1aaa   : > { %v3636_v28 = vpop.xlane.xlu1 %3635 }
0x1aab   : > { %6527 = vrcp.f32 %v3636_v28 }
0x1aac   : > { %6529 = vrcp.f32 %v3802_v15 }
0x1aad   : > { %6531 = vrcp.f32 %v3968_v57 }
0x1aae   : > { %6533 = vrcp.f32 %v4134_v16  ;;  %v3972_v25 = vpop.permute.xlu1 %3971 }
0x1aaf   : > { %6535 = vrcp.f32 %v4300_v22 }
0x1ab2   : > { %v4304_v35 = vpop.permute.xlu1 %4303 }
0x1ab5   : > { %v6528_v2 = vpop.eup %6527 }
0x1ab6   : > { %v3638_v29 = vmul.f32 %v6528_v2, %v6526_v14  ;;  %v6530_v31 = vpop.eup %6529  ;;  %v4381_v14 = vpop.permute.xlu0 %4380 }
0x1ab7   : > { %v3804_v24 = vmul.f32 %v6530_v31, %v7856_v49  ;;  %v6532_v32 = vpop.eup %6531  ;;  %v4422_v49 = vld [vmem:[#allocation7 + $0xb8] sm:$0xff]  ;;  %v4385_v10 = vpop.permute.xlu1 %4384  ;;  %v4407_v21 = vsel %vm887_vm1, %v7776_v38, %v4381_v14  ;;  %v4565_v14 = vld [vmem:[#allocation13 + $0x2c8] sm:$0xff] }
0x1ab8   : > { %5794 = vmatmul.mubr.msk.f32.vlgmr.msra.gmra.mrb[46].mxu1 %vm965_vm2, %v3638_v29  ;;  %v3970_v26 = vmul.f32 %v6532_v32, %v6520_v61  ;;  %v6534_v33 = vpop.eup %6533  ;;  %v6145_v50 = vpack.c.bf16 %v4422_v49, %v4421_v48  ;;  %v4430_v61 = vld [vmem:[#allocation7 + $0xf8] sm:$0xff]  ;;  %v4408_v57 = vsel %vm2242_vm3, %v4407_v21, %v4385_v10  ;;  %v4569_v10 = vld [vmem:[#allocation13 + $0x2e8] sm:$0xff] }
0x1ab9   : > { %5802 = vmatpush3.msra.mxu1 %v3806_v23  ;;  %5803 = vmatprep.mubr.msk.f32.mxu1 %vm6994_vm0, %v6992_v0  ;;  %v4136_v34 = vmul.f32 %v6534_v33, %v6524_v6  ;;  %v6536_v46 = vpop.eup %6535  ;;  %v6157_v63 = vpack.c.bf16 %v4430_v61, %v4429_v60  ;;  %v4551_v48 = vld [vmem:[#allocation13 + $0x258] sm:$0xff]  ;;  %v4556_v61 = vld [vmem:[#allocation13 + $0x280] sm:$0xff] }
0x1aba   : > { %5811 = vmatprep.subr.mxu1 %v6992_v0  ;;  %v4302_v36 = vmul.f32 %v6536_v46, %v6522_v4  ;;  %6146 = vmatpush3.bf16.msra.mxu0 %v6145_v50  ;;  %v4545_v46 = vld [vmem:[#allocation13 + $0x228] sm:$0xff]  ;;  %v4555_v49 = vld [vmem:[#allocation13 + $0x278] sm:$0xff] }
0x1abb   : > { %6147 = vmatprep.subr.bf16.mxu0 %v6993_v1  ;;  %v6195_v50 = vpack.c.bf16 %v4555_v49, %v4551_v48  ;;  %v4563_v60 = vld [vmem:[#allocation13 + $0x2b8] sm:$0xff]  ;;  %v4586_v49 = vld [vmem:[#allocation13 + $0x370] sm:$0xff] }
0x1abc   : > { %5804 = vmatmul.mubr.msk.f32.vlgmr.msra.gmra.mrb[48].mxu1 %vm965_vm2, %v3804_v24  ;;  %v4571_v21 = vld [vmem:[#allocation13 + $0x2f8] sm:$0xff] }
0x1abd   : > { %5812 = vmatpush3.msra.mxu1 %v3972_v25  ;;  %5813 = vmatprep.mubr.msk.f32.mxu1 %vm6994_vm0, %v6992_v0  ;;  %v5291_v25 = vld [vmem:[#allocation9 + $0x1] ss:$0 sm:$0xff] }
0x1abe   : > { %5821 = vmatprep.subr.mxu1 %v6992_v0  ;;  %6149 = vmatpush3.bf16.msra.mxu0 %v6148_v54  ;;  %v4550_v54 = vld [vmem:[#allocation13 + $0x250] sm:$0xff] }
0x1abf   : > { %6150 = vmatprep.subr.bf16.mxu0 %v6993_v1  ;;  %v6197_v51 = vpack.c.bf16 %v4554_v9, %v4550_v54  ;;  %v4591_v54 = vld [vmem:[#allocation13 + $0x398] sm:$0xff]  ;;  %v4588_v9 = vld [vmem:[#allocation13 + $0x380] sm:$0xff] }
0x1ac0   : > { %5814 = vmatmul.mubr.msk.f32.vlgmr.msra.gmra.mrb[50].mxu1 %vm965_vm2, %v3970_v26 }
0x1ac1   : > { %5822 = vmatpush3.msra.mxu1 %v4138_v30  ;;  %5823 = vmatprep.mubr.msk.f32.mxu1 %vm6994_vm0, %v6992_v0 }
0x1ac2   : > { %5831 = vmatprep.subr.mxu1 %v6992_v0  ;;  %6152 = vmatpush3.bf16.msra.mxu0 %v6151_v56  ;;  %v4557_v56 = vld [vmem:[#allocation13 + $0x288] sm:$0xff] }
0x1ac3   : > { %6153 = vmatprep.subr.bf16.mxu0 %v6993_v1 }
0x1ac4   : > { %5824 = vmatmul.mubr.msk.f32.vlgmr.msra.gmra.mrb[52].mxu1 %vm965_vm2, %v4136_v34  ;;  %v4541_v34 = vld [vmem:[#allocation13 + $0x208] sm:$0xff] }
0x1ac5   : > { %5832 = vmatpush3.msra.mxu1 %v4304_v35  ;;  %5833 = vmatprep.mubr.msk.f32.mxu1 %vm6994_vm0, %v6992_v0  ;;  %v4543_v35 = vld [vmem:[#allocation13 + $0x218] sm:$0xff] }
0x1ac6   : > { %6155 = vmatpush3.bf16.msra.mxu0 %v6154_v58  ;;  %v6191_v41 = vpack.c.bf16 %v4547_v37, %v4543_v35  ;;  %v6167_v58 = vpack.c.bf16 %v4561_v19, %v4557_v56  ;;  %v4574_v35 = vld [vmem:[#allocation13 + $0x310] sm:$0xff]  ;;  %v4581_v37 = vld [vmem:[#allocation13 + $0x348] sm:$0xff]  ;;  %v4592_v19 = vld [vmem:[#allocation13 + $0x3a0] sm:$0xff] }
0x1ac7   : > { %6156 = vmatprep.subr.bf16.mxu0 %v6993_v1 }
0x1ac8   : > { %5834 = vmatmul.mubr.msk.f32.vlgmr.msra.gmra.mrb[54].mxu1 %vm965_vm2, %v4302_v36  ;;  %v6159_v36 = vpack.c.bf16 %v4545_v46, %v4541_v34 }
0x1ac9   : > { %4691 = vmatprep.mubr.f32.mxu1 %v6992_v0 }
0x1aca   : > { %6158 = vmatpush3.bf16.msra.mxu0 %v6157_v63  ;;  %6160 = vmatprep.subr.bf16.mxu1 %v6159_v36  ;;  %v4560_v63 = vld [vmem:[#allocation13 + $0x2a0] sm:$0xff]  ;;  %v4578_v36 = vld [vmem:[#allocation13 + $0x330] sm:$0xff] }
0x1acb   : > { %6192 = vmatprep.subr.bf16.mxu0 %v6191_v41  ;;  %6162 = vmatpush1.bf16.msra.mxu1 %v6161_v42  ;;  %v6209_v39 = vpack.c.bf16 %v4578_v36, %v4574_v35  ;;  %v4583_v41 = vld [vmem:[#allocation13 + $0x358] sm:$0xff]  ;;  %v4825_v36 = vld [vmem:[#allocation16 + $0x398] sm:$0xff] }
0x1acc   : > { %v4587_v42 = vld [vmem:[#allocation13 + $0x378] sm:$0xff] }
0x1acd   : > { %v4824_v35 = vld [vmem:[#allocation16 + $0x390] sm:$0xff] }
0x1b8b   : > { %v3711_v59 = vpop.f32.mrb[46].mxu1 }
0x1b8c   : > { %4388 = vrot.lane.b32.xlu0 %v3711_v59, %s6999_s25  ;;  %v5795_v62 = vpop.f32.mrb[47].mxu1  ;;  %v4559_v59 = vld [vmem:[#allocation13 + $0x298] sm:$0xff] }
0x1b8d   : > { %v6199_v62 = vpack.c.bf16 %v4563_v60, %v4559_v59  ;;  %v6185_v59 = vpack.c.bf16 %v4592_v19, %v4588_v9  ;;  %v4597_v60 = vld [vmem:[#allocation13 + $0x3c8] sm:$0xff]  ;;  %v4811_v19 = vld [vmem:[#allocation16 + $0x328] sm:$0xff] }
0x1b8f   : > { %v3877_v3 = vpop.f32.mrb[48].mxu1 }
0x1b90   : > { %4392 = vrot.lane.b32.xlu1 %v3877_v3, %s6998_s10  ;;  %v5805_v4 = vpop.f32.mrb[49].mxu1  ;;  %v4558_v3 = vld [vmem:[#allocation13 + $0x290] sm:$0xff] }
0x1b91   : > { %v4562_v4 = vld [vmem:[#allocation13 + $0x2b0] sm:$0xff] }
0x1b93   : > { %v4043_v5 = vpop.f32.mrb[50].mxu1 }
0x1b94   : > { %4396 = vrot.lane.b32.xlu0 %v4043_v5, %s6997_s27  ;;  %v5815_v6 = vpop.f32.mrb[51].mxu1  ;;  %v6169_v5 = vpack.c.bf16 %v4560_v63, %v4556_v61  ;;  %v4601_v61 = vld [vmem:[#allocation13 + $0x3e8] sm:$0xff] }
0x1b95   : > { %v6201_v6 = vpack.c.bf16 %v4562_v4, %v4558_v3  ;;  %v6187_v3 = vpack.c.bf16 %v4601_v61, %v4597_v60  ;;  %v4603_v4 = vld [vmem:[#allocation13 + $0x3f8] sm:$0xff]  ;;  %v4829_v60 = vld [vmem:[#allocation16 + $0x3b8] sm:$0xff] }
0x1b97   : > { %v4209_v8 = vpop.f32.mrb[52].mxu1 }
0x1b98   : > { %4400 = vrot.lane.b32.xlu1 %v4209_v8, %s6996_s8  ;;  %v5825_v11 = vpop.f32.mrb[53].mxu1 }
0x1b9b   : > { %v4375_v1 = vpop.f32.mrb[54].mxu1 }
0x1b9c   : > { %4404 = vrot.lane.b32.xlu0 %v4375_v1, %s6995_s6  ;;  %v5835_v13 = vpop.f32.mrb[55].mxu1 }
0x1bfe   : > { %v4389_v15 = vpop.permute.xlu0 %4388 }
0x1bff   : > { %v4409_v23 = vsel %vm2244_vm4, %v4408_v57, %v4389_v15  ;;  %v4567_v15 = vld [vmem:[#allocation13 + $0x2d8] sm:$0xff]  ;;  %v4564_v57 = vld [vmem:[#allocation13 + $0x2c0] sm:$0xff] }
0x1c02   : > { %v4393_v16 = vpop.permute.xlu1 %4392 }
0x1c03   : > { %v4410_v2 = vsel %vm2246_vm5, %v4409_v23, %v4393_v16  ;;  %v6171_v16 = vpack.c.bf16 %v4569_v10, %v4565_v14  ;;  %v6203_v23 = vpack.c.bf16 %v4571_v21, %v4567_v15  ;;  %v4790_v15 = vld [vmem:[#allocation16 + $0x280] sm:$0xff] }
0x1c04   : > { %v4822_v21 = vld [vmem:[#allocation16 + $0x380] sm:$0xff] }
0x1c06   : > { %v4397_v22 = vpop.permute.xlu0 %4396 }
0x1c07   : > { %v4411_v29 = vsel %vm2248_vm6, %v4410_v2, %v4397_v22  ;;  %v4568_v22 = vld [vmem:[#allocation13 + $0x2e0] sm:$0xff]  ;;  %v4566_v2 = vld [vmem:[#allocation13 + $0x2d0] sm:$0xff] }
0x1c0a   : > { %v4401_v28 = vpop.permute.xlu1 %4400 }
0x1c0b   : > { %v4412_v31 = vsel %vm2250_vm7, %v4411_v29, %v4401_v28  ;;  %v6173_v28 = vpack.c.bf16 %v4568_v22, %v4564_v57  ;;  %v4570_v29 = vld [vmem:[#allocation13 + $0x2f0] sm:$0xff] }
0x1c0c   : > { %v4823_v22 = vld [vmem:[#allocation16 + $0x388] sm:$0xff] }
0x1c0e   : > { %v4405_v24 = vpop.permute.xlu0 %4404 }
0x1c0f   : > { %v4413_v32 = vsel %vm2252_vm8, %v4412_v31, %v4405_v24  ;;  %v6205_v31 = vpack.c.bf16 %v4570_v29, %v4566_v2  ;;  %v4573_v24 = vld [vmem:[#allocation13 + $0x308] sm:$0xff] }
0x1c10   : > { %5869 = vmatmul.mubr.f32.vlgmr.msra.gmra.mrb[26].mxu0 %v4413_v32  ;;  %v4577_v32 = vld [vmem:[#allocation13 + $0x328] sm:$0xff] }
0x1c11   : > { %4762 = vmatprep.mubr.f32.mxu0 %v6992_v0  ;;  %v6193_v0 = vpack.c.bf16 %v4546_v44, %v4542_v43  ;;  %v6179_v43 = vpack.c.bf16 %v4585_v40, %v4581_v37  ;;  %v6211_v44 = vpack.c.bf16 %v4587_v42, %v4583_v41  ;;  %v4776_v41 = vld [vmem:[#allocation16 + $0x210] sm:$0xff]  ;;  %v4777_v42 = vld [vmem:[#allocation16 + $0x218] sm:$0xff] }
0x1c13   : > { %6194 = vmatpush1.bf16.msra.mxu0 %v6193_v0  ;;  %v4584_v0 = vld [vmem:[#allocation13 + $0x360] sm:$0xff] }
0x1c14   : > { %6196 = vmatprep.subr.bf16.mxu0 %v6195_v50  ;;  %v4593_v50 = vld [vmem:[#allocation13 + $0x3a8] sm:$0xff] }
0x1c17   : > { %6198 = vmatpush1.bf16.msra.mxu0 %v6197_v51  ;;  %v4590_v51 = vld [vmem:[#allocation13 + $0x390] sm:$0xff] }
0x1c18   : > { %6200 = vmatprep.subr.bf16.mxu0 %v6199_v62  ;;  %v4599_v62 = vld [vmem:[#allocation13 + $0x3d8] sm:$0xff] }
0x1c1b   : > { %6202 = vmatpush1.bf16.msra.mxu0 %v6201_v6  ;;  %v4600_v6 = vld [vmem:[#allocation13 + $0x3e0] sm:$0xff] }
0x1c1c   : > { %6204 = vmatprep.subr.bf16.mxu0 %v6203_v23  ;;  %v6255_v23 = vpack.c.bf16 %v4823_v22, %v4822_v21  ;;  %v4782_v21 = vld [vmem:[#allocation16 + $0x240] sm:$0xff] }
0x1c1f   : > { %6206 = vmatpush1.bf16.msra.mxu0 %v6205_v31  ;;  %v5292_v31 = vld [vmem:[#allocation10 + $0x1] ss:$0 sm:$0xff] }
0x1ce3   : > { %v4505_v38 = vpop.f32.mrb[26].mxu0 }
0x1ce4   : > { %v4506_v26 = vadd.f32 %v5291_v25, %v4505_v38  ;;  %v5870_v33 = vpop.f32.mrb[27].mxu0  ;;  %v4575_v25 = vld [vmem:[#allocation13 + $0x318] sm:$0xff]  ;;  %v6175_v38 = vpack.c.bf16 %v4577_v32, %v4573_v24 }
0x1ce5   : > { %v4572_v33 = vld [vmem:[#allocation13 + $0x300] sm:$0xff]  ;;  %v5293_v32 = vld [vmem:[#allocation12 + $0x1] ss:$0 sm:$0xff] }
0x1ce6   : > { %v4509_v30 = vadd.f32 %v4506_v26, %v7736_v7  ;;  %v6163_v7 = vpack.c.bf16 %v4553_v47, %v4549_v45  ;;  %v4579_v26 = vld [vmem:[#allocation13 + $0x338] sm:$0xff]  ;;  %v4580_v45 = vld [vmem:[#allocation13 + $0x340] sm:$0xff]  ;;  %v4582_v47 = vld [vmem:[#allocation13 + $0x350] sm:$0xff] }
0x1ce7   : > { %v6207_v34 = vpack.c.bf16 %v4579_v26, %v4575_v25  ;;  %v6181_v48 = vpack.c.bf16 %v4584_v0, %v4580_v45  ;;  %v6213_v52 = vpack.c.bf16 %v4586_v49, %v4582_v47  ;;  %v4774_v25 = vld [vmem:[#allocation16 + $0x200] sm:$0xff]  ;;  %v6259_v45 = vpack.c.bf16 %v4825_v36, %v4824_v35  ;;  %v4808_v0 = vld [vmem:[#allocation16 + $0x310] sm:$0xff]  ;;  %v4809_v47 = vld [vmem:[#allocation16 + $0x318] sm:$0xff] }
0x1ce8   : > { %4514 = vadd.xlane.f32.xlu1 %v4509_v30  ;;  %6164 = vmatprep.subr.bf16.mxu1 %v6163_v7  ;;  %v4589_v7 = vld [vmem:[#allocation13 + $0x388] sm:$0xff]  ;;  %v4795_v49 = vld [vmem:[#allocation16 + $0x2a8] sm:$0xff]  ;;  %v4817_v35 = vld [vmem:[#allocation16 + $0x358] sm:$0xff] }
0x1ce9   : > { %6166 = vmatpush1.bf16.msra.mxu1 %v6165_v55  ;;  %6208 = vmatprep.subr.bf16.mxu0 %v6207_v34  ;;  %v6183_v53 = vpack.c.bf16 %v4593_v50, %v4589_v7  ;;  %v4595_v55 = vld [vmem:[#allocation13 + $0x3b8] sm:$0xff]  ;;  %v4827_v7 = vld [vmem:[#allocation16 + $0x3a8] sm:$0xff]  ;;  %v6229_v50 = vpack.c.bf16 %v4777_v42, %v4776_v41  ;;  %v4802_v36 = vld [vmem:[#allocation16 + $0x2e0] sm:$0xff] }
0x1cea   : > { %6168 = vmatprep.subr.bf16.mxu1 %v6167_v58  ;;  %6210 = vmatpush1.bf16.msra.mxu0 %v6209_v39  ;;  %v6215_v56 = vpack.c.bf16 %v4595_v55, %v4591_v54  ;;  %v4594_v58 = vld [vmem:[#allocation13 + $0x3b0] sm:$0xff]  ;;  %v4792_v34 = vld [vmem:[#allocation16 + $0x290] sm:$0xff] }
0x1ceb   : > { %6212 = vmatprep.subr.bf16.mxu0 %v6211_v44  ;;  %v6217_v63 = vpack.c.bf16 %v4594_v58, %v4590_v51  ;;  %v4779_v54 = vld [vmem:[#allocation16 + $0x228] sm:$0xff]  ;;  %v4796_v51 = vld [vmem:[#allocation16 + $0x2b0] sm:$0xff]  ;;  %v4797_v58 = vld [vmem:[#allocation16 + $0x2b8] sm:$0xff] }
0x1ced   : > { %6170 = vmatpush1.bf16.msra.mxu1 %v6169_v5  ;;  %v4596_v5 = vld [vmem:[#allocation13 + $0x3c0] sm:$0xff] }
0x1cee   : > { %6172 = vmatprep.subr.bf16.mxu1 %v6171_v16  ;;  %6214 = vmatpush1.bf16.msra.mxu0 %v6213_v52  ;;  %v6189_v14 = vpack.c.bf16 %v4600_v6, %v4596_v5  ;;  %v4791_v16 = vld [vmem:[#allocation16 + $0x288] sm:$0xff]  ;;  %v6261_v52 = vpack.c.bf16 %v4809_v47, %v4808_v0  ;;  %v4812_v6 = vld [vmem:[#allocation16 + $0x330] sm:$0xff]  ;;  %v4786_v0 = vld [vmem:[#allocation16 + $0x260] sm:$0xff] }
0x1cef   : > { %6216 = vmatprep.subr.bf16.mxu0 %v6215_v56  ;;  %v6223_v57 = vpack.c.bf16 %v4791_v16, %v4790_v15  ;;  %v4810_v56 = vld [vmem:[#allocation16 + $0x320] sm:$0xff]  ;;  %v4787_v47 = vld [vmem:[#allocation16 + $0x268] sm:$0xff] }
0x1cf1   : > { %6174 = vmatpush1.bf16.msra.mxu1 %v6173_v28 }
0x1cf2   : > { %6176 = vmatprep.subr.bf16.mxu1 %v6175_v38  ;;  %6218 = vmatpush1.bf16.msra.mxu0 %v6217_v63  ;;  %v4775_v38 = vld [vmem:[#allocation16 + $0x208] sm:$0xff]  ;;  %v4780_v63 = vld [vmem:[#allocation16 + $0x230] sm:$0xff] }
0x1cf3   : > { %v6225_v39 = vpack.c.bf16 %v4775_v38, %v4774_v25 }
0x1d75   : > { %v4515_v8 = vpop.xlane.xlu1 %4514 }
0x1d76   : > { %v4516_v11 = vmul.f32 0.0078125, %v4515_v8  ;;  %v6219_v8 = vpack.c.bf16 %v4603_v4, %v4599_v62  ;;  %v6265_v62 = vpack.c.bf16 %v4811_v19, %v4810_v56  ;;  %v6235_v4 = vpack.c.bf16 %v4797_v58, %v4796_v51  ;;  %v4789_v56 = vld [vmem:[#allocation16 + $0x278] sm:$0xff]  ;;  %v4820_v58 = vld [vmem:[#allocation16 + $0x370] sm:$0xff] }
0x1d78   : > { %v7920_v1 = vsub.f32 %v4509_v30, %v4516_v11  ;;  %v4576_v30 = vld [vmem:[#allocation13 + $0x320] sm:$0xff]  ;;  %v4598_v11 = vld [vmem:[#allocation13 + $0x3d0] sm:$0xff]  ;;  %6220 = vmatprep.subr.bf16.mxu0 %v6219_v8 }
0x1d79   : > { %v6177_v46 = vpack.c.bf16 %v4576_v30, %v4572_v33  ;;  %v4806_v33 = vld [vmem:[#allocation16 + $0x300] sm:$0xff]  ;;  %v4807_v30 = vld [vmem:[#allocation16 + $0x308] sm:$0xff]  ;;  %v4813_v8 = vld [vmem:[#allocation16 + $0x338] sm:$0xff] }
0x1d7a   : > { %v4518_v13 = vmul.f32 %v7920_v1, %v7920_v1  ;;  %v6257_v40 = vpack.c.bf16 %v4807_v30, %v4806_v33  ;;  %v6269_v16 = vpack.c.bf16 %v4813_v8, %v4812_v6  ;;  %v4785_v33 = vld [vmem:[#allocation16 + $0x258] sm:$0xff] }
0x1d7b   : > { %6178 = vmatpush1.bf16.msra.mxu1 %v6177_v46  ;;  %v4793_v46 = vld [vmem:[#allocation16 + $0x298] sm:$0xff] }
0x1d7c   : > { %4519 = vadd.xlane.f32.xlu0 %v4518_v13  ;;  %6180 = vmatprep.subr.bf16.mxu1 %v6179_v43  ;;  %v4602_v13 = vld [vmem:[#allocation13 + $0x3f0] sm:$0xff]  ;;  %v6227_v44 = vpack.c.bf16 %v4793_v46, %v4792_v34  ;;  %v4816_v46 = vld [vmem:[#allocation16 + $0x350] sm:$0xff] }
0x1d7d   : > { %v6221_v10 = vpack.c.bf16 %v4602_v13, %v4598_v11  ;;  %v4798_v11 = vld [vmem:[#allocation16 + $0x2c0] sm:$0xff]  ;;  %v4799_v13 = vld [vmem:[#allocation16 + $0x2c8] sm:$0xff]  ;;  %v6277_v42 = vpack.c.bf16 %v4817_v35, %v4816_v46 }
0x1d7e   : > { %v6239_v22 = vpack.c.bf16 %v4799_v13, %v4798_v11  ;;  %v5295_v46 = vld [vmem:[#allocation19 + $0x1] ss:$0 sm:$0xff] }
0x1d7f   : > { %6182 = vmatpush1.bf16.msra.mxu1 %v6181_v48  ;;  %6222 = vmatpush1.bf16.msra.mxu0 %v6221_v10  ;;  %v4794_v48 = vld [vmem:[#allocation16 + $0x2a0] sm:$0xff]  ;;  %v4831_v10 = vld [vmem:[#allocation16 + $0x3c8] sm:$0xff] }
0x1d80   : > { %6184 = vmatprep.subr.bf16.mxu1 %v6183_v53  ;;  %6256 = vmatprep.subr.bf16.mxu0 %v6255_v23  ;;  %v4778_v53 = vld [vmem:[#allocation16 + $0x220] sm:$0xff]  ;;  %v6231_v55 = vpack.c.bf16 %v4795_v49, %v4794_v48  ;;  %v6249_v49 = vpack.c.bf16 %v4787_v47, %v4786_v0 }
0x1d81   : > { %v6233_v61 = vpack.c.bf16 %v4779_v54, %v4778_v53  ;;  %v4818_v48 = vld [vmem:[#allocation16 + $0x360] sm:$0xff]  ;;  %v4836_v53 = vld [vmem:[#allocation16 + $0x3f0] sm:$0xff] }
0x1d83   : > { %6186 = vmatpush1.bf16.msra.mxu1 %v6185_v59  ;;  %v4828_v59 = vld [vmem:[#allocation16 + $0x3b0] sm:$0xff] }
0x1d84   : > { %6188 = vmatprep.subr.bf16.mxu1 %v6187_v3  ;;  %v4781_v3 = vld [vmem:[#allocation16 + $0x238] sm:$0xff]  ;;  %v6267_v5 = vpack.c.bf16 %v4829_v60, %v4828_v59 }
0x1d85   : > { %v6237_v15 = vpack.c.bf16 %v4781_v3, %v4780_v63  ;;  %v4821_v59 = vld [vmem:[#allocation16 + $0x378] sm:$0xff] }
0x1d86   : > { %v6285_v60 = vpack.c.bf16 %v4821_v59, %v4820_v58 }
0x1d87   : > { %6190 = vmatpush1.bf16.msra.mxu1 %v6189_v14  ;;  %v4830_v14 = vld [vmem:[#allocation16 + $0x3c0] sm:$0xff] }
0x1d88   : > { %6224 = vmatprep.subr.bf16.mxu1 %v6223_v57  ;;  %v4783_v57 = vld [vmem:[#allocation16 + $0x248] sm:$0xff]  ;;  %v6271_v23 = vpack.c.bf16 %v4831_v10, %v4830_v14 }
0x1d89   : > { %v6241_v25 = vpack.c.bf16 %v4783_v57, %v4782_v21 }
0x1e09   : > { %v4520_v28 = vpop.xlane.xlu0 %4519 }
0x1e0a   : > { %v4521_v2 = vmul.f32 0.0078125, %v4520_v28  ;;  %v4814_v28 = vld [vmem:[#allocation16 + $0x340] sm:$0xff] }
0x1e0c   : > { %v4522_v29 = vadd.f32 1e-05, %v4521_v2  ;;  %v4815_v2 = vld [vmem:[#allocation16 + $0x348] sm:$0xff] }
0x1e0d   : > { %v6273_v38 = vpack.c.bf16 %v4815_v2, %v4814_v28 }
0x1e0e   : > { %6537 = vrsqrt.f32 %v4522_v29  ;;  %v4800_v29 = vld [vmem:[#allocation16 + $0x2d0] sm:$0xff] }
0x1e18   : > { %v6538_v24 = vpop.eup %6537 }
0x1e19   : > { %v4524_v26 = vmul.f32 %v6538_v24, %v7920_v1  ;;  %v4826_v1 = vld [vmem:[#allocation16 + $0x3a0] sm:$0xff]  ;;  %v4832_v24 = vld [vmem:[#allocation16 + $0x3d0] sm:$0xff] }
0x1e1a   : > { %v6263_v9 = vpack.c.bf16 %v4827_v7, %v4826_v1  ;;  %v4819_v1 = vld [vmem:[#allocation16 + $0x368] sm:$0xff] }
0x1e1b   : > { %v4531_v37 = vmul.f32 %v5292_v31, %v4524_v26  ;;  %v4801_v31 = vld [vmem:[#allocation16 + $0x2d8] sm:$0xff]  ;;  %v4784_v26 = vld [vmem:[#allocation16 + $0x250] sm:$0xff]  ;;  %v6281_v7 = vpack.c.bf16 %v4819_v1, %v4818_v48 }
0x1e1c   : > { %v6243_v30 = vpack.c.bf16 %v4801_v31, %v4800_v29  ;;  %v6245_v41 = vpack.c.bf16 %v4785_v33, %v4784_v26 }
0x1e1d   : > { %v7925_v43 = vadd.f32 %v5293_v32, %v4531_v37  ;;  %v4833_v32 = vld [vmem:[#allocation16 + $0x3d8] sm:$0xff]  ;;  %v4803_v37 = vld [vmem:[#allocation16 + $0x2e8] sm:$0xff] }
0x1e1e   : > { %v6275_v34 = vpack.c.bf16 %v4833_v32, %v4832_v24 }
0x1e1f   : > { %4692 = vmatmul.mubr.f32.vlgmr.msra.gmra.mrb[56].mxu1 %v7925_v43  ;;  %4763 = vmatmul.mubr.f32.vlgmr.msra.gmra.mrb[28].mxu0 %v7925_v43 }
0x1e20   : > { %6226 = vmatpush3.bf16.msra.mxu1 %v6225_v39  ;;  %6258 = vmatpush3.bf16.msra.mxu0 %v6257_v40  ;;  %v4834_v39 = vld [vmem:[#allocation16 + $0x3e0] sm:$0xff]  ;;  %v4835_v40 = vld [vmem:[#allocation16 + $0x3e8] sm:$0xff] }
0x1e21   : > { %6228 = vmatprep.subr.bf16.mxu1 %v6227_v44  ;;  %6260 = vmatprep.subr.bf16.mxu0 %v6259_v45  ;;  %v6247_v44 = vpack.c.bf16 %v4803_v37, %v4802_v36  ;;  %v6279_v45 = vpack.c.bf16 %v4835_v40, %v4834_v39  ;;  %v5296_v36 = vld [vmem:[#allocation21 + $0x1] ss:$0 sm:$0xff] }
0x1e24   : > { %6230 = vmatpush3.bf16.msra.mxu1 %v6229_v50  ;;  %6262 = vmatpush3.bf16.msra.mxu0 %v6261_v52  ;;  %v4804_v50 = vld [vmem:[#allocation16 + $0x2f0] sm:$0xff]  ;;  %v4805_v52 = vld [vmem:[#allocation16 + $0x2f8] sm:$0xff] }
0x1e25   : > { %6232 = vmatprep.subr.bf16.mxu1 %v6231_v55  ;;  %6264 = vmatprep.subr.bf16.mxu0 %v6263_v9  ;;  %v6251_v54 = vpack.c.bf16 %v4805_v52, %v4804_v50  ;;  %v4837_v55 = vld [vmem:[#allocation16 + $0x3f8] sm:$0xff]  ;;  %v4788_v9 = vld [vmem:[#allocation16 + $0x270] sm:$0xff] }
0x1e26   : > { %v6283_v19 = vpack.c.bf16 %v4837_v55, %v4836_v53  ;;  %v6253_v51 = vpack.c.bf16 %v4789_v56, %v4788_v9 }
0x1e28   : > { %6234 = vmatpush3.bf16.msra.mxu1 %v6233_v61  ;;  %6266 = vmatpush3.bf16.msra.mxu0 %v6265_v62  ;;  %v4605_v61 = vld [vmem:[#allocation15 + $0x4] sm:$0xf] }
0x1e29   : > { %6236 = vmatprep.subr.bf16.mxu1 %v6235_v4  ;;  %6268 = vmatprep.subr.bf16.mxu0 %v6267_v5  ;;  %v4610_v62 = vrot.slane %v4605_v61, %v7528_v20  ;;  %v4618_v63 = vrot.slane %v4605_v61, %v7548_v27  ;;  %v4614_v3 = vrot.slane %v4605_v61, %v7525_v18 }
0x1e2a   : > { %v4622_v4 = vrot.slane %v4605_v61, %v2456_v12 }
0x1e2c   : > { %6238 = vmatpush3.bf16.msra.mxu1 %v6237_v15  ;;  %6270 = vmatpush3.bf16.msra.mxu0 %v6269_v16 }
0x1e2d   : > { %6240 = vmatprep.subr.bf16.mxu1 %v6239_v22  ;;  %6272 = vmatprep.subr.bf16.mxu0 %v6271_v23 }
0x1e30   : > { %6242 = vmatpush3.bf16.msra.mxu1 %v6241_v25  ;;  %6274 = vmatpush3.bf16.msra.mxu0 %v6273_v38 }
0x1e31   : > { %6244 = vmatprep.subr.bf16.mxu1 %v6243_v30  ;;  %6276 = vmatprep.subr.bf16.mxu0 %v6275_v34 }
0x1e34   : > { %6246 = vmatpush3.bf16.msra.mxu1 %v6245_v41  ;;  %6278 = vmatpush3.bf16.msra.mxu0 %v6277_v42 }
0x1e35   : > { %6248 = vmatprep.subr.bf16.mxu1 %v6247_v44  ;;  %6280 = vmatprep.subr.bf16.mxu0 %v6279_v45 }
0x1e38   : > { %6250 = vmatpush3.bf16.msra.mxu1 %v6249_v49  ;;  %6282 = vmatpush3.bf16.msra.mxu0 %v6281_v7 }
0x1e39   : > { %6252 = vmatprep.subr.bf16.mxu1 %v6251_v54  ;;  %6284 = vmatprep.subr.bf16.mxu0 %v6283_v19 }
0x1e3c   : > { %6254 = vmatpush3.bf16.msra.mxu1 %v6253_v51  ;;  %6286 = vmatpush3.bf16.msra.mxu0 %v6285_v60 }
0x1ef2   : > { %v4693_v5 = vpop.f32.mrb[56].mxu1  ;;  %v4764_v6 = vpop.f32.mrb[28].mxu0 }
0x1ef3   : > { %v4694_v8 = vadd.f32 %v4693_v5, %v4610_v62  ;;  %v4765_v11 = vadd.f32 %v4764_v6, %v4618_v63  ;;  %v4695_v13 = vpop.f32.mrb[57].mxu1  ;;  %v4766_v14 = vpop.f32.mrb[29].mxu0 }
0x1ef4   : > { %v4696_v10 = vadd.f32 %v4695_v13, %v4614_v3  ;;  %v4767_v15 = vadd.f32 %v4766_v14, %v4622_v4 }
0x1ef5   : > { %v4769_v57 = vmax.f32 %v4694_v8, 0.0  ;;  %v4771_v22 = vmax.f32 %v4765_v11, 0.0 }
0x1ef6   : > { %v4770_v16 = vmax.f32 %v4696_v10, 0.0  ;;  %v4772_v21 = vmax.f32 %v4767_v15, 0.0 }
0x1ef8   : > { %4910 = vmatprep.mubr.f32.mxu1 %v4770_v16  ;;  %4980 = vmatprep.mubr.f32.mxu0 %v4772_v21 }
0x1ef9   : > { %4911 = vmatmul.mubr.f32.vlgmr.msra.gmra.mrb[58].mxu1 %v4769_v57  ;;  %4981 = vmatmul.mubr.f32.vlgmr.msra.gmra.mrb[30].mxu0 %v4771_v22 }
0x1fcc   : > { %v5533_v18 = vpop.f32.mrb[58].mxu1  ;;  %v5568_v20 = vpop.f32.mrb[30].mxu0 }
0x1fcd   : > { %v5534_v27 = vpop.f32.mrb[59].mxu1  ;;  %v5569_v12 = vpop.f32.mrb[31].mxu0 }
0x1fce   : > { %v5535_v23 = vadd.f32 %v5534_v27, %v5533_v18  ;;  %v5570_v28 = vadd.f32 %v5569_v12, %v5568_v20 }
0x1fd0   : > { %v4913_v2 = vadd.f32 %v5535_v23, %v5294_v17 }
0x1fd2   : > { %v4983_v29 = vadd.f32 %v5570_v28, %v4913_v2 }
0x1fd4   : > { %v4986_v31 = vadd.f32 %v4983_v29, %v7925_v43 }
0x1fd6   : > { %4991 = vadd.xlane.f32.xlu0 %v4986_v31 }
0x2063   : > { %v4992_v24 = vpop.xlane.xlu0 %4991 }
0x2064   : > { %v4993_v32 = vmul.f32 0.0078125, %v4992_v24 }
0x2066   : > { %v4994_v25 = vsub.f32 %v4986_v31, %v4993_v32 }
0x2068   : > { %v4995_v38 = vmul.f32 %v4994_v25, %v4994_v25 }
0x206a   : > { %4996 = vadd.xlane.f32.xlu1 %v4995_v38 }
0x20f7   : > { %v4997_v26 = vpop.xlane.xlu1 %4996 }
0x20f8   : > { %v4998_v33 = vmul.f32 0.0078125, %v4997_v26 }
0x20fa   : > { %v4999_v30 = vadd.f32 1e-05, %v4998_v33 }
0x20fc   : > { %6539 = vrsqrt.f32 %v4999_v30 }
0x2106   : > { %v6540_v34 = vpop.eup %6539 }
0x2107   : > { %v5001_v35 = vmul.f32 %v6540_v34, %v4994_v25 }
0x2109   : > { %v5008_v37 = vmul.f32 %v5295_v46, %v5001_v35 }
0x210b   : > { %v5015_v43 = vadd.f32 %v5296_v36, %v5008_v37 }
0x210d   : > { %5016 = vst [vmem:[%s670_s0] sm:$0xff] %v5015_v43 }
0x210e PF: > { %p30_p9 = scmp.ge.s32.totalorder %s7397_s23, 4   ;;  %s8024_s29 = smov %s6957_s30 }
0x210f   : > { %s8025_s30 = smov %s6961_s15  ;;  %s8026_s15 = smov %s7409_s28 }
0x2110   : > { %s8027_s16 = smov %s7397_s23  ;;  %32 = sbr.rel (!%p30_p9) target bundleno = 18 (0x12), region = 179 }
0x2117   :  { %5036 = vsyncpa [#allocation3], 1 }
0x2118   :  { %5038 = vsyncpa [#allocation3 + $0x1], 1 }
0x2119   :  { %5039 = vsyncpa [#allocation5], 1 }
0x211a   :  { %5040 = vsyncpa [#allocation8], 1 }
0x211b   :  { %5041 = vsyncpa [#allocation11], 1 }
0x211c   :  { %5042 = vsyncpa [#allocation14], 1 }
0x211d   :  { %5043 = vsyncpa [#allocation17], 1 }
0x211e   :  { %5044 = vsyncpa [#allocation20], 1 }

</bundles_post_ra>
